<compile_context>
chip_gen: v7x
topology: tpu7x:2x2x1
jax: 0.10.0
libtpu: 0.0.40
codegen_flags: <defaults>
</compile_context>

<pallas_src>
import math
import functools

import jax
import jax.numpy as jnp
from jax.experimental import pallas as pl
from jax.experimental.pallas import tpu as pltpu

_VMEM_LIMIT = 32 * 1024 * 1024          # safe on v5e/v6e (128 MiB) and v7x (64 MiB)
_COMPUTE_DTYPE = jnp.bfloat16           # MXU input dtype; accumulation stays f32


def _pick_tile(dim, target, align):
    """Largest tile <= target that is the full dim or an align-multiple divisor."""
    if dim <= target:
        return dim
    t = (target // align) * align
    while t >= align:
        if dim % t == 0:
            return t
        t -= align
    return dim  # fall back to whole dim (always legal: equals full array dim)


# ----------------------------------------------------------------------------
# Generic tiled linear:  y = relu?(x @ w + b)
# ----------------------------------------------------------------------------
def _linear_kernel(x_ref, w_ref, b_ref, o_ref, acc_ref, *, apply_relu):
    k = pl.program_id(2)

    @pl.when(k == 0)
    def _init():
        acc_ref[...] = jnp.zeros_like(acc_ref)

    acc_ref[...] += jnp.dot(
        x_ref[...].astype(_COMPUTE_DTYPE),
        w_ref[...].astype(_COMPUTE_DTYPE),
        preferred_element_type=jnp.float32)

    @pl.when(k == pl.num_programs(2) - 1)
    def _store():
        y = acc_ref[...] + b_ref[...].astype(jnp.float32)   # bias only in epilogue
        if apply_relu:
            y = jnp.maximum(y, 0.0)
        o_ref[...] = y.astype(o_ref.dtype)


def linear(x, w, b, apply_relu=False, *, tm_target=256, tn_target=256, tk_target=512):
    """x: (M, K) f32, w: (K, N) bf16/f32, b: (N,) f32 -> (M, N) f32."""
    M, K = x.shape
    N = w.shape[1]
    tm = _pick_tile(M, tm_target, 8)
    tn = _pick_tile(N, tn_target, 128)
    tk = _pick_tile(K, tk_target, 128)
    grid = (M // tm, N // tn, K // tk)
    return pl.pallas_call(
        functools.partial(_linear_kernel, apply_relu=apply_relu),
        out_shape=jax.ShapeDtypeStruct((M, N), jnp.float32),
        grid=grid,
        in_specs=[
            pl.BlockSpec((tm, tk), lambda i, j, k: (i, k)),
            pl.BlockSpec((tk, tn), lambda i, j, k: (k, j)),
            pl.BlockSpec((1, tn), lambda i, j, k: (0, j)),
        ],
        out_specs=pl.BlockSpec((tm, tn), lambda i, j, k: (i, j)),
        scratch_shapes=[pltpu.VMEM((tm, tn), jnp.float32)],
        compiler_params=pltpu.CompilerParams(
            dimension_semantics=("parallel", "parallel", "arbitrary"),
            vmem_limit_bytes=_VMEM_LIMIT),
    )(x, w, b.reshape(1, N))


# ----------------------------------------------------------------------------
# Fused attention block:
#   LayerNorm( x + OutProj( MultiHeadAttention( QKVProj(x) ) ) )
# Gridded over batch; heads handled with a static unrolled loop inside the
# kernel so q/k/v/attn never touch HBM.  The 1/sqrt(Dh) scale is pre-folded
# into wq/bq at init time.
# ----------------------------------------------------------------------------
def _attn_block_kernel(x_ref, wq_ref, wk_ref, wv_ref, bq_ref, bk_ref, bv_ref,
                       wo_ref, bo_ref, g_ref, beta_ref, o_ref,
                       *, nhead, eps):
    x = x_ref[0].astype(jnp.float32)                  # (S, D)
    x_c = x.astype(_COMPUTE_DTYPE)
    S, D = x.shape

    attn_out = jnp.zeros((S, D), jnp.float32)
    # TODO(synk): for long sequences (S >~ 1-2K) replace the full (S,S) score
    # matrix with an online-softmax (flash) kv-tile loop; fine at these shapes.
    for h in range(nhead):
        q = jnp.dot(x_c, wq_ref[h], preferred_element_type=jnp.float32) + bq_ref[h]
        k = jnp.dot(x_c, wk_ref[h], preferred_element_type=jnp.float32) + bk_ref[h]
        v = jnp.dot(x_c, wv_ref[h], preferred_element_type=jnp.float32) + bv_ref[h]
        s = jax.lax.dot_general(                       # (S, S) = q @ k^T
            q.astype(_COMPUTE_DTYPE), k.astype(_COMPUTE_DTYPE),
            (((1,), (1,)), ((), ())),
            preferred_element_type=jnp.float32)
        s = s - jnp.max(s, axis=-1, keepdims=True)
        p = jnp.exp(s)
        p = p * pl.reciprocal(jnp.sum(p, axis=-1, keepdims=True), approx=True)
        o_h = jnp.dot(p.astype(_COMPUTE_DTYPE), v.astype(_COMPUTE_DTYPE),
                      preferred_element_type=jnp.float32)          # (S, Dh)
        # accumulate this head's contribution of the output projection directly
        attn_out = attn_out + jnp.dot(o_h.astype(_COMPUTE_DTYPE), wo_ref[h],
                                      preferred_element_type=jnp.float32)
    attn_out = attn_out + bo_ref[...]

    h1 = x + attn_out                                  # residual (f32)
    mu = jnp.mean(h1, axis=-1, keepdims=True)
    var = jnp.mean((h1 - mu) ** 2, axis=-1, keepdims=True)
    hn = (h1 - mu) * jax.lax.rsqrt(var + eps)
    o_ref[0] = (hn * g_ref[...] + beta_ref[...]).astype(o_ref.dtype)


def attn_block(x, p, *, nhead, eps=1e-5):
    B, S, D = x.shape
    Dh = D // nhead
    w3 = lambda b: (0, 0, 0)
    w2 = lambda b: (0, 0)
    return pl.pallas_call(
        functools.partial(_attn_block_kernel, nhead=nhead, eps=eps),
        out_shape=jax.ShapeDtypeStruct((B, S, D), jnp.float32),
        grid=(B,),
        in_specs=[
            pl.BlockSpec((1, S, D), lambda b: (b, 0, 0)),
            pl.BlockSpec((nhead, D, Dh), w3),
            pl.BlockSpec((nhead, D, Dh), w3),
            pl.BlockSpec((nhead, D, Dh), w3),
            pl.BlockSpec((nhead, 1, Dh), w3),
            pl.BlockSpec((nhead, 1, Dh), w3),
            pl.BlockSpec((nhead, 1, Dh), w3),
            pl.BlockSpec((nhead, Dh, D), w3),
            pl.BlockSpec((1, D), w2),
            pl.BlockSpec((1, D), w2),
            pl.BlockSpec((1, D), w2),
        ],
        out_specs=pl.BlockSpec((1, S, D), lambda b: (b, 0, 0)),
        compiler_params=pltpu.CompilerParams(
            dimension_semantics=("parallel",),
            vmem_limit_bytes=_VMEM_LIMIT),
    )(x, p["wq_h"], p["wk_h"], p["wv_h"],
      p["bq_h"], p["bk_h"], p["bv_h"],
      p["wo_h"], p["out_proj_b"].reshape(1, D),
      p["ln1_g"].reshape(1, D), p["ln1_b"].reshape(1, D))


# ----------------------------------------------------------------------------
# Fused FFN block:  LayerNorm( h + Lin2( ReLU( Lin1(h) ) ) )
# Gridded over row tiles; weights resident in VMEM.
# ----------------------------------------------------------------------------
def _ffn_block_kernel(h_ref, w1_ref, b1_ref, w2_ref, b2_ref, g_ref, beta_ref,
                      o_ref, *, eps):
    h = h_ref[...].astype(jnp.float32)                 # (tm, D)
    f = jnp.dot(h.astype(_COMPUTE_DTYPE), w1_ref[...],
                preferred_element_type=jnp.float32) + b1_ref[...]
    f = jnp.maximum(f, 0.0)
    f2 = jnp.dot(f.astype(_COMPUTE_DTYPE), w2_ref[...],
                 preferred_element_type=jnp.float32) + b2_ref[...]
    y = h + f2                                         # residual (f32)
    mu = jnp.mean(y, axis=-1, keepdims=True)
    var = jnp.mean((y - mu) ** 2, axis=-1, keepdims=True)
    yn = (y - mu) * jax.lax.rsqrt(var + eps)
    o_ref[...] = (yn * g_ref[...] + beta_ref[...]).astype(o_ref.dtype)


def ffn_block(h, w1, b1, w2, b2, gamma, beta, *, eps=1e-5, tm_target=256):
    M, D = h.shape
    F = w1.shape[1]
    tm = _pick_tile(M, tm_target, 8)
    grid = (M // tm,)
    # TODO(synk): for very large dim_feedforward also tile the hidden (F) axis;
    # full-width bf16 weights stay tiny (D*F) at these model sizes.
    return pl.pallas_call(
        functools.partial(_ffn_block_kernel, eps=eps),
        out_shape=jax.ShapeDtypeStruct((M, D), jnp.float32),
        grid=grid,
        in_specs=[
            pl.BlockSpec((tm, D), lambda i: (i, 0)),
            pl.BlockSpec((D, F), lambda i: (0, 0)),
            pl.BlockSpec((1, F), lambda i: (0, 0)),
            pl.BlockSpec((F, D), lambda i: (0, 0)),
            pl.BlockSpec((1, D), lambda i: (0, 0)),
            pl.BlockSpec((1, D), lambda i: (0, 0)),
            pl.BlockSpec((1, D), lambda i: (0, 0)),
        ],
        out_specs=pl.BlockSpec((tm, D), lambda i: (i, 0)),
        compiler_params=pltpu.CompilerParams(
            dimension_semantics=("parallel",),
            vmem_limit_bytes=_VMEM_LIMIT),
    )(h, w1, b1.reshape(1, F), w2, b2.reshape(1, D),
      gamma.reshape(1, D), beta.reshape(1, D))


# ----------------------------------------------------------------------------
# Model (glue + parameter construction)
# ----------------------------------------------------------------------------
def make_positional_encoding(emb_size, maxlen=5000):
    den = jnp.exp(-jnp.arange(0, emb_size, 2, dtype=jnp.float32)
                  * math.log(10000.0) / emb_size)
    pos = jnp.arange(0, maxlen, dtype=jnp.float32).reshape(maxlen, 1)
    pe = jnp.zeros((maxlen, emb_size), dtype=jnp.float32)
    pe = pe.at[:, 0::2].set(jnp.sin(pos * den))
    pe = pe.at[:, 1::2].set(jnp.cos(pos * den))
    return pe[:, None, :]                              # (maxlen, 1, E)


def init_params(key, *, vocab_size, embedding_dim, nhead, num_layers,
                num_tokens, num_classes, dim_feedforward=2048):
    D = embedding_dim
    assert D % nhead == 0
    Dh = D // nhead
    scale = 1.0 / math.sqrt(Dh)
    ks = jax.random.split(key, 4 + num_layers)

    def nrm(k, shape, scale=0.02, dtype=_COMPUTE_DTYPE):
        return (scale * jax.random.normal(k, shape)).astype(dtype)

    params = {
        "embedding": nrm(ks[0], (vocab_size, D), 1.0, jnp.float32),
        "pos_embedding": make_positional_encoding(D),
        "layers": [],
        # output_layer: Linear(d_model * num_tokens, 150 * 2)
        "out_w_t": nrm(ks[1], (D * num_tokens, 300)),
        "out_b": jnp.zeros((300,), jnp.float32),
        # TODO(synk): reference declares final_layer = nn.Linear(150*150, num_classes),
        # whose in_features (22500) mismatches the 300-dim activation and would crash
        # at runtime in PyTorch; implemented with in_features=300 so forward runs.
        "final_w_t": nrm(ks[2], (300, num_classes)),
        "final_b": jnp.zeros((num_classes,), jnp.float32),
    }

    def heads_in(w):     # (D, D) -> (nhead, D, Dh)   (per-head projection slices)
        return w.reshape(D, nhead, Dh).transpose(1, 0, 2).astype(_COMPUTE_DTYPE)

    def heads_bias(b):   # (D,) -> (nhead, 1, Dh)
        return b.reshape(nhead, 1, Dh).astype(jnp.float32)

    for l in range(num_layers):
        lk = jax.random.split(ks[4 + l], 6)
        in_proj_w_t = nrm(lk[0], (D, 3 * D), dtype=jnp.float32)
        in_proj_b = jnp.zeros((3 * D,), jnp.float32)
        wq, wk, wv = jnp.split(in_proj_w_t, 3, axis=1)
        bq, bk, bv = jnp.split(in_proj_b, 3)
        out_proj_w_t = nrm(lk[1], (D, D), dtype=jnp.float32)
        params["layers"].append({
            # 1/sqrt(Dh) attention scale folded into the Q projection at init.
            "wq_h": heads_in(wq * scale), "wk_h": heads_in(wk), "wv_h": heads_in(wv),
            "bq_h": heads_bias(bq * scale), "bk_h": heads_bias(bk), "bv_h": heads_bias(bv),
            "wo_h": out_proj_w_t.reshape(nhead, Dh, D).astype(_COMPUTE_DTYPE),
            "out_proj_b": jnp.zeros((D,), jnp.float32),
            "lin1_w_t": nrm(lk[2], (D, dim_feedforward)),
            "lin1_b": jnp.zeros((dim_feedforward,), jnp.float32),
            "lin2_w_t": nrm(lk[3], (dim_feedforward, D)),
            "lin2_b": jnp.zeros((D,), jnp.float32),
            "ln1_g": jnp.ones((D,), jnp.float32),
            "ln1_b": jnp.zeros((D,), jnp.float32),
            "ln2_g": jnp.ones((D,), jnp.float32),
            "ln2_b": jnp.zeros((D,), jnp.float32),
        })
    return params


def encoder_layer_forward(x, p, nhead):
    """Post-norm nn.TransformerEncoderLayer (batch_first=True), eval mode."""
    B, S, D = x.shape
    h1 = attn_block(x, p, nhead=nhead)                         # (B, S, D)
    h2 = ffn_block(h1.reshape(B * S, D),
                   p["lin1_w_t"], p["lin1_b"],
                   p["lin2_w_t"], p["lin2_b"],
                   p["ln2_g"], p["ln2_b"])                     # (B*S, D)
    return h2.reshape(B, S, D)


def modelo_forward(params, input_indices, *, nhead, num_layers,
                   embedding_dim, num_tokens):
    # embedding (frozen) — plain gather
    emb = jnp.take(params["embedding"], input_indices, axis=0)   # (B, S, E)
    B, S, E = emb.shape

    # positional encoding: reproduces the reference exactly, including its
    # seq-first indexing (pos_embedding[:B] has shape (B, 1, E) and broadcasts
    # over the sequence axis).  Dropout is identity in eval mode.
    emb = emb + params["pos_embedding"][:B]

    x = emb
    for l in range(num_layers):
        x = encoder_layer_forward(x, params["layers"][l], nhead)

    flat = x.reshape(B, -1)                                      # (B, S*E)
    assert flat.shape[1] == embedding_dim * num_tokens
    out = linear(flat, params["out_w_t"], params["out_b"], apply_relu=True)
    out = linear(out, params["final_w_t"], params["final_b"])
    return out                                                   # (B, num_classes)


# ----------------------------------------------------------------------------
if __name__ == "__main__":
    # small, self-consistent shapes
    vocab_size = 100
    embedding_dim = d_model = 32
    nhead = 4
    num_layers = 2
    num_tokens = 8          # sequence length
    num_classes = 10
    batch = 2

    key = jax.random.PRNGKey(0)
    pkey, ikey = jax.random.split(key)

    params = init_params(
        pkey,
        vocab_size=vocab_size, embedding_dim=embedding_dim, nhead=nhead,
        num_layers=num_layers, num_tokens=num_tokens, num_classes=num_classes)

    input_indices = jax.random.randint(
        ikey, (batch, num_tokens), 0, vocab_size, dtype=jnp.int32)

    fwd = jax.jit(functools.partial(
        modelo_forward, nhead=nhead, num_layers=num_layers,
        embedding_dim=embedding_dim, num_tokens=num_tokens))

    out = fwd(params, input_indices)
    jax.block_until_ready(out)
    assert out.shape == (batch, num_classes)
    assert jnp.all(jnp.isfinite(out))
    print("KERNEL_OK")
</pallas_src>

<mosaic_0001>
module attributes {stable_mosaic.version = 11 : i64} {
  func.func @_ffn_block_kernel(%arg0: i32, %arg1: memref<16x32xf32, #tpu.memory_space<vmem>>, %arg2: memref<32x2048xbf16, #tpu.memory_space<vmem>>, %arg3: memref<1x2048xf32, #tpu.memory_space<vmem>>, %arg4: memref<2048x32xbf16, #tpu.memory_space<vmem>>, %arg5: memref<1x32xf32, #tpu.memory_space<vmem>>, %arg6: memref<1x32xf32, #tpu.memory_space<vmem>>, %arg7: memref<1x32xf32, #tpu.memory_space<vmem>>, %arg8: memref<16x32xf32, #tpu.memory_space<vmem>>) attributes {dimension_semantics = [#tpu.dimension_semantics<parallel>], iteration_bounds = array<i64: 1>, scalar_prefetch = 0 : i64, scratch_operands = 0 : i64, tpu.core_type = #tpu.core_type<tc>, window_params = [{transform_indices = @transform_0, window_bounds = array<i64: 16, 32>}, {pipeline_mode = #tpu.pipeline_mode<synchronous>, transform_indices = @transform_1, window_bounds = array<i64: 32, 2048>}, {pipeline_mode = #tpu.pipeline_mode<synchronous>, transform_indices = @transform_2, window_bounds = array<i64: 1, 2048>}, {pipeline_mode = #tpu.pipeline_mode<synchronous>, transform_indices = @transform_3, window_bounds = array<i64: 2048, 32>}, {pipeline_mode = #tpu.pipeline_mode<synchronous>, transform_indices = @transform_4, window_bounds = array<i64: 1, 32>}, {pipeline_mode = #tpu.pipeline_mode<synchronous>, transform_indices = @transform_5, window_bounds = array<i64: 1, 32>}, {pipeline_mode = #tpu.pipeline_mode<synchronous>, transform_indices = @transform_6, window_bounds = array<i64: 1, 32>}, {transform_indices = @transform_7, window_bounds = array<i64: 16, 32>}]} {
    %c0 = arith.constant 0 : index
    %c0_0 = arith.constant 0 : index
    %0 = vector.load %arg1[%c0, %c0_0] : memref<16x32xf32, #tpu.memory_space<vmem>>, vector<16x32xf32>
    %1 = arith.truncf %0 : vector<16x32xf32> to vector<16x32xbf16>
    %c0_1 = arith.constant 0 : index
    %c0_2 = arith.constant 0 : index
    %2 = vector.load %arg2[%c0_1, %c0_2] : memref<32x2048xbf16, #tpu.memory_space<vmem>>, vector<32x2048xbf16>
    %cst = arith.constant dense<0.000000e+00> : vector<16x2048xf32>
    %3 = tpu.matmul %1, %2, %cst {dimension_numbers = #tpu.dot_dimension_numbers<[1], [0], [0], [1], [0, 0, 1, 1], [], []>} : vector<16x32xbf16>, vector<32x2048xbf16>, vector<16x2048xf32> -> vector<16x2048xf32>
    %c0_3 = arith.constant 0 : index
    %c0_4 = arith.constant 0 : index
    %4 = vector.load %arg3[%c0_3, %c0_4] : memref<1x2048xf32, #tpu.memory_space<vmem>>, vector<1x2048xf32>
    %5 = vector.broadcast %4 : vector<1x2048xf32> to vector<16x2048xf32>
    %6 = arith.addf %3, %5 : vector<16x2048xf32>
    %cst_5 = arith.constant 0.000000e+00 : f32
    %7 = vector.broadcast %cst_5 : f32 to vector<16x2048xf32>
    %8 = arith.maximumf %6, %7 : vector<16x2048xf32>
    %9 = arith.truncf %8 : vector<16x2048xf32> to vector<16x2048xbf16>
    %c0_6 = arith.constant 0 : index
    %c0_7 = arith.constant 0 : index
    %10 = vector.load %arg4[%c0_6, %c0_7] : memref<2048x32xbf16, #tpu.memory_space<vmem>>, vector<2048x32xbf16>
    %cst_8 = arith.constant dense<0.000000e+00> : vector<16x32xf32>
    %11 = tpu.matmul %9, %10, %cst_8 {dimension_numbers = #tpu.dot_dimension_numbers<[1], [0], [0], [1], [0, 0, 1, 1], [], []>} : vector<16x2048xbf16>, vector<2048x32xbf16>, vector<16x32xf32> -> vector<16x32xf32>
    %c0_9 = arith.constant 0 : index
    %c0_10 = arith.constant 0 : index
    %12 = vector.load %arg5[%c0_9, %c0_10] : memref<1x32xf32, #tpu.memory_space<vmem>>, vector<1x32xf32>
    %13 = vector.broadcast %12 : vector<1x32xf32> to vector<16x32xf32>
    %14 = arith.addf %11, %13 : vector<16x32xf32>
    %15 = arith.addf %0, %14 : vector<16x32xf32>
    %cst_11 = arith.constant dense<0.000000e+00> : vector<16xf32>
    %16 = vector.multi_reduction <add>, %15, %cst_11 [1] : vector<16x32xf32> to vector<16xf32>
    %17 = vector.shape_cast %16 : vector<16xf32> to vector<16x1xf32>
    %cst_12 = arith.constant 3.200000e+01 : f32
    %18 = vector.broadcast %cst_12 : f32 to vector<16x1xf32>
    %19 = arith.divf %17, %18 : vector<16x1xf32>
    %20 = vector.broadcast %19 : vector<16x1xf32> to vector<16x32xf32>
    %21 = arith.subf %15, %20 : vector<16x32xf32>
    %22 = arith.mulf %21, %21 : vector<16x32xf32>
    %cst_13 = arith.constant dense<0.000000e+00> : vector<16xf32>
    %23 = vector.multi_reduction <add>, %22, %cst_13 [1] : vector<16x32xf32> to vector<16xf32>
    %24 = vector.shape_cast %23 : vector<16xf32> to vector<16x1xf32>
    %cst_14 = arith.constant 3.200000e+01 : f32
    %25 = vector.broadcast %cst_14 : f32 to vector<16x1xf32>
    %26 = arith.divf %24, %25 : vector<16x1xf32>
    %27 = vector.broadcast %19 : vector<16x1xf32> to vector<16x32xf32>
    %28 = arith.subf %15, %27 : vector<16x32xf32>
    %cst_15 = arith.constant 9.99999974E-6 : f32
    %29 = vector.broadcast %cst_15 : f32 to vector<16x1xf32>
    %30 = arith.addf %26, %29 : vector<16x1xf32>
    %31 = math.rsqrt %30 : vector<16x1xf32>
    %32 = vector.broadcast %31 : vector<16x1xf32> to vector<16x32xf32>
    %33 = arith.mulf %28, %32 : vector<16x32xf32>
    %c0_16 = arith.constant 0 : index
    %c0_17 = arith.constant 0 : index
    %34 = vector.load %arg6[%c0_16, %c0_17] : memref<1x32xf32, #tpu.memory_space<vmem>>, vector<1x32xf32>
    %35 = vector.broadcast %34 : vector<1x32xf32> to vector<16x32xf32>
    %36 = arith.mulf %33, %35 : vector<16x32xf32>
    %c0_18 = arith.constant 0 : index
    %c0_19 = arith.constant 0 : index
    %37 = vector.load %arg7[%c0_18, %c0_19] : memref<1x32xf32, #tpu.memory_space<vmem>>, vector<1x32xf32>
    %38 = vector.broadcast %37 : vector<1x32xf32> to vector<16x32xf32>
    %39 = arith.addf %36, %38 : vector<16x32xf32>
    %c0_20 = arith.constant 0 : index
    %c0_21 = arith.constant 0 : index
    %40 = vector.load %arg8[%c0_20, %c0_21] : memref<16x32xf32, #tpu.memory_space<vmem>>, vector<16x32xf32>
    tpu.vector_store %arg8[%c0_20, %c0_21], %39 {strides = array<i32>} : memref<16x32xf32, #tpu.memory_space<vmem>>, vector<16x32xf32>,
    return
  }
  func.func @transform_0(%arg0: i32) -> (i32, i32) {
    %c0_i32 = arith.constant 0 : i32
    %c0_i32_0 = arith.constant 0 : i32
    return %arg0, %c0_i32 : i32, i32
  }
  func.func @transform_1(%arg0: i32) -> (i32, i32) {
    %c0_i32 = arith.constant 0 : i32
    %c0_i32_0 = arith.constant 0 : i32
    %c0_i32_1 = arith.constant 0 : i32
    return %c0_i32, %c0_i32_0 : i32, i32
  }
  func.func @transform_2(%arg0: i32) -> (i32, i32) {
    %c0_i32 = arith.constant 0 : i32
    %c0_i32_0 = arith.constant 0 : i32
    %c0_i32_1 = arith.constant 0 : i32
    return %c0_i32, %c0_i32_0 : i32, i32
  }
  func.func @transform_3(%arg0: i32) -> (i32, i32) {
    %c0_i32 = arith.constant 0 : i32
    %c0_i32_0 = arith.constant 0 : i32
    %c0_i32_1 = arith.constant 0 : i32
    return %c0_i32, %c0_i32_0 : i32, i32
  }
  func.func @transform_4(%arg0: i32) -> (i32, i32) {
    %c0_i32 = arith.constant 0 : i32
    %c0_i32_0 = arith.constant 0 : i32
    %c0_i32_1 = arith.constant 0 : i32
    return %c0_i32, %c0_i32_0 : i32, i32
  }
  func.func @transform_5(%arg0: i32) -> (i32, i32) {
    %c0_i32 = arith.constant 0 : i32
    %c0_i32_0 = arith.constant 0 : i32
    %c0_i32_1 = arith.constant 0 : i32
    return %c0_i32, %c0_i32_0 : i32, i32
  }
  func.func @transform_6(%arg0: i32) -> (i32, i32) {
    %c0_i32 = arith.constant 0 : i32
    %c0_i32_0 = arith.constant 0 : i32
    %c0_i32_1 = arith.constant 0 : i32
    return %c0_i32, %c0_i32_0 : i32, i32
  }
  func.func @transform_7(%arg0: i32) -> (i32, i32) {
    %c0_i32 = arith.constant 0 : i32
    %c0_i32_0 = arith.constant 0 : i32
    return %arg0, %c0_i32 : i32, i32
  }
}

module attributes {stable_mosaic.version = 11 : i64} {
  func.func @_attn_block_kernel(%arg0: i32, %arg1: memref<1x8x32xf32, #tpu.memory_space<vmem>>, %arg2: memref<4x32x8xbf16, #tpu.memory_space<vmem>>, %arg3: memref<4x32x8xbf16, #tpu.memory_space<vmem>>, %arg4: memref<4x32x8xbf16, #tpu.memory_space<vmem>>, %arg5: memref<4x1x8xf32, #tpu.memory_space<vmem>>, %arg6: memref<4x1x8xf32, #tpu.memory_space<vmem>>, %arg7: memref<4x1x8xf32, #tpu.memory_space<vmem>>, %arg8: memref<4x8x32xbf16, #tpu.memory_space<vmem>>, %arg9: memref<1x32xf32, #tpu.memory_space<vmem>>, %arg10: memref<1x32xf32, #tpu.memory_space<vmem>>, %arg11: memref<1x32xf32, #tpu.memory_space<vmem>>, %arg12: memref<1x8x32xf32, #tpu.memory_space<vmem>>) attributes {dimension_semantics = [#tpu.dimension_semantics<parallel>], iteration_bounds = array<i64: 2>, scalar_prefetch = 0 : i64, scratch_operands = 0 : i64, tpu.core_type = #tpu.core_type<tc>, window_params = [{transform_indices = @transform_0, window_bounds = array<i64: 1, 8, 32>}, {pipeline_mode = #tpu.pipeline_mode<synchronous>, transform_indices = @transform_1, window_bounds = array<i64: 4, 32, 8>}, {pipeline_mode = #tpu.pipeline_mode<synchronous>, transform_indices = @transform_2, window_bounds = array<i64: 4, 32, 8>}, {pipeline_mode = #tpu.pipeline_mode<synchronous>, transform_indices = @transform_3, window_bounds = array<i64: 4, 32, 8>}, {pipeline_mode = #tpu.pipeline_mode<synchronous>, transform_indices = @transform_4, window_bounds = array<i64: 4, 1, 8>}, {pipeline_mode = #tpu.pipeline_mode<synchronous>, transform_indices = @transform_5, window_bounds = array<i64: 4, 1, 8>}, {pipeline_mode = #tpu.pipeline_mode<synchronous>, transform_indices = @transform_6, window_bounds = array<i64: 4, 1, 8>}, {pipeline_mode = #tpu.pipeline_mode<synchronous>, transform_indices = @transform_7, window_bounds = array<i64: 4, 8, 32>}, {pipeline_mode = #tpu.pipeline_mode<synchronous>, transform_indices = @transform_8, window_bounds = array<i64: 1, 32>}, {pipeline_mode = #tpu.pipeline_mode<synchronous>, transform_indices = @transform_9, window_bounds = array<i64: 1, 32>}, {pipeline_mode = #tpu.pipeline_mode<synchronous>, transform_indices = @transform_10, window_bounds = array<i64: 1, 32>}, {transform_indices = @transform_11, window_bounds = array<i64: 1, 8, 32>}]} {
    %c0 = arith.constant 0 : index
    %c0_0 = arith.constant 0 : index
    %c0_1 = arith.constant 0 : index
    %0 = vector.load %arg1[%c0, %c0_0, %c0_1] : memref<1x8x32xf32, #tpu.memory_space<vmem>>, vector<1x8x32xf32>
    %1 = vector.shape_cast %0 : vector<1x8x32xf32> to vector<8x32xf32>
    %2 = arith.truncf %1 : vector<8x32xf32> to vector<8x32xbf16>
    %cst = arith.constant 0.000000e+00 : f32
    %3 = vector.broadcast %cst : f32 to vector<8x32xf32>
    %c0_2 = arith.constant 0 : index
    %c0_3 = arith.constant 0 : index
    %c0_4 = arith.constant 0 : index
    %4 = vector.load %arg2[%c0_2, %c0_3, %c0_4] : memref<4x32x8xbf16, #tpu.memory_space<vmem>>, vector<1x32x8xbf16>
    %5 = vector.shape_cast %4 : vector<1x32x8xbf16> to vector<32x8xbf16>
    %cst_5 = arith.constant dense<0.000000e+00> : vector<8x8xf32>
    %6 = tpu.matmul %2, %5, %cst_5 {dimension_numbers = #tpu.dot_dimension_numbers<[1], [0], [0], [1], [0, 0, 1, 1], [], []>} : vector<8x32xbf16>, vector<32x8xbf16>, vector<8x8xf32> -> vector<8x8xf32>
    %c0_6 = arith.constant 0 : index
    %c0_7 = arith.constant 0 : index
    %c0_8 = arith.constant 0 : index
    %7 = vector.load %arg5[%c0_6, %c0_7, %c0_8] : memref<4x1x8xf32, #tpu.memory_space<vmem>>, vector<1x1x8xf32>
    %8 = vector.shape_cast %7 : vector<1x1x8xf32> to vector<1x8xf32>
    %9 = vector.broadcast %8 : vector<1x8xf32> to vector<8x8xf32>
    %10 = arith.addf %6, %9 : vector<8x8xf32>
    %c0_9 = arith.constant 0 : index
    %c0_10 = arith.constant 0 : index
    %c0_11 = arith.constant 0 : index
    %11 = vector.load %arg3[%c0_9, %c0_10, %c0_11] : memref<4x32x8xbf16, #tpu.memory_space<vmem>>, vector<1x32x8xbf16>
    %12 = vector.shape_cast %11 : vector<1x32x8xbf16> to vector<32x8xbf16>
    %cst_12 = arith.constant dense<0.000000e+00> : vector<8x8xf32>
    %13 = tpu.matmul %2, %12, %cst_12 {dimension_numbers = #tpu.dot_dimension_numbers<[1], [0], [0], [1], [0, 0, 1, 1], [], []>} : vector<8x32xbf16>, vector<32x8xbf16>, vector<8x8xf32> -> vector<8x8xf32>
    %c0_13 = arith.constant 0 : index
    %c0_14 = arith.constant 0 : index
    %c0_15 = arith.constant 0 : index
    %14 = vector.load %arg6[%c0_13, %c0_14, %c0_15] : memref<4x1x8xf32, #tpu.memory_space<vmem>>, vector<1x1x8xf32>
    %15 = vector.shape_cast %14 : vector<1x1x8xf32> to vector<1x8xf32>
    %16 = vector.broadcast %15 : vector<1x8xf32> to vector<8x8xf32>
    %17 = arith.addf %13, %16 : vector<8x8xf32>
    %c0_16 = arith.constant 0 : index
    %c0_17 = arith.constant 0 : index
    %c0_18 = arith.constant 0 : index
    %18 = vector.load %arg4[%c0_16, %c0_17, %c0_18] : memref<4x32x8xbf16, #tpu.memory_space<vmem>>, vector<1x32x8xbf16>
    %19 = vector.shape_cast %18 : vector<1x32x8xbf16> to vector<32x8xbf16>
    %cst_19 = arith.constant dense<0.000000e+00> : vector<8x8xf32>
    %20 = tpu.matmul %2, %19, %cst_19 {dimension_numbers = #tpu.dot_dimension_numbers<[1], [0], [0], [1], [0, 0, 1, 1], [], []>} : vector<8x32xbf16>, vector<32x8xbf16>, vector<8x8xf32> -> vector<8x8xf32>
    %c0_20 = arith.constant 0 : index
    %c0_21 = arith.constant 0 : index
    %c0_22 = arith.constant 0 : index
    %21 = vector.load %arg7[%c0_20, %c0_21, %c0_22] : memref<4x1x8xf32, #tpu.memory_space<vmem>>, vector<1x1x8xf32>
    %22 = vector.shape_cast %21 : vector<1x1x8xf32> to vector<1x8xf32>
    %23 = vector.broadcast %22 : vector<1x8xf32> to vector<8x8xf32>
    %24 = arith.addf %20, %23 : vector<8x8xf32>
    %25 = arith.truncf %10 : vector<8x8xf32> to vector<8x8xbf16>
    %26 = arith.truncf %17 : vector<8x8xf32> to vector<8x8xbf16>
    %cst_23 = arith.constant dense<0.000000e+00> : vector<8x8xf32>
    %27 = tpu.matmul %25, %26, %cst_23 {dimension_numbers = #tpu.dot_dimension_numbers<[1], [1], [0], [0], [0, 0, 1, 0], [], []>} : vector<8x8xbf16>, vector<8x8xbf16>, vector<8x8xf32> -> vector<8x8xf32>
    %cst_24 = arith.constant dense<0xFF800000> : vector<8xf32>
    %28 = vector.multi_reduction <maximumf>, %27, %cst_24 [1] : vector<8x8xf32> to vector<8xf32>
    %29 = vector.shape_cast %28 : vector<8xf32> to vector<8x1xf32>
    %30 = vector.broadcast %29 : vector<8x1xf32> to vector<8x8xf32>
    %31 = arith.subf %27, %30 : vector<8x8xf32>
    %32 = math.exp %31 : vector<8x8xf32>
    %cst_25 = arith.constant dense<0.000000e+00> : vector<8xf32>
    %33 = vector.multi_reduction <add>, %32, %cst_25 [1] : vector<8x8xf32> to vector<8xf32>
    %34 = vector.shape_cast %33 : vector<8xf32> to vector<8x1xf32>
    %35 = tpu.reciprocal %34 {approx = true} : vector<8x1xf32> -> vector<8x1xf32>
    %36 = vector.broadcast %35 : vector<8x1xf32> to vector<8x8xf32>
    %37 = arith.mulf %32, %36 : vector<8x8xf32>
    %38 = arith.truncf %37 : vector<8x8xf32> to vector<8x8xbf16>
    %39 = arith.truncf %24 : vector<8x8xf32> to vector<8x8xbf16>
    %cst_26 = arith.constant dense<0.000000e+00> : vector<8x8xf32>
    %40 = tpu.matmul %38, %39, %cst_26 {dimension_numbers = #tpu.dot_dimension_numbers<[1], [0], [0], [1], [0, 0, 1, 1], [], []>} : vector<8x8xbf16>, vector<8x8xbf16>, vector<8x8xf32> -> vector<8x8xf32>
    %41 = arith.truncf %40 : vector<8x8xf32> to vector<8x8xbf16>
    %c0_27 = arith.constant 0 : index
    %c0_28 = arith.constant 0 : index
    %c0_29 = arith.constant 0 : index
    %42 = vector.load %arg8[%c0_27, %c0_28, %c0_29] : memref<4x8x32xbf16, #tpu.memory_space<vmem>>, vector<1x8x32xbf16>
    %43 = vector.shape_cast %42 : vector<1x8x32xbf16> to vector<8x32xbf16>
    %cst_30 = arith.constant dense<0.000000e+00> : vector<8x32xf32>
    %44 = tpu.matmul %41, %43, %cst_30 {dimension_numbers = #tpu.dot_dimension_numbers<[1], [0], [0], [1], [0, 0, 1, 1], [], []>} : vector<8x8xbf16>, vector<8x32xbf16>, vector<8x32xf32> -> vector<8x32xf32>
    %45 = arith.addf %3, %44 : vector<8x32xf32>
    %c1 = arith.constant 1 : index
    %c0_31 = arith.constant 0 : index
    %c0_32 = arith.constant 0 : index
    %46 = vector.load %arg2[%c1, %c0_31, %c0_32] : memref<4x32x8xbf16, #tpu.memory_space<vmem>>, vector<1x32x8xbf16>
    %47 = vector.shape_cast %46 : vector<1x32x8xbf16> to vector<32x8xbf16>
    %cst_33 = arith.constant dense<0.000000e+00> : vector<8x8xf32>
    %48 = tpu.matmul %2, %47, %cst_33 {dimension_numbers = #tpu.dot_dimension_numbers<[1], [0], [0], [1], [0, 0, 1, 1], [], []>} : vector<8x32xbf16>, vector<32x8xbf16>, vector<8x8xf32> -> vector<8x8xf32>
    %c1_34 = arith.constant 1 : index
    %c0_35 = arith.constant 0 : index
    %c0_36 = arith.constant 0 : index
    %49 = vector.load %arg5[%c1_34, %c0_35, %c0_36] : memref<4x1x8xf32, #tpu.memory_space<vmem>>, vector<1x1x8xf32>
    %50 = vector.shape_cast %49 : vector<1x1x8xf32> to vector<1x8xf32>
    %51 = vector.broadcast %50 : vector<1x8xf32> to vector<8x8xf32>
    %52 = arith.addf %48, %51 : vector<8x8xf32>
    %c1_37 = arith.constant 1 : index
    %c0_38 = arith.constant 0 : index
    %c0_39 = arith.constant 0 : index
    %53 = vector.load %arg3[%c1_37, %c0_38, %c0_39] : memref<4x32x8xbf16, #tpu.memory_space<vmem>>, vector<1x32x8xbf16>
    %54 = vector.shape_cast %53 : vector<1x32x8xbf16> to vector<32x8xbf16>
    %cst_40 = arith.constant dense<0.000000e+00> : vector<8x8xf32>
    %55 = tpu.matmul %2, %54, %cst_40 {dimension_numbers = #tpu.dot_dimension_numbers<[1], [0], [0], [1], [0, 0, 1, 1], [], []>} : vector<8x32xbf16>, vector<32x8xbf16>, vector<8x8xf32> -> vector<8x8xf32>
    %c1_41 = arith.constant 1 : index
    %c0_42 = arith.constant 0 : index
    %c0_43 = arith.constant 0 : index
    %56 = vector.load %arg6[%c1_41, %c0_42, %c0_43] : memref<4x1x8xf32, #tpu.memory_space<vmem>>, vector<1x1x8xf32>
    %57 = vector.shape_cast %56 : vector<1x1x8xf32> to vector<1x8xf32>
    %58 = vector.broadcast %57 : vector<1x8xf32> to vector<8x8xf32>
    %59 = arith.addf %55, %58 : vector<8x8xf32>
    %c1_44 = arith.constant 1 : index
    %c0_45 = arith.constant 0 : index
    %c0_46 = arith.constant 0 : index
    %60 = vector.load %arg4[%c1_44, %c0_45, %c0_46] : memref<4x32x8xbf16, #tpu.memory_space<vmem>>, vector<1x32x8xbf16>
    %61 = vector.shape_cast %60 : vector<1x32x8xbf16> to vector<32x8xbf16>
    %cst_47 = arith.constant dense<0.000000e+00> : vector<8x8xf32>
    %62 = tpu.matmul %2, %61, %cst_47 {dimension_numbers = #tpu.dot_dimension_numbers<[1], [0], [0], [1], [0, 0, 1, 1], [], []>} : vector<8x32xbf16>, vector<32x8xbf16>, vector<8x8xf32> -> vector<8x8xf32>
    %c1_48 = arith.constant 1 : index
    %c0_49 = arith.constant 0 : index
    %c0_50 = arith.constant 0 : index
    %63 = vector.load %arg7[%c1_48, %c0_49, %c0_50] : memref<4x1x8xf32, #tpu.memory_space<vmem>>, vector<1x1x8xf32>
    %64 = vector.shape_cast %63 : vector<1x1x8xf32> to vector<1x8xf32>
    %65 = vector.broadcast %64 : vector<1x8xf32> to vector<8x8xf32>
    %66 = arith.addf %62, %65 : vector<8x8xf32>
    %67 = arith.truncf %52 : vector<8x8xf32> to vector<8x8xbf16>
    %68 = arith.truncf %59 : vector<8x8xf32> to vector<8x8xbf16>
    %cst_51 = arith.constant dense<0.000000e+00> : vector<8x8xf32>
    %69 = tpu.matmul %67, %68, %cst_51 {dimension_numbers = #tpu.dot_dimension_numbers<[1], [1], [0], [0], [0, 0, 1, 0], [], []>} : vector<8x8xbf16>, vector<8x8xbf16>, vector<8x8xf32> -> vector<8x8xf32>
    %cst_52 = arith.constant dense<0xFF800000> : vector<8xf32>
    %70 = vector.multi_reduction <maximumf>, %69, %cst_52 [1] : vector<8x8xf32> to vector<8xf32>
    %71 = vector.shape_cast %70 : vector<8xf32> to vector<8x1xf32>
    %72 = vector.broadcast %71 : vector<8x1xf32> to vector<8x8xf32>
    %73 = arith.subf %69, %72 : vector<8x8xf32>
    %74 = math.exp %73 : vector<8x8xf32>
    %cst_53 = arith.constant dense<0.000000e+00> : vector<8xf32>
    %75 = vector.multi_reduction <add>, %74, %cst_53 [1] : vector<8x8xf32> to vector<8xf32>
    %76 = vector.shape_cast %75 : vector<8xf32> to vector<8x1xf32>
    %77 = tpu.reciprocal %76 {approx = true} : vector<8x1xf32> -> vector<8x1xf32>
    %78 = vector.broadcast %77 : vector<8x1xf32> to vector<8x8xf32>
    %79 = arith.mulf %74, %78 : vector<8x8xf32>
    %80 = arith.truncf %79 : vector<8x8xf32> to vector<8x8xbf16>
    %81 = arith.truncf %66 : vector<8x8xf32> to vector<8x8xbf16>
    %cst_54 = arith.constant dense<0.000000e+00> : vector<8x8xf32>
    %82 = tpu.matmul %80, %81, %cst_54 {dimension_numbers = #tpu.dot_dimension_numbers<[1], [0], [0], [1], [0, 0, 1, 1], [], []>} : vector<8x8xbf16>, vector<8x8xbf16>, vector<8x8xf32> -> vector<8x8xf32>
    %83 = arith.truncf %82 : vector<8x8xf32> to vector<8x8xbf16>
    %c1_55 = arith.constant 1 : index
    %c0_56 = arith.constant 0 : index
    %c0_57 = arith.constant 0 : index
    %84 = vector.load %arg8[%c1_55, %c0_56, %c0_57] : memref<4x8x32xbf16, #tpu.memory_space<vmem>>, vector<1x8x32xbf16>
    %85 = vector.shape_cast %84 : vector<1x8x32xbf16> to vector<8x32xbf16>
    %cst_58 = arith.constant dense<0.000000e+00> : vector<8x32xf32>
    %86 = tpu.matmul %83, %85, %cst_58 {dimension_numbers = #tpu.dot_dimension_numbers<[1], [0], [0], [1], [0, 0, 1, 1], [], []>} : vector<8x8xbf16>, vector<8x32xbf16>, vector<8x32xf32> -> vector<8x32xf32>
    %87 = arith.addf %45, %86 : vector<8x32xf32>
    %c2 = arith.constant 2 : index
    %c0_59 = arith.constant 0 : index
    %c0_60 = arith.constant 0 : index
    %88 = vector.load %arg2[%c2, %c0_59, %c0_60] : memref<4x32x8xbf16, #tpu.memory_space<vmem>>, vector<1x32x8xbf16>
    %89 = vector.shape_cast %88 : vector<1x32x8xbf16> to vector<32x8xbf16>
    %cst_61 = arith.constant dense<0.000000e+00> : vector<8x8xf32>
    %90 = tpu.matmul %2, %89, %cst_61 {dimension_numbers = #tpu.dot_dimension_numbers<[1], [0], [0], [1], [0, 0, 1, 1], [], []>} : vector<8x32xbf16>, vector<32x8xbf16>, vector<8x8xf32> -> vector<8x8xf32>
    %c2_62 = arith.constant 2 : index
    %c0_63 = arith.constant 0 : index
    %c0_64 = arith.constant 0 : index
    %91 = vector.load %arg5[%c2_62, %c0_63, %c0_64] : memref<4x1x8xf32, #tpu.memory_space<vmem>>, vector<1x1x8xf32>
    %92 = vector.shape_cast %91 : vector<1x1x8xf32> to vector<1x8xf32>
    %93 = vector.broadcast %92 : vector<1x8xf32> to vector<8x8xf32>
    %94 = arith.addf %90, %93 : vector<8x8xf32>
    %c2_65 = arith.constant 2 : index
    %c0_66 = arith.constant 0 : index
    %c0_67 = arith.constant 0 : index
    %95 = vector.load %arg3[%c2_65, %c0_66, %c0_67] : memref<4x32x8xbf16, #tpu.memory_space<vmem>>, vector<1x32x8xbf16>
    %96 = vector.shape_cast %95 : vector<1x32x8xbf16> to vector<32x8xbf16>
    %cst_68 = arith.constant dense<0.000000e+00> : vector<8x8xf32>
    %97 = tpu.matmul %2, %96, %cst_68 {dimension_numbers = #tpu.dot_dimension_numbers<[1], [0], [0], [1], [0, 0, 1, 1], [], []>} : vector<8x32xbf16>, vector<32x8xbf16>, vector<8x8xf32> -> vector<8x8xf32>
    %c2_69 = arith.constant 2 : index
    %c0_70 = arith.constant 0 : index
    %c0_71 = arith.constant 0 : index
    %98 = vector.load %arg6[%c2_69, %c0_70, %c0_71] : memref<4x1x8xf32, #tpu.memory_space<vmem>>, vector<1x1x8xf32>
    %99 = vector.shape_cast %98 : vector<1x1x8xf32> to vector<1x8xf32>
    %100 = vector.broadcast %99 : vector<1x8xf32> to vector<8x8xf32>
    %101 = arith.addf %97, %100 : vector<8x8xf32>
    %c2_72 = arith.constant 2 : index
    %c0_73 = arith.constant 0 : index
    %c0_74 = arith.constant 0 : index
    %102 = vector.load %arg4[%c2_72, %c0_73, %c0_74] : memref<4x32x8xbf16, #tpu.memory_space<vmem>>, vector<1x32x8xbf16>
    %103 = vector.shape_cast %102 : vector<1x32x8xbf16> to vector<32x8xbf16>
    %cst_75 = arith.constant dense<0.000000e+00> : vector<8x8xf32>
    %104 = tpu.matmul %2, %103, %cst_75 {dimension_numbers = #tpu.dot_dimension_numbers<[1], [0], [0], [1], [0, 0, 1, 1], [], []>} : vector<8x32xbf16>, vector<32x8xbf16>, vector<8x8xf32> -> vector<8x8xf32>
    %c2_76 = arith.constant 2 : index
    %c0_77 = arith.constant 0 : index
    %c0_78 = arith.constant 0 : index
    %105 = vector.load %arg7[%c2_76, %c0_77, %c0_78] : memref<4x1x8xf32, #tpu.memory_space<vmem>>, vector<1x1x8xf32>
    %106 = vector.shape_cast %105 : vector<1x1x8xf32> to vector<1x8xf32>
    %107 = vector.broadcast %106 : vector<1x8xf32> to vector<8x8xf32>
    %108 = arith.addf %104, %107 : vector<8x8xf32>
    %109 = arith.truncf %94 : vector<8x8xf32> to vector<8x8xbf16>
    %110 = arith.truncf %101 : vector<8x8xf32> to vector<8x8xbf16>
    %cst_79 = arith.constant dense<0.000000e+00> : vector<8x8xf32>
    %111 = tpu.matmul %109, %110, %cst_79 {dimension_numbers = #tpu.dot_dimension_numbers<[1], [1], [0], [0], [0, 0, 1, 0], [], []>} : vector<8x8xbf16>, vector<8x8xbf16>, vector<8x8xf32> -> vector<8x8xf32>
    %cst_80 = arith.constant dense<0xFF800000> : vector<8xf32>
    %112 = vector.multi_reduction <maximumf>, %111, %cst_80 [1] : vector<8x8xf32> to vector<8xf32>
    %113 = vector.shape_cast %112 : vector<8xf32> to vector<8x1xf32>
    %114 = vector.broadcast %113 : vector<8x1xf32> to vector<8x8xf32>
    %115 = arith.subf %111, %114 : vector<8x8xf32>
    %116 = math.exp %115 : vector<8x8xf32>
    %cst_81 = arith.constant dense<0.000000e+00> : vector<8xf32>
    %117 = vector.multi_reduction <add>, %116, %cst_81 [1] : vector<8x8xf32> to vector<8xf32>
    %118 = vector.shape_cast %117 : vector<8xf32> to vector<8x1xf32>
    %119 = tpu.reciprocal %118 {approx = true} : vector<8x1xf32> -> vector<8x1xf32>
    %120 = vector.broadcast %119 : vector<8x1xf32> to vector<8x8xf32>
    %121 = arith.mulf %116, %120 : vector<8x8xf32>
    %122 = arith.truncf %121 : vector<8x8xf32> to vector<8x8xbf16>
    %123 = arith.truncf %108 : vector<8x8xf32> to vector<8x8xbf16>
    %cst_82 = arith.constant dense<0.000000e+00> : vector<8x8xf32>
    %124 = tpu.matmul %122, %123, %cst_82 {dimension_numbers = #tpu.dot_dimension_numbers<[1], [0], [0], [1], [0, 0, 1, 1], [], []>} : vector<8x8xbf16>, vector<8x8xbf16>, vector<8x8xf32> -> vector<8x8xf32>
    %125 = arith.truncf %124 : vector<8x8xf32> to vector<8x8xbf16>
    %c2_83 = arith.constant 2 : index
    %c0_84 = arith.constant 0 : index
    %c0_85 = arith.constant 0 : index
    %126 = vector.load %arg8[%c2_83, %c0_84, %c0_85] : memref<4x8x32xbf16, #tpu.memory_space<vmem>>, vector<1x8x32xbf16>
    %127 = vector.shape_cast %126 : vector<1x8x32xbf16> to vector<8x32xbf16>
    %cst_86 = arith.constant dense<0.000000e+00> : vector<8x32xf32>
    %128 = tpu.matmul %125, %127, %cst_86 {dimension_numbers = #tpu.dot_dimension_numbers<[1], [0], [0], [1], [0, 0, 1, 1], [], []>} : vector<8x8xbf16>, vector<8x32xbf16>, vector<8x32xf32> -> vector<8x32xf32>
    %129 = arith.addf %87, %128 : vector<8x32xf32>
    %c3 = arith.constant 3 : index
    %c0_87 = arith.constant 0 : index
    %c0_88 = arith.constant 0 : index
    %130 = vector.load %arg2[%c3, %c0_87, %c0_88] : memref<4x32x8xbf16, #tpu.memory_space<vmem>>, vector<1x32x8xbf16>
    %131 = vector.shape_cast %130 : vector<1x32x8xbf16> to vector<32x8xbf16>
    %cst_89 = arith.constant dense<0.000000e+00> : vector<8x8xf32>
    %132 = tpu.matmul %2, %131, %cst_89 {dimension_numbers = #tpu.dot_dimension_numbers<[1], [0], [0], [1], [0, 0, 1, 1], [], []>} : vector<8x32xbf16>, vector<32x8xbf16>, vector<8x8xf32> -> vector<8x8xf32>
    %c3_90 = arith.constant 3 : index
    %c0_91 = arith.constant 0 : index
    %c0_92 = arith.constant 0 : index
    %133 = vector.load %arg5[%c3_90, %c0_91, %c0_92] : memref<4x1x8xf32, #tpu.memory_space<vmem>>, vector<1x1x8xf32>
    %134 = vector.shape_cast %133 : vector<1x1x8xf32> to vector<1x8xf32>
    %135 = vector.broadcast %134 : vector<1x8xf32> to vector<8x8xf32>
    %136 = arith.addf %132, %135 : vector<8x8xf32>
    %c3_93 = arith.constant 3 : index
    %c0_94 = arith.constant 0 : index
    %c0_95 = arith.constant 0 : index
    %137 = vector.load %arg3[%c3_93, %c0_94, %c0_95] : memref<4x32x8xbf16, #tpu.memory_space<vmem>>, vector<1x32x8xbf16>
    %138 = vector.shape_cast %137 : vector<1x32x8xbf16> to vector<32x8xbf16>
    %cst_96 = arith.constant dense<0.000000e+00> : vector<8x8xf32>
    %139 = tpu.matmul %2, %138, %cst_96 {dimension_numbers = #tpu.dot_dimension_numbers<[1], [0], [0], [1], [0, 0, 1, 1], [], []>} : vector<8x32xbf16>, vector<32x8xbf16>, vector<8x8xf32> -> vector<8x8xf32>
    %c3_97 = arith.constant 3 : index
    %c0_98 = arith.constant 0 : index
    %c0_99 = arith.constant 0 : index
    %140 = vector.load %arg6[%c3_97, %c0_98, %c0_99] : memref<4x1x8xf32, #tpu.memory_space<vmem>>, vector<1x1x8xf32>
    %141 = vector.shape_cast %140 : vector<1x1x8xf32> to vector<1x8xf32>
    %142 = vector.broadcast %141 : vector<1x8xf32> to vector<8x8xf32>
    %143 = arith.addf %139, %142 : vector<8x8xf32>
    %c3_100 = arith.constant 3 : index
    %c0_101 = arith.constant 0 : index
    %c0_102 = arith.constant 0 : index
    %144 = vector.load %arg4[%c3_100, %c0_101, %c0_102] : memref<4x32x8xbf16, #tpu.memory_space<vmem>>, vector<1x32x8xbf16>
    %145 = vector.shape_cast %144 : vector<1x32x8xbf16> to vector<32x8xbf16>
    %cst_103 = arith.constant dense<0.000000e+00> : vector<8x8xf32>
    %146 = tpu.matmul %2, %145, %cst_103 {dimension_numbers = #tpu.dot_dimension_numbers<[1], [0], [0], [1], [0, 0, 1, 1], [], []>} : vector<8x32xbf16>, vector<32x8xbf16>, vector<8x8xf32> -> vector<8x8xf32>
    %c3_104 = arith.constant 3 : index
    %c0_105 = arith.constant 0 : index
    %c0_106 = arith.constant 0 : index
    %147 = vector.load %arg7[%c3_104, %c0_105, %c0_106] : memref<4x1x8xf32, #tpu.memory_space<vmem>>, vector<1x1x8xf32>
    %148 = vector.shape_cast %147 : vector<1x1x8xf32> to vector<1x8xf32>
    %149 = vector.broadcast %148 : vector<1x8xf32> to vector<8x8xf32>
    %150 = arith.addf %146, %149 : vector<8x8xf32>
    %151 = arith.truncf %136 : vector<8x8xf32> to vector<8x8xbf16>
    %152 = arith.truncf %143 : vector<8x8xf32> to vector<8x8xbf16>
    %cst_107 = arith.constant dense<0.000000e+00> : vector<8x8xf32>
    %153 = tpu.matmul %151, %152, %cst_107 {dimension_numbers = #tpu.dot_dimension_numbers<[1], [1], [0], [0], [0, 0, 1, 0], [], []>} : vector<8x8xbf16>, vector<8x8xbf16>, vector<8x8xf32> -> vector<8x8xf32>
    %cst_108 = arith.constant dense<0xFF800000> : vector<8xf32>
    %154 = vector.multi_reduction <maximumf>, %153, %cst_108 [1] : vector<8x8xf32> to vector<8xf32>
    %155 = vector.shape_cast %154 : vector<8xf32> to vector<8x1xf32>
    %156 = vector.broadcast %155 : vector<8x1xf32> to vector<8x8xf32>
    %157 = arith.subf %153, %156 : vector<8x8xf32>
    %158 = math.exp %157 : vector<8x8xf32>
    %cst_109 = arith.constant dense<0.000000e+00> : vector<8xf32>
    %159 = vector.multi_reduction <add>, %158, %cst_109 [1] : vector<8x8xf32> to vector<8xf32>
    %160 = vector.shape_cast %159 : vector<8xf32> to vector<8x1xf32>
    %161 = tpu.reciprocal %160 {approx = true} : vector<8x1xf32> -> vector<8x1xf32>
    %162 = vector.broadcast %161 : vector<8x1xf32> to vector<8x8xf32>
    %163 = arith.mulf %158, %162 : vector<8x8xf32>
    %164 = arith.truncf %163 : vector<8x8xf32> to vector<8x8xbf16>
    %165 = arith.truncf %150 : vector<8x8xf32> to vector<8x8xbf16>
    %cst_110 = arith.constant dense<0.000000e+00> : vector<8x8xf32>
    %166 = tpu.matmul %164, %165, %cst_110 {dimension_numbers = #tpu.dot_dimension_numbers<[1], [0], [0], [1], [0, 0, 1, 1], [], []>} : vector<8x8xbf16>, vector<8x8xbf16>, vector<8x8xf32> -> vector<8x8xf32>
    %167 = arith.truncf %166 : vector<8x8xf32> to vector<8x8xbf16>
    %c3_111 = arith.constant 3 : index
    %c0_112 = arith.constant 0 : index
    %c0_113 = arith.constant 0 : index
    %168 = vector.load %arg8[%c3_111, %c0_112, %c0_113] : memref<4x8x32xbf16, #tpu.memory_space<vmem>>, vector<1x8x32xbf16>
    %169 = vector.shape_cast %168 : vector<1x8x32xbf16> to vector<8x32xbf16>
    %cst_114 = arith.constant dense<0.000000e+00> : vector<8x32xf32>
    %170 = tpu.matmul %167, %169, %cst_114 {dimension_numbers = #tpu.dot_dimension_numbers<[1], [0], [0], [1], [0, 0, 1, 1], [], []>} : vector<8x8xbf16>, vector<8x32xbf16>, vector<8x32xf32> -> vector<8x32xf32>
    %171 = arith.addf %129, %170 : vector<8x32xf32>
    %c0_115 = arith.constant 0 : index
    %c0_116 = arith.constant 0 : index
    %172 = vector.load %arg9[%c0_115, %c0_116] : memref<1x32xf32, #tpu.memory_space<vmem>>, vector<1x32xf32>
    %173 = vector.broadcast %172 : vector<1x32xf32> to vector<8x32xf32>
    %174 = arith.addf %171, %173 : vector<8x32xf32>
    %175 = arith.addf %1, %174 : vector<8x32xf32>
    %cst_117 = arith.constant dense<0.000000e+00> : vector<8xf32>
    %176 = vector.multi_reduction <add>, %175, %cst_117 [1] : vector<8x32xf32> to vector<8xf32>
    %177 = vector.shape_cast %176 : vector<8xf32> to vector<8x1xf32>
    %cst_118 = arith.constant 3.200000e+01 : f32
    %178 = vector.broadcast %cst_118 : f32 to vector<8x1xf32>
    %179 = arith.divf %177, %178 : vector<8x1xf32>
    %180 = vector.broadcast %179 : vector<8x1xf32> to vector<8x32xf32>
    %181 = arith.subf %175, %180 : vector<8x32xf32>
    %182 = arith.mulf %181, %181 : vector<8x32xf32>
    %cst_119 = arith.constant dense<0.000000e+00> : vector<8xf32>
    %183 = vector.multi_reduction <add>, %182, %cst_119 [1] : vector<8x32xf32> to vector<8xf32>
    %184 = vector.shape_cast %183 : vector<8xf32> to vector<8x1xf32>
    %cst_120 = arith.constant 3.200000e+01 : f32
    %185 = vector.broadcast %cst_120 : f32 to vector<8x1xf32>
    %186 = arith.divf %184, %185 : vector<8x1xf32>
    %187 = vector.broadcast %179 : vector<8x1xf32> to vector<8x32xf32>
    %188 = arith.subf %175, %187 : vector<8x32xf32>
    %cst_121 = arith.constant 9.99999974E-6 : f32
    %189 = vector.broadcast %cst_121 : f32 to vector<8x1xf32>
    %190 = arith.addf %186, %189 : vector<8x1xf32>
    %191 = math.rsqrt %190 : vector<8x1xf32>
    %192 = vector.broadcast %191 : vector<8x1xf32> to vector<8x32xf32>
    %193 = arith.mulf %188, %192 : vector<8x32xf32>
    %c0_122 = arith.constant 0 : index
    %c0_123 = arith.constant 0 : index
    %194 = vector.load %arg10[%c0_122, %c0_123] : memref<1x32xf32, #tpu.memory_space<vmem>>, vector<1x32xf32>
    %195 = vector.broadcast %194 : vector<1x32xf32> to vector<8x32xf32>
    %196 = arith.mulf %193, %195 : vector<8x32xf32>
    %c0_124 = arith.constant 0 : index
    %c0_125 = arith.constant 0 : index
    %197 = vector.load %arg11[%c0_124, %c0_125] : memref<1x32xf32, #tpu.memory_space<vmem>>, vector<1x32xf32>
    %198 = vector.broadcast %197 : vector<1x32xf32> to vector<8x32xf32>
    %199 = arith.addf %196, %198 : vector<8x32xf32>
    %c0_126 = arith.constant 0 : index
    %c0_127 = arith.constant 0 : index
    %c0_128 = arith.constant 0 : index
    %200 = vector.load %arg12[%c0_126, %c0_127, %c0_128] : memref<1x8x32xf32, #tpu.memory_space<vmem>>, vector<1x8x32xf32>
    %201 = vector.shape_cast %200 : vector<1x8x32xf32> to vector<8x32xf32>
    %202 = vector.shape_cast %199 : vector<8x32xf32> to vector<1x8x32xf32>
    tpu.vector_store %arg12[%c0_126, %c0_127, %c0_128], %202 {strides = array<i32>} : memref<1x8x32xf32, #tpu.memory_space<vmem>>, vector<1x8x32xf32>,
    return
  }
  func.func @transform_0(%arg0: i32) -> (i32, i32, i32) {
    %c0_i32 = arith.constant 0 : i32
    %c0_i32_0 = arith.constant 0 : i32
    %c0_i32_1 = arith.constant 0 : i32
    return %arg0, %c0_i32, %c0_i32_0 : i32, i32, i32
  }
  func.func @transform_1(%arg0: i32) -> (i32, i32, i32) {
    %c0_i32 = arith.constant 0 : i32
    %c0_i32_0 = arith.constant 0 : i32
    %c0_i32_1 = arith.constant 0 : i32
    %c0_i32_2 = arith.constant 0 : i32
    return %c0_i32, %c0_i32_0, %c0_i32_1 : i32, i32, i32
  }
  func.func @transform_2(%arg0: i32) -> (i32, i32, i32) {
    %c0_i32 = arith.constant 0 : i32
    %c0_i32_0 = arith.constant 0 : i32
    %c0_i32_1 = arith.constant 0 : i32
    %c0_i32_2 = arith.constant 0 : i32
    return %c0_i32, %c0_i32_0, %c0_i32_1 : i32, i32, i32
  }
  func.func @transform_3(%arg0: i32) -> (i32, i32, i32) {
    %c0_i32 = arith.constant 0 : i32
    %c0_i32_0 = arith.constant 0 : i32
    %c0_i32_1 = arith.constant 0 : i32
    %c0_i32_2 = arith.constant 0 : i32
    return %c0_i32, %c0_i32_0, %c0_i32_1 : i32, i32, i32
  }
  func.func @transform_4(%arg0: i32) -> (i32, i32, i32) {
    %c0_i32 = arith.constant 0 : i32
    %c0_i32_0 = arith.constant 0 : i32
    %c0_i32_1 = arith.constant 0 : i32
    %c0_i32_2 = arith.constant 0 : i32
    return %c0_i32, %c0_i32_0, %c0_i32_1 : i32, i32, i32
  }
  func.func @transform_5(%arg0: i32) -> (i32, i32, i32) {
    %c0_i32 = arith.constant 0 : i32
    %c0_i32_0 = arith.constant 0 : i32
    %c0_i32_1 = arith.constant 0 : i32
    %c0_i32_2 = arith.constant 0 : i32
    return %c0_i32, %c0_i32_0, %c0_i32_1 : i32, i32, i32
  }
  func.func @transform_6(%arg0: i32) -> (i32, i32, i32) {
    %c0_i32 = arith.constant 0 : i32
    %c0_i32_0 = arith.constant 0 : i32
    %c0_i32_1 = arith.constant 0 : i32
    %c0_i32_2 = arith.constant 0 : i32
    return %c0_i32, %c0_i32_0, %c0_i32_1 : i32, i32, i32
  }
  func.func @transform_7(%arg0: i32) -> (i32, i32, i32) {
    %c0_i32 = arith.constant 0 : i32
    %c0_i32_0 = arith.constant 0 : i32
    %c0_i32_1 = arith.constant 0 : i32
    %c0_i32_2 = arith.constant 0 : i32
    return %c0_i32, %c0_i32_0, %c0_i32_1 : i32, i32, i32
  }
  func.func @transform_8(%arg0: i32) -> (i32, i32) {
    %c0_i32 = arith.constant 0 : i32
    %c0_i32_0 = arith.constant 0 : i32
    %c0_i32_1 = arith.constant 0 : i32
    return %c0_i32, %c0_i32_0 : i32, i32
  }
  func.func @transform_9(%arg0: i32) -> (i32, i32) {
    %c0_i32 = arith.constant 0 : i32
    %c0_i32_0 = arith.constant 0 : i32
    %c0_i32_1 = arith.constant 0 : i32
    return %c0_i32, %c0_i32_0 : i32, i32
  }
  func.func @transform_10(%arg0: i32) -> (i32, i32) {
    %c0_i32 = arith.constant 0 : i32
    %c0_i32_0 = arith.constant 0 : i32
    %c0_i32_1 = arith.constant 0 : i32
    return %c0_i32, %c0_i32_0 : i32, i32
  }
  func.func @transform_11(%arg0: i32) -> (i32, i32, i32) {
    %c0_i32 = arith.constant 0 : i32
    %c0_i32_0 = arith.constant 0 : i32
    %c0_i32_1 = arith.constant 0 : i32
    return %arg0, %c0_i32, %c0_i32_0 : i32, i32, i32
  }
}

module attributes {stable_mosaic.version = 11 : i64} {
  func.func @_linear_kernel(%arg0: i32, %arg1: i32, %arg2: i32, %arg3: memref<2x256xf32, #tpu.memory_space<vmem>>, %arg4: memref<256x300xbf16, #tpu.memory_space<vmem>>, %arg5: memref<1x300xf32, #tpu.memory_space<vmem>>, %arg6: memref<2x300xf32, #tpu.memory_space<vmem>>, %arg7: memref<2x300xf32, #tpu.memory_space<vmem>>) attributes {dimension_semantics = [#tpu.dimension_semantics<parallel>, #tpu.dimension_semantics<parallel>, #tpu.dimension_semantics<arbitrary>], iteration_bounds = array<i64: 1, 1, 1>, scalar_prefetch = 0 : i64, scratch_operands = 1 : i64, tpu.core_type = #tpu.core_type<tc>, window_params = [{transform_indices = @transform_0, window_bounds = array<i64: 2, 256>}, {transform_indices = @transform_1, window_bounds = array<i64: 256, 300>}, {transform_indices = @transform_2, window_bounds = array<i64: 1, 300>}, {transform_indices = @transform_3, window_bounds = array<i64: 2, 300>}]} {
    %c0_i32 = arith.constant 0 : i32
    %0 = arith.cmpi eq, %arg2, %c0_i32 : i32
    %1 = arith.extui %0 : i1 to i32
    %c0_i32_0 = arith.constant 0 : i32
    %2 = arith.cmpi ne, %1, %c0_i32_0 : i32
    scf.if %2 {
      %cst_10 = arith.constant 0.000000e+00 : f32
      %13 = vector.broadcast %cst_10 : f32 to vector<2x300xf32>
      %c0_11 = arith.constant 0 : index
      %c0_12 = arith.constant 0 : index
      %14 = vector.load %arg7[%c0_11, %c0_12] : memref<2x300xf32, #tpu.memory_space<vmem>>, vector<2x300xf32>
      tpu.vector_store %arg7[%c0_11, %c0_12], %13 {strides = array<i32>} : memref<2x300xf32, #tpu.memory_space<vmem>>, vector<2x300xf32>,
    } else {
    }
    %c0 = arith.constant 0 : index
    %c0_1 = arith.constant 0 : index
    %3 = vector.load %arg7[%c0, %c0_1] : memref<2x300xf32, #tpu.memory_space<vmem>>, vector<2x300xf32>
    %c0_2 = arith.constant 0 : index
    %c0_3 = arith.constant 0 : index
    %4 = vector.load %arg3[%c0_2, %c0_3] : memref<2x256xf32, #tpu.memory_space<vmem>>, vector<2x256xf32>
    %5 = arith.truncf %4 : vector<2x256xf32> to vector<2x256xbf16>
    %c0_4 = arith.constant 0 : index
    %c0_5 = arith.constant 0 : index
    %6 = vector.load %arg4[%c0_4, %c0_5] : memref<256x300xbf16, #tpu.memory_space<vmem>>, vector<256x300xbf16>
    %cst = arith.constant dense<0.000000e+00> : vector<2x300xf32>
    %7 = tpu.matmul %5, %6, %cst {dimension_numbers = #tpu.dot_dimension_numbers<[1], [0], [0], [1], [0, 0, 1, 1], [], []>} : vector<2x256xbf16>, vector<256x300xbf16>, vector<2x300xf32> -> vector<2x300xf32>
    %8 = arith.addf %3, %7 : vector<2x300xf32>
    %c0_6 = arith.constant 0 : index
    %c0_7 = arith.constant 0 : index
    %9 = vector.load %arg7[%c0_6, %c0_7] : memref<2x300xf32, #tpu.memory_space<vmem>>, vector<2x300xf32>
    tpu.vector_store %arg7[%c0_6, %c0_7], %8 {strides = array<i32>} : memref<2x300xf32, #tpu.memory_space<vmem>>, vector<2x300xf32>,
    %c0_i32_8 = arith.constant 0 : i32
    %10 = arith.cmpi eq, %arg2, %c0_i32_8 : i32
    %11 = arith.extui %10 : i1 to i32
    %c0_i32_9 = arith.constant 0 : i32
    %12 = arith.cmpi ne, %11, %c0_i32_9 : i32
    scf.if %12 {
      %c0_10 = arith.constant 0 : index
      %c0_11 = arith.constant 0 : index
      %13 = vector.load %arg7[%c0_10, %c0_11] : memref<2x300xf32, #tpu.memory_space<vmem>>, vector<2x300xf32>
      %c0_12 = arith.constant 0 : index
      %c0_13 = arith.constant 0 : index
      %14 = vector.load %arg5[%c0_12, %c0_13] : memref<1x300xf32, #tpu.memory_space<vmem>>, vector<1x300xf32>
      %15 = vector.broadcast %14 : vector<1x300xf32> to vector<2x300xf32>
      %16 = arith.addf %13, %15 : vector<2x300xf32>
      %cst_14 = arith.constant 0.000000e+00 : f32
      %17 = vector.broadcast %cst_14 : f32 to vector<2x300xf32>
      %18 = arith.maximumf %16, %17 : vector<2x300xf32>
      %c0_15 = arith.constant 0 : index
      %c0_16 = arith.constant 0 : index
      %19 = vector.load %arg6[%c0_15, %c0_16] : memref<2x300xf32, #tpu.memory_space<vmem>>, vector<2x300xf32>
      tpu.vector_store %arg6[%c0_15, %c0_16], %18 {strides = array<i32>} : memref<2x300xf32, #tpu.memory_space<vmem>>, vector<2x300xf32>,
    } else {
    }
    return
  }
  func.func @transform_0(%arg0: i32, %arg1: i32, %arg2: i32) -> (i32, i32) {
    %c0_i32 = arith.constant 0 : i32
    return %arg0, %arg2 : i32, i32
  }
  func.func @transform_1(%arg0: i32, %arg1: i32, %arg2: i32) -> (i32, i32) {
    %c0_i32 = arith.constant 0 : i32
    return %arg2, %arg1 : i32, i32
  }
  func.func @transform_2(%arg0: i32, %arg1: i32, %arg2: i32) -> (i32, i32) {
    %c0_i32 = arith.constant 0 : i32
    %c0_i32_0 = arith.constant 0 : i32
    return %c0_i32, %arg1 : i32, i32
  }
  func.func @transform_3(%arg0: i32, %arg1: i32, %arg2: i32) -> (i32, i32) {
    %c0_i32 = arith.constant 0 : i32
    return %arg0, %arg1 : i32, i32
  }
}

module attributes {stable_mosaic.version = 11 : i64} {
  func.func @_linear_kernel(%arg0: i32, %arg1: i32, %arg2: i32, %arg3: memref<2x300xf32, #tpu.memory_space<vmem>>, %arg4: memref<300x10xbf16, #tpu.memory_space<vmem>>, %arg5: memref<1x10xf32, #tpu.memory_space<vmem>>, %arg6: memref<2x10xf32, #tpu.memory_space<vmem>>, %arg7: memref<2x10xf32, #tpu.memory_space<vmem>>) attributes {dimension_semantics = [#tpu.dimension_semantics<parallel>, #tpu.dimension_semantics<parallel>, #tpu.dimension_semantics<arbitrary>], iteration_bounds = array<i64: 1, 1, 1>, scalar_prefetch = 0 : i64, scratch_operands = 1 : i64, tpu.core_type = #tpu.core_type<tc>, window_params = [{transform_indices = @transform_0, window_bounds = array<i64: 2, 300>}, {transform_indices = @transform_1, window_bounds = array<i64: 300, 10>}, {transform_indices = @transform_2, window_bounds = array<i64: 1, 10>}, {transform_indices = @transform_3, window_bounds = array<i64: 2, 10>}]} {
    %c0_i32 = arith.constant 0 : i32
    %0 = arith.cmpi eq, %arg2, %c0_i32 : i32
    %1 = arith.extui %0 : i1 to i32
    %c0_i32_0 = arith.constant 0 : i32
    %2 = arith.cmpi ne, %1, %c0_i32_0 : i32
    scf.if %2 {
      %cst_10 = arith.constant 0.000000e+00 : f32
      %13 = vector.broadcast %cst_10 : f32 to vector<2x10xf32>
      %c0_11 = arith.constant 0 : index
      %c0_12 = arith.constant 0 : index
      %14 = vector.load %arg7[%c0_11, %c0_12] : memref<2x10xf32, #tpu.memory_space<vmem>>, vector<2x10xf32>
      tpu.vector_store %arg7[%c0_11, %c0_12], %13 {strides = array<i32>} : memref<2x10xf32, #tpu.memory_space<vmem>>, vector<2x10xf32>,
    } else {
    }
    %c0 = arith.constant 0 : index
    %c0_1 = arith.constant 0 : index
    %3 = vector.load %arg7[%c0, %c0_1] : memref<2x10xf32, #tpu.memory_space<vmem>>, vector<2x10xf32>
    %c0_2 = arith.constant 0 : index
    %c0_3 = arith.constant 0 : index
    %4 = vector.load %arg3[%c0_2, %c0_3] : memref<2x300xf32, #tpu.memory_space<vmem>>, vector<2x300xf32>
    %5 = arith.truncf %4 : vector<2x300xf32> to vector<2x300xbf16>
    %c0_4 = arith.constant 0 : index
    %c0_5 = arith.constant 0 : index
    %6 = vector.load %arg4[%c0_4, %c0_5] : memref<300x10xbf16, #tpu.memory_space<vmem>>, vector<300x10xbf16>
    %cst = arith.constant dense<0.000000e+00> : vector<2x10xf32>
    %7 = tpu.matmul %5, %6, %cst {dimension_numbers = #tpu.dot_dimension_numbers<[1], [0], [0], [1], [0, 0, 1, 1], [], []>} : vector<2x300xbf16>, vector<300x10xbf16>, vector<2x10xf32> -> vector<2x10xf32>
    %8 = arith.addf %3, %7 : vector<2x10xf32>
    %c0_6 = arith.constant 0 : index
    %c0_7 = arith.constant 0 : index
    %9 = vector.load %arg7[%c0_6, %c0_7] : memref<2x10xf32, #tpu.memory_space<vmem>>, vector<2x10xf32>
    tpu.vector_store %arg7[%c0_6, %c0_7], %8 {strides = array<i32>} : memref<2x10xf32, #tpu.memory_space<vmem>>, vector<2x10xf32>,
    %c0_i32_8 = arith.constant 0 : i32
    %10 = arith.cmpi eq, %arg2, %c0_i32_8 : i32
    %11 = arith.extui %10 : i1 to i32
    %c0_i32_9 = arith.constant 0 : i32
    %12 = arith.cmpi ne, %11, %c0_i32_9 : i32
    scf.if %12 {
      %c0_10 = arith.constant 0 : index
      %c0_11 = arith.constant 0 : index
      %13 = vector.load %arg7[%c0_10, %c0_11] : memref<2x10xf32, #tpu.memory_space<vmem>>, vector<2x10xf32>
      %c0_12 = arith.constant 0 : index
      %c0_13 = arith.constant 0 : index
      %14 = vector.load %arg5[%c0_12, %c0_13] : memref<1x10xf32, #tpu.memory_space<vmem>>, vector<1x10xf32>
      %15 = vector.broadcast %14 : vector<1x10xf32> to vector<2x10xf32>
      %16 = arith.addf %13, %15 : vector<2x10xf32>
      %c0_14 = arith.constant 0 : index
      %c0_15 = arith.constant 0 : index
      %17 = vector.load %arg6[%c0_14, %c0_15] : memref<2x10xf32, #tpu.memory_space<vmem>>, vector<2x10xf32>
      tpu.vector_store %arg6[%c0_14, %c0_15], %16 {strides = array<i32>} : memref<2x10xf32, #tpu.memory_space<vmem>>, vector<2x10xf32>,
    } else {
    }
    return
  }
  func.func @transform_0(%arg0: i32, %arg1: i32, %arg2: i32) -> (i32, i32) {
    %c0_i32 = arith.constant 0 : i32
    return %arg0, %arg2 : i32, i32
  }
  func.func @transform_1(%arg0: i32, %arg1: i32, %arg2: i32) -> (i32, i32) {
    %c0_i32 = arith.constant 0 : i32
    return %arg2, %arg1 : i32, i32
  }
  func.func @transform_2(%arg0: i32, %arg1: i32, %arg2: i32) -> (i32, i32) {
    %c0_i32 = arith.constant 0 : i32
    %c0_i32_0 = arith.constant 0 : i32
    return %c0_i32, %arg1 : i32, i32
  }
  func.func @transform_3(%arg0: i32, %arg1: i32, %arg2: i32) -> (i32, i32) {
    %c0_i32 = arith.constant 0 : i32
    return %arg0, %arg1 : i32, i32
  }
}

</mosaic_0001>

<bundles_post_ra>
// kernel: modelo_forward.6
= control target key start
LH: loop header
LB: loop body
LE: loop exit
PB: predicated region body
PF: predicated region fallthrough
CT: control target
= control target key end

     0   :  { %s2353_s17 = smov 0   ;;  %s2666_s0 = inlined_call_operand.vmem [shape: f32[2,8,32], index: 0, kind: input, shape index: {}]   ;;  %s2667_s1 = inlined_call_operand.vmem [shape: bf16[4,32,8], index: 1, kind: input, shape index: {}]   ;;  %s2668_s2 = inlined_call_operand.vmem [shape: bf16[4,32,8], index: 2, kind: input, shape index: {}]   ;;  %s2669_s3 = inlined_call_operand.vmem [shape: bf16[4,32,8], index: 3, kind: input, shape index: {}]   ;;  %s2670_s4 = inlined_call_operand.vmem [shape: f32[4,1,8], index: 4, kind: input, shape index: {}]   ;;  %s2671_s5 = inlined_call_operand.vmem [shape: f32[4,1,8], index: 5, kind: input, shape index: {}]   ;;  %s2672_s6 = inlined_call_operand.vmem [shape: f32[4,1,8], index: 6, kind: input, shape index: {}]   ;;  %s2673_s7 = inlined_call_operand.vmem [shape: bf16[4,8,32], index: 7, kind: input, shape index: {}]   ;;  %s2674_s8 = inlined_call_operand.vmem [shape: f32[1,32], index: 8, kind: input, shape index: {}]   ;;  %s2675_s9 = inlined_call_operand.vmem [shape: f32[1,32], index: 9, kind: input, shape index: {}]   ;;  %s2676_s10 = inlined_call_operand.vmem [shape: f32[1,32], index: 10, kind: input, shape index: {}]   ;;  %s2677_s11 = inlined_call_operand.vmem [shape: f32[2,8,32], index: 11, kind: output, shape index: {}]  }
   0x1 LB: > { %s1883_s18 = sadd.s32 4294967295, %s2289_s17   ;;  %p1887_p0 = scmp.ge.s32.totalorder %s2289_s17, 1  ;;  %s2289_s17 = sphi %s2353_s17, %s21_s17  }
   0x2   : > { %p336_p1 = scmp.lt.s32.totalorder %s2289_s17, 3 }
   0x4   : > { %p337_p2 = pnand %p1887_p0, %p336_p1 }
   0x5   : > { %v2241_v0 = vld [vmem:[%s2668_s2] sm:$0xff] (!%p337_p2)   ;;  %v2291_v1 = vmov (!%p337_p2), 0.0   ;;  %v2242_v2 = vld [vmem:[%s2668_s2 + $0x8] sm:$0xff] (!%p337_p2)   ;;  %vm2292_vm0 = vmmov (!%p337_p2), 0   ;;  %p374_p3 = scmp.lt.s32.totalorder (!%p337_p2), %s1883_s18, 1  ;;  %vm408_vm1 = vcmask (!%p337_p2), 261120  }
   0x6   : > { %340 = sbr.rel (%p337_p2) target bundleno = 4217 (0x1079), region = 64  ;;  %2071 = vmatprep.subr.bf16.mxu1 (!%p337_p2), %v2291_v1  ;;  %2063 = vmatprep.subr.bf16.mxu0 (!%p337_p2), %v2291_v1  ;;  %v2243_v3 = vld [vmem:[%s2667_s1] sm:$0xff] (!%p337_p2)   ;;  %v2244_v4 = vld [vmem:[%s2667_s1 + $0x8] sm:$0xff] (!%p337_p2)   ;;  %vm580_vm2 = vcmask (!%p337_p2), 64512   ;;  %vm643_vm3 = vcmask (!%p337_p2), 1043456   ;;  %v2249_v42 = vld [vmem:[%s2667_s1 + $0x10] sm:$0xff] (!%p337_p2)  }
   0x7   : > { %2072 = vmatpush3.bf16.msra.mxu1 (!%p337_p2), %v2241_v0  ;;  %2075 = vmatprep.mubr.msk.bf16.mxu1 (!%p337_p2), %vm2292_vm0, %v2291_v1  ;;  %v1894_v7 = vld [vmem:[%s2671_s5] ss:$0 sm:$0xff] (!%p337_p2)  ;;  %v2246_v23 = vld [vmem:[%s2669_s3 + $0x8] sm:$0xff] (!%p337_p2)   ;;  %v2250_v43 = vld [vmem:[%s2667_s1 + $0x18] sm:$0xff] (!%p337_p2)  }
   0x8   : > { %2073 = vmatprep.subr.bf16.mxu1 (!%p337_p2), %v2291_v1  ;;  %2067 = vmatprep.mubr.msk.bf16.mxu0 (!%p337_p2), %vm2292_vm0, %v2291_v1  ;;  %v1890_v14 = vld [vmem:[%s2670_s4] ss:$0 sm:$0xff] (!%p337_p2)  ;;  %v2247_v47 = vld [vmem:[%s2668_s2 + $0x10] sm:$0xff] (!%p337_p2)   ;;  %v2248_v49 = vld [vmem:[%s2668_s2 + $0x18] sm:$0xff] (!%p337_p2)  }
   0x9   : > { %2064 = vmatpush3.bf16.msra.mxu0 (!%p337_p2), %v2243_v3  ;;  %v2245_v22 = vld [vmem:[%s2669_s3] sm:$0xff] (!%p337_p2)  }
   0xa   : > { %2065 = vmatprep.subr.bf16.mxu0 (!%p337_p2), %v2291_v1  ;;  %v1898_v37 = vld [vmem:[%s2672_s6] ss:$0 sm:$0xff] (!%p337_p2)  ;;  %v1918_v58 = vld [vmem:[%s2671_s5 + $0x1] ss:$0 sm:$0xff] (!%p337_p2) }
   0xb   : > { %2074 = vmatpush3.bf16.msra.mxu1 (!%p337_p2), %v2242_v2  ;;  %v1909_v63 = vld [vmem:[%s2670_s4 + $0x1] ss:$0 sm:$0xff] (!%p337_p2) }
   0xc   : > { %2087 = vmatprep.subr.bf16.mxu1 (!%p337_p2), %v2291_v1 }
   0xd   : > { %s2679_s18 = smov (!%p374_p3, %s1883_s18), 1  ;;  %2066 = vmatpush3.bf16.msra.mxu0 %v2244_v4 }
   0xe   : > { %s1888_s27 = sshll.u32 %s2679_s18, 3  ;;  %2079 = vmatprep.subr.bf16.mxu0 %v2291_v1 }
   0xf   : > { %s377_s30 = scalar_lea.vmem %s2666_s0, %s1888_s27  ;;  %s381_s12 = scalar_lea.vmem %s2677_s11, %s1888_s27 }
  0x10   : > { %v2390_v5 = vld [vmem:[%s377_s30] sm:$0xff] }
  0x11   : > { %v2394_v6 = vpack.c.bf16 %v2390_v5, %v2390_v5 }
  0x13   : > { %2076 = vmatmul.mubr.msk.bf16.vlgmr.msra.gmra.mrb[0].mxu1 %vm408_vm1, %v2394_v6  ;;  %2068 = vmatmul.mubr.msk.bf16.vlgmr.msra.gmra.mrb[0].mxu0 %vm408_vm1, %v2394_v6 }
  0x14   : > { %2089 = vmatprep.mubr.msk.bf16.mxu1 %vm2292_vm0, %v2291_v1  ;;  %2083 = vmatprep.mubr.msk.bf16.mxu0 %vm2292_vm0, %v2291_v1 }
  0x15   : > { %2080 = vmatpush3.bf16.msra.mxu0 %v2245_v22 }
  0x16   : > { %2081 = vmatprep.subr.bf16.mxu0 %v2291_v1 }
  0x19   : > { %2082 = vmatpush3.bf16.msra.mxu0 %v2246_v23 }
  0x1a   : > { %2093 = vmatprep.subr.bf16.mxu0 %v2291_v1 }
  0x1c   : > { %2084 = vmatmul.mubr.msk.bf16.vlgmr.msra.gmra.mrb[4].mxu0 %vm408_vm1, %v2394_v6 }
  0x1d   : > { %2095 = vmatprep.mubr.msk.bf16.mxu0 %vm2292_vm0, %v2291_v1 }
  0xe6   : > { %v509_v8 = vpop.f32.mrb[0].mxu1  ;;  %v446_v9 = vpop.f32.mrb[0].mxu0 }
  0xe7   : > { %v510_v10 = vadd.f32 %v1894_v7, %v509_v8  ;;  %v2077_v11 = vpop.f32.mrb[1].mxu1  ;;  %v2069_v12 = vpop.f32.mrb[1].mxu0  ;;  %v447_v20 = vadd.f32 %v1890_v14, %v446_v9  ;;  %v2251_v8 = vld [vmem:[%s2669_s3 + $0x10] sm:$0xff]   ;;  %v2252_v9 = vld [vmem:[%s2669_s3 + $0x18] sm:$0xff]  }
  0xe8   : > { %v512_v13 = vpop.f32.mrb[2].mxu1  ;;  %v449_v15 = vpop.f32.mrb[2].mxu0 }
  0xe9   : > { %v579_v16 = vpack.c.bf16 %v510_v10, %v510_v10  ;;  %v2078_v17 = vpop.f32.mrb[3].mxu1  ;;  %v2070_v18 = vpop.f32.mrb[3].mxu0  ;;  %v578_v21 = vpack.c.bf16 %v447_v20, %v447_v20  ;;  %v1927_v15 = vld [vmem:[%s2672_s6 + $0x1] ss:$0 sm:$0xff] }
  0xeb   : > { %v585_v19 = vsel %vm580_vm2, %v579_v16, 0 }
  0xec   : > { %2088 = vmatpush3.bf16.xpose.msra.mxu1 %v585_v19 }
  0xed   : > { %2099 = vmatprep.subr.bf16.mxu1 %v2291_v1 }
  0xef   : > { %v572_v34 = vpop.f32.mrb[4].mxu0 }
  0xf0   : > { %v2085_v35 = vpop.f32.mrb[5].mxu0  ;;  %v573_v39 = vadd.f32 %v1898_v37, %v572_v34 }
  0xf1   : > { %v575_v36 = vpop.f32.mrb[6].mxu0 }
  0xf2   : > { %v2086_v38 = vpop.f32.mrb[7].mxu0  ;;  %v639_v40 = vpack.c.bf16 %v573_v39, %v573_v39  ;;  %v2253_v36 = vld [vmem:[%s2668_s2 + $0x20] sm:$0xff]  }
  0xf3   : > { %2090 = vmatmul.mubr.msk.bf16.vlgmr.msra.gmra.mrb[4].mxu1 %vm580_vm2, %v578_v21  ;;  %v2254_v38 = vld [vmem:[%s2668_s2 + $0x28] sm:$0xff]  }
  0xf4   : > { %2103 = vmatprep.mubr.msk.bf16.mxu1 %vm2292_vm0, %v2291_v1  ;;  %v645_v41 = vsel %vm643_vm3, %v639_v40, 0  ;;  %2100 = vmatpush3.bf16.msra.mxu1 %v2249_v42  ;;  %v2255_v40 = vld [vmem:[%s2667_s1 + $0x20] sm:$0xff]  }
  0xf5   : > { %2094 = vmatpush3.bf16.msra.mxu0 %v645_v41  ;;  %2101 = vmatprep.subr.bf16.mxu1 %v2291_v1 }
  0xf6   : > { %2107 = vmatprep.subr.bf16.mxu0 %v2291_v1 }
  0xf8   : > { %2102 = vmatpush3.bf16.msra.mxu1 %v2250_v43 }
  0xf9   : > { %2115 = vmatprep.subr.bf16.mxu1 %v2291_v1 }
  0xfb   : > { %2104 = vmatmul.mubr.msk.bf16.vlgmr.msra.gmra.mrb[8].mxu1 %vm408_vm1, %v2394_v6 }
  0xfc   : > { %2119 = vmatprep.mubr.msk.bf16.mxu1 %vm2292_vm0, %v2291_v1  ;;  %2116 = vmatpush3.bf16.msra.mxu1 %v2251_v8 }
  0xfd   : > { %2117 = vmatprep.subr.bf16.mxu1 %v2291_v1 }
 0x100   : > { %2118 = vmatpush3.bf16.msra.mxu1 %v2252_v9  ;;  %v2257_v9 = vld [vmem:[%s2669_s3 + $0x20] sm:$0xff]  }
 0x101   : > { %2129 = vmatprep.subr.bf16.mxu1 %v2291_v1 }
 0x103   : > { %2120 = vmatmul.mubr.msk.bf16.vlgmr.msra.gmra.mrb[12].mxu1 %vm408_vm1, %v2394_v6 }
 0x104   : > { %2131 = vmatprep.mubr.msk.bf16.mxu1 %vm2292_vm0, %v2291_v1 }
 0x1c6   : > { %v621_v24 = vpop.f32.mrb[4].mxu1 }
 0x1c7   : > { %v2091_v25 = vpop.f32.mrb[5].mxu1  ;;  %v627_v26 = vsel %vm580_vm2, %v621_v24, -inf }
 0x1c8   : > { %628 = vmax.xlane.f32.xlu0 %v627_v26  ;;  %v624_v27 = vpop.f32.mrb[6].mxu1 }
 0x1c9   : > { %v2092_v28 = vpop.f32.mrb[7].mxu1 }
 0x1ca   : > { %v1933_v28 = vld [vmem:[%s2673_s7 + $0x4] sm:$0xf] }
 0x1ce   : > { %v748_v50 = vpop.f32.mrb[8].mxu1 }
 0x1cf   : > { %v2105_v51 = vpop.f32.mrb[9].mxu1  ;;  %v749_v4 = vadd.f32 %v1909_v63, %v748_v50  ;;  %v1950_v50 = vld [vmem:[%s2671_s5 + $0x2] ss:$0 sm:$0xff] }
 0x1d0   : > { %v751_v52 = vpop.f32.mrb[10].mxu1  ;;  %v1941_v63 = vld [vmem:[%s2670_s4 + $0x2] ss:$0 sm:$0xff] }
 0x1d1   : > { %v2106_v53 = vpop.f32.mrb[11].mxu1  ;;  %v884_v7 = vpack.c.bf16 %v749_v4, %v749_v4 }
 0x1d6   : > { %v878_v16 = vpop.f32.mrb[12].mxu1 }
 0x1d7   : > { %v879_v17 = vadd.f32 %v1927_v15, %v878_v16  ;;  %v2121_v18 = vpop.f32.mrb[13].mxu1 }
 0x1d8   : > { %v881_v19 = vpop.f32.mrb[14].mxu1 }
 0x1d9   : > { %v944_v20 = vpack.c.bf16 %v879_v17, %v879_v17  ;;  %v2122_v21 = vpop.f32.mrb[15].mxu1 }
 0x1db   : > { %v949_v22 = vsel %vm643_vm3, %v944_v20, 0 }
 0x1dc   : > { %2130 = vmatpush3.bf16.msra.mxu1 %v949_v22 }
 0x1dd   : > { %2141 = vmatprep.subr.bf16.mxu1 %v2291_v1 }
 0x255   : > { %v629_v29 = vpop.xlane.xlu0 %628 }
 0x256   : > { %v630_v30 = vsub.f32 %v621_v24, %v629_v29  ;;  %v998_v29 = vsel %vm643_vm3, %v1933_v28, 0 }
 0x258   : > { %v631_v31 = vmul.f32 1.442695, %v630_v30 }
 0x25a   : > { %2265 = vpow2.f32 %v631_v31 }
 0x264   : > { %v2266_v32 = vpop.eup %2265 }
 0x265   : > { %v633_v33 = vsel %vm580_vm2, %v2266_v32, 0.0 }
 0x266   : > { %634 = vadd.xlane.f32.xlu0 %v633_v33 }
 0x2f3   : > { %v635_v44 = vpop.xlane.xlu0 %634 }
 0x2f4   : > { %2267 = vrcp.f32 %v635_v44 }
 0x2fe   : > { %v2268_v45 = vpop.eup %2267 }
 0x2ff   : > { %v637_v46 = vmul.f32 %v2268_v45, %v2266_v32  ;;  %v688_v32 = vld [vmem:[%s2673_s7] sm:$0xf]  ;;  %v2256_v45 = vld [vmem:[%s2667_s1 + $0x28] sm:$0xff]  }
 0x300   : > { %v1044_v35 = vsel %vm643_vm3, %v688_v32, 0 }
 0x301   : > { %v638_v48 = vpack.c.bf16 %v637_v46, %v637_v46 }
 0x303   : > { %2096 = vmatmul.mubr.msk.bf16.vlgmr.msra.gmra.mrb[8].mxu0 %vm580_vm2, %v638_v48 }
 0x304   : > { %2108 = vmatpush3.bf16.msra.mxu0 %v2247_v47  ;;  %2111 = vmatprep.mubr.msk.bf16.mxu0 %vm2292_vm0, %v2291_v1 }
 0x305   : > { %2109 = vmatprep.subr.bf16.mxu0 %v2291_v1 }
 0x308   : > { %2110 = vmatpush3.bf16.msra.mxu0 %v2248_v49 }
 0x309   : > { %2123 = vmatprep.subr.bf16.mxu0 %v2291_v1 }
 0x30b   : > { %2112 = vmatmul.mubr.msk.bf16.vlgmr.msra.gmra.mrb[12].mxu0 %vm408_vm1, %v2394_v6 }
 0x30c   : > { %2125 = vmatprep.mubr.msk.bf16.mxu0 %vm2292_vm0, %v2291_v1 }
 0x3d6   : > { %v2462_v54 = vpop.f32.mrb[8].mxu0 }
 0x3d7   : > { %v2097_v55 = vpop.f32.mrb[9].mxu0  ;;  %v687_v37 = vpack.c.bf16 %v2462_v54, %v2462_v54 }
 0x3d8   : > { %v684_v56 = vpop.f32.mrb[10].mxu0 }
 0x3d9   : > { %v2098_v57 = vpop.f32.mrb[11].mxu0 }
 0x3de   : > { %v813_v59 = vpop.f32.mrb[12].mxu0 }
 0x3df   : > { %v814_v60 = vadd.f32 %v1918_v58, %v813_v59  ;;  %v2113_v61 = vpop.f32.mrb[13].mxu0 }
 0x3e0   : > { %v816_v62 = vpop.f32.mrb[14].mxu0 }
 0x3e1   : > { %v885_v0 = vpack.c.bf16 %v814_v60, %v814_v60  ;;  %v2114_v2 = vpop.f32.mrb[15].mxu0 }
 0x3e3   : > { %v890_v3 = vsel %vm580_vm2, %v885_v0, 0 }
 0x3e4   : > { %2124 = vmatpush3.bf16.xpose.msra.mxu0 %v890_v3 }
 0x3e5   : > { %2135 = vmatprep.subr.bf16.mxu0 %v2291_v1 }
 0x3eb   : > { %2126 = vmatmul.mubr.msk.bf16.vlgmr.msra.gmra.mrb[16].mxu0 %vm580_vm2, %v884_v7 }
 0x3ec   : > { %2137 = vmatprep.mubr.msk.bf16.mxu0 %vm2292_vm0, %v2291_v1  ;;  %2136 = vmatpush3.bf16.msra.mxu0 %v998_v29  ;;  %v1965_v29 = vld [vmem:[%s2673_s7 + $0x8] sm:$0xf] }
 0x3ed   : > { %2147 = vmatprep.subr.bf16.mxu0 %v2291_v1 }
 0x4be   : > { %v926_v10 = vpop.f32.mrb[16].mxu0 }
 0x4bf   : > { %v2127_v11 = vpop.f32.mrb[17].mxu0  ;;  %v932_v12 = vsel %vm580_vm2, %v926_v10, -inf }
 0x4c0   : > { %933 = vmax.xlane.f32.xlu1 %v932_v12  ;;  %v929_v13 = vpop.f32.mrb[18].mxu0 }
 0x4c1   : > { %v2128_v14 = vpop.f32.mrb[19].mxu0 }
 0x54d   : > { %v934_v23 = vpop.xlane.xlu1 %933 }
 0x54e   : > { %v935_v24 = vsub.f32 %v926_v10, %v934_v23  ;;  %v2258_v10 = vld [vmem:[%s2669_s3 + $0x28] sm:$0xff]  }
 0x550   : > { %v936_v25 = vmul.f32 1.442695, %v935_v24  ;;  %v1959_v24 = vld [vmem:[%s2672_s6 + $0x2] ss:$0 sm:$0xff] }
 0x552   : > { %2269 = vpow2.f32 %v936_v25 }
 0x55c   : > { %v2270_v26 = vpop.eup %2269 }
 0x55d   : > { %v938_v27 = vsel %vm580_vm2, %v2270_v26, 0.0 }
 0x55e   : > { %939 = vadd.xlane.f32.xlu1 %v938_v27 }
 0x5eb   : > { %v940_v30 = vpop.xlane.xlu1 %939 }
 0x5ec   : > { %2271 = vrcp.f32 %v940_v30  ;;  %v1395_v30 = vsel %vm643_vm3, %v1965_v29, 0 }
 0x5f6   : > { %v2272_v31 = vpop.eup %2271 }
 0x5f7   : > { %v942_v33 = vmul.f32 %v2272_v31, %v2270_v26 }
 0x5f9   : > { %v943_v34 = vpack.c.bf16 %v942_v33, %v942_v33 }
 0x5fb   : > { %2132 = vmatmul.mubr.msk.bf16.vlgmr.msra.gmra.mrb[16].mxu1 %vm580_vm2, %v943_v34 }
 0x5fc   : > { %2142 = vmatpush3.bf16.msra.mxu1 %v1044_v35  ;;  %2143 = vmatprep.mubr.msk.bf16.mxu1 %vm2292_vm0, %v2291_v1  ;;  %v2261_v35 = vld [vmem:[%s2667_s1 + $0x30] sm:$0xff]  }
 0x5fd   : > { %2155 = vmatprep.subr.bf16.mxu1 %v2291_v1 }
 0x603   : > { %2144 = vmatmul.mubr.msk.bf16.vlgmr.msra.gmra.mrb[20].mxu1 %vm580_vm2, %v687_v37 }
 0x604   : > { %2156 = vmatpush3.bf16.msra.mxu1 %v2253_v36  ;;  %2159 = vmatprep.mubr.msk.bf16.mxu1 %vm2292_vm0, %v2291_v1  ;;  %v2262_v36 = vld [vmem:[%s2667_s1 + $0x38] sm:$0xff]  }
 0x605   : > { %2157 = vmatprep.subr.bf16.mxu1 %v2291_v1 }
 0x608   : > { %2158 = vmatpush3.bf16.msra.mxu1 %v2254_v38  ;;  %v2259_v38 = vld [vmem:[%s2668_s2 + $0x30] sm:$0xff]  }
 0x609   : > { %2171 = vmatprep.subr.bf16.mxu1 %v2291_v1 }
 0x60b   : > { %2160 = vmatmul.mubr.msk.bf16.vlgmr.msra.gmra.mrb[24].mxu1 %vm408_vm1, %v2394_v6 }
 0x60c   : > { %2173 = vmatprep.mubr.msk.bf16.mxu1 %vm2292_vm0, %v2291_v1 }
 0x6ce   : > { %v985_v39 = vpop.f32.mrb[16].mxu1 }
 0x6cf   : > { %v991_v41 = vpack.c.bf16 %v985_v39, %v985_v39  ;;  %v2133_v42 = vpop.f32.mrb[17].mxu1 }
 0x6d0   : > { %v988_v43 = vpop.f32.mrb[18].mxu1 }
 0x6d1   : > { %v2134_v44 = vpop.f32.mrb[19].mxu1  ;;  %2138 = vmatmul.mubr.msk.bf16.vlgmr.msra.gmra.mrb[20].mxu0 %vm580_vm2, %v991_v41  ;;  %v2260_v43 = vld [vmem:[%s2668_s2 + $0x38] sm:$0xff]  }
 0x6d2   : > { %2148 = vmatpush3.bf16.msra.mxu0 %v2255_v40  ;;  %2151 = vmatprep.mubr.msk.bf16.mxu0 %vm2292_vm0, %v2291_v1 }
 0x6d3   : > { %2149 = vmatprep.subr.bf16.mxu0 %v2291_v1 }
 0x6d6   : > { %v1080_v46 = vpop.f32.mrb[20].mxu1  ;;  %2150 = vmatpush3.bf16.msra.mxu0 %v2256_v45 }
 0x6d7   : > { %v2145_v47 = vpop.f32.mrb[21].mxu1  ;;  %2163 = vmatprep.subr.bf16.mxu0 %v2291_v1 }
 0x6d8   : > { %v1083_v48 = vpop.f32.mrb[22].mxu1 }
 0x6d9   : > { %v2146_v49 = vpop.f32.mrb[23].mxu1  ;;  %2152 = vmatmul.mubr.msk.bf16.vlgmr.msra.gmra.mrb[24].mxu0 %vm408_vm1, %v2394_v6 }
 0x6da   : > { %2167 = vmatprep.mubr.msk.bf16.mxu0 %vm2292_vm0, %v2291_v1  ;;  %2164 = vmatpush3.bf16.msra.mxu0 %v2257_v9 }
 0x6db   : > { %2165 = vmatprep.subr.bf16.mxu0 %v2291_v1 }
 0x6de   : > { %v1210_v51 = vpop.f32.mrb[24].mxu1  ;;  %2166 = vmatpush3.bf16.msra.mxu0 %v2258_v10 }
 0x6df   : > { %v1211_v52 = vadd.f32 %v1950_v50, %v1210_v51  ;;  %v2161_v53 = vpop.f32.mrb[25].mxu1  ;;  %2177 = vmatprep.subr.bf16.mxu0 %v2291_v1 }
 0x6e0   : > { %v1213_v54 = vpop.f32.mrb[26].mxu1  ;;  %v1981_v53 = vld [vmem:[%s2671_s5 + $0x3] ss:$0 sm:$0xff] }
 0x6e1   : > { %v1282_v55 = vpack.c.bf16 %v1211_v52, %v1211_v52  ;;  %v2162_v56 = vpop.f32.mrb[27].mxu1  ;;  %2168 = vmatmul.mubr.msk.bf16.vlgmr.msra.gmra.mrb[28].mxu0 %vm408_vm1, %v2394_v6 }
 0x6e2   : > { %2179 = vmatprep.mubr.msk.bf16.mxu0 %vm2292_vm0, %v2291_v1 }
 0x6e3   : > { %v1287_v57 = vsel %vm580_vm2, %v1282_v55, 0 }
 0x6e4   : > { %2172 = vmatpush3.bf16.xpose.msra.mxu1 %v1287_v57 }
 0x6e5   : > { %2183 = vmatprep.subr.bf16.mxu1 %v2291_v1 }
 0x7a4   : > { %v1034_v58 = vpop.f32.mrb[20].mxu0 }
 0x7a5   : > { %v2544_v59 = vadd.f32 %v1080_v46, %v1034_v58  ;;  %v2139_v60 = vpop.f32.mrb[21].mxu0  ;;  %v1972_v58 = vld [vmem:[%s2670_s4 + $0x3] ss:$0 sm:$0xff] }
 0x7a6   : > { %v1037_v61 = vpop.f32.mrb[22].mxu0 }
 0x7a7   : > { %v2140_v62 = vpop.f32.mrb[23].mxu0 }
 0x7ac   : > { %v1145_v0 = vpop.f32.mrb[24].mxu0 }
 0x7ad   : > { %v1146_v2 = vadd.f32 %v1941_v63, %v1145_v0  ;;  %v2153_v3 = vpop.f32.mrb[25].mxu0  ;;  %v2263_v0 = vld [vmem:[%s2669_s3 + $0x30] sm:$0xff]  }
 0x7ae   : > { %v1148_v4 = vpop.f32.mrb[26].mxu0 }
 0x7af   : > { %v1281_v7 = vpack.c.bf16 %v1146_v2, %v1146_v2  ;;  %v2154_v8 = vpop.f32.mrb[27].mxu0  ;;  %v2264_v2 = vld [vmem:[%s2669_s3 + $0x38] sm:$0xff]  }
 0x7b1   : > { %2174 = vmatmul.mubr.msk.bf16.vlgmr.msra.gmra.mrb[28].mxu1 %vm580_vm2, %v1281_v7 }
 0x7b2   : > { %2185 = vmatprep.mubr.msk.bf16.mxu1 %vm2292_vm0, %v2291_v1  ;;  %2184 = vmatpush3.bf16.msra.mxu1 %v1395_v30 }
 0x7b3   : > { %2197 = vmatprep.subr.bf16.mxu1 %v2291_v1 }
 0x7b4   : > { %v1275_v21 = vpop.f32.mrb[28].mxu0 }
 0x7b5   : > { %v2169_v22 = vpop.f32.mrb[29].mxu0  ;;  %v1276_v26 = vadd.f32 %v1959_v24, %v1275_v21  ;;  %v1996_v21 = vld [vmem:[%s2673_s7 + $0xc] sm:$0xf] }
 0x7b6   : > { %v1278_v23 = vpop.f32.mrb[30].mxu0  ;;  %v1747_v22 = vsel %vm643_vm3, %v1996_v21, 0 }
 0x7b7   : > { %v2170_v25 = vpop.f32.mrb[31].mxu0  ;;  %v1341_v27 = vpack.c.bf16 %v1276_v26, %v1276_v26 }
 0x7b9   : > { %v1346_v28 = vsel %vm643_vm3, %v1341_v27, 0 }
 0x7ba   : > { %2178 = vmatpush3.bf16.msra.mxu0 %v1346_v28 }
 0x7bb   : > { %2189 = vmatprep.subr.bf16.mxu0 %v2291_v1 }
 0x884   : > { %v1323_v11 = vpop.f32.mrb[28].mxu1 }
 0x885   : > { %v2175_v12 = vpop.f32.mrb[29].mxu1  ;;  %v1329_v13 = vsel %vm580_vm2, %v1323_v11, -inf }
 0x886   : > { %1330 = vmax.xlane.f32.xlu0 %v1329_v13  ;;  %v1326_v14 = vpop.f32.mrb[30].mxu1 }
 0x887   : > { %v2176_v15 = vpop.f32.mrb[31].mxu1 }
 0x913   : > { %v1331_v16 = vpop.xlane.xlu0 %1330 }
 0x914   : > { %v1332_v17 = vsub.f32 %v1323_v11, %v1331_v16 }
 0x916   : > { %v1333_v18 = vmul.f32 1.442695, %v1332_v17 }
 0x918   : > { %2273 = vpow2.f32 %v1333_v18 }
 0x922   : > { %v2274_v19 = vpop.eup %2273 }
 0x923   : > { %v1335_v20 = vsel %vm580_vm2, %v2274_v19, 0.0 }
 0x924   : > { %1336 = vadd.xlane.f32.xlu1 %v1335_v20 }
 0x9b1   : > { %v1337_v31 = vpop.xlane.xlu1 %1336 }
 0x9b2   : > { %2275 = vrcp.f32 %v1337_v31 }
 0x9bc   : > { %v2276_v32 = vpop.eup %2275 }
 0x9bd   : > { %v1339_v33 = vmul.f32 %v2276_v32, %v2274_v19 }
 0x9bf   : > { %v1340_v34 = vpack.c.bf16 %v1339_v33, %v1339_v33  ;;  %v1998_v33 = vld [vmem:[%s2674_s8] ss:$0 sm:$0xff] }
 0x9c1   : > { %2180 = vmatmul.mubr.msk.bf16.vlgmr.msra.gmra.mrb[32].mxu0 %vm580_vm2, %v1340_v34 }
 0x9c2   : > { %2193 = vmatprep.mubr.msk.bf16.mxu0 %vm2292_vm0, %v2291_v1  ;;  %2190 = vmatpush3.bf16.msra.mxu0 %v2261_v35 }
 0x9c3   : > { %2191 = vmatprep.subr.bf16.mxu0 %v2291_v1 }
 0x9c6   : > { %2192 = vmatpush3.bf16.msra.mxu0 %v2262_v36 }
 0x9c7   : > { %2205 = vmatprep.subr.bf16.mxu0 %v2291_v1 }
 0x9c9   : > { %2194 = vmatmul.mubr.msk.bf16.vlgmr.msra.gmra.mrb[36].mxu0 %vm408_vm1, %v2394_v6 }
 0x9ca   : > { %2209 = vmatprep.mubr.msk.bf16.mxu0 %vm2292_vm0, %v2291_v1  ;;  %2206 = vmatpush3.bf16.msra.mxu0 %v2263_v0 }
 0x9cb   : > { %2207 = vmatprep.subr.bf16.mxu0 %v2291_v1 }
 0x9ce   : > { %2208 = vmatpush3.bf16.msra.mxu0 %v2264_v2 }
 0x9cf   : > { %2219 = vmatprep.subr.bf16.mxu0 %v2291_v1 }
 0x9d1   : > { %2210 = vmatmul.mubr.msk.bf16.vlgmr.msra.gmra.mrb[40].mxu0 %vm408_vm1, %v2394_v6 }
 0x9d2   : > { %2221 = vmatprep.mubr.msk.bf16.mxu0 %vm2292_vm0, %v2291_v1 }
 0xa94   : > { %v1382_v37 = vpop.f32.mrb[32].mxu0 }
 0xa95   : > { %v1388_v39 = vpack.c.bf16 %v1382_v37, %v1382_v37  ;;  %v2181_v40 = vpop.f32.mrb[33].mxu0 }
 0xa96   : > { %v1385_v41 = vpop.f32.mrb[34].mxu0 }
 0xa97   : > { %v2182_v42 = vpop.f32.mrb[35].mxu0  ;;  %2186 = vmatmul.mubr.msk.bf16.vlgmr.msra.gmra.mrb[32].mxu1 %vm580_vm2, %v1388_v39 }
 0xa98   : > { %2198 = vmatpush3.bf16.msra.mxu1 %v2259_v38  ;;  %2201 = vmatprep.mubr.msk.bf16.mxu1 %vm2292_vm0, %v2291_v1 }
 0xa99   : > { %2199 = vmatprep.subr.bf16.mxu1 %v2291_v1 }
 0xa9c   : > { %2200 = vmatpush3.bf16.msra.mxu1 %v2260_v43  ;;  %v1497_v44 = vpop.f32.mrb[36].mxu0 }
 0xa9d   : > { %2213 = vmatprep.subr.bf16.mxu1 %v2291_v1  ;;  %v2195_v45 = vpop.f32.mrb[37].mxu0  ;;  %v1498_v62 = vadd.f32 %v1972_v58, %v1497_v44 }
 0xa9e   : > { %v1500_v46 = vpop.f32.mrb[38].mxu0 }
 0xa9f   : > { %2202 = vmatmul.mubr.msk.bf16.vlgmr.msra.gmra.mrb[36].mxu1 %vm408_vm1, %v2394_v6  ;;  %v2196_v47 = vpop.f32.mrb[39].mxu0  ;;  %v1633_v63 = vpack.c.bf16 %v1498_v62, %v1498_v62 }
 0xaa0   : > { %2215 = vmatprep.mubr.msk.bf16.mxu1 %vm2292_vm0, %v2291_v1 }
 0xaa4   : > { %v1627_v15 = vpop.f32.mrb[40].mxu0 }
 0xaa5   : > { %v2211_v6 = vpop.f32.mrb[41].mxu0 }
 0xaa6   : > { %v1630_v16 = vpop.f32.mrb[42].mxu0 }
 0xaa7   : > { %v2212_v17 = vpop.f32.mrb[43].mxu0 }
 0xb6a   : > { %v1431_v48 = vpop.f32.mrb[32].mxu1 }
 0xb6b   : > { %v2607_v49 = vadd.f32 %v1431_v48, %v2544_v59  ;;  %v2187_v50 = vpop.f32.mrb[33].mxu1 }
 0xb6c   : > { %v1434_v51 = vpop.f32.mrb[34].mxu1 }
 0xb6d   : > { %v2188_v52 = vpop.f32.mrb[35].mxu1  ;;  %v2000_v51 = vld [vmem:[%s2676_s10] ss:$0 sm:$0xff] }
 0xb72   : > { %v1562_v54 = vpop.f32.mrb[36].mxu1 }
 0xb73   : > { %v1563_v55 = vadd.f32 %v1981_v53, %v1562_v54  ;;  %v2203_v56 = vpop.f32.mrb[37].mxu1 }
 0xb74   : > { %v1565_v57 = vpop.f32.mrb[38].mxu1 }
 0xb75   : > { %v1634_v60 = vpack.c.bf16 %v1563_v55, %v1563_v55  ;;  %v2204_v61 = vpop.f32.mrb[39].mxu1 }
 0xb77   : > { %v1639_v59 = vsel %vm580_vm2, %v1634_v60, 0 }
 0xb78   : > { %2214 = vmatpush3.bf16.xpose.msra.mxu1 %v1639_v59 }
 0xb79   : > { %2225 = vmatprep.subr.bf16.mxu1 %v2291_v1 }
 0xb7f   : > { %2216 = vmatmul.mubr.msk.bf16.vlgmr.msra.gmra.mrb[40].mxu1 %vm580_vm2, %v1633_v63 }
 0xb80   : > { %2227 = vmatprep.mubr.msk.bf16.mxu1 %vm2292_vm0, %v2291_v1  ;;  %v1990_v1 = vld [vmem:[%s2672_s6 + $0x3] ss:$0 sm:$0xff]  ;;  %2226 = vmatpush3.bf16.msra.mxu1 %v1747_v22 }
 0xb81   : > { %v1628_v18 = vadd.f32 %v1990_v1, %v1627_v15 }
 0xb83   : > { %v1693_v19 = vpack.c.bf16 %v1628_v18, %v1628_v18 }
 0xb85   : > { %v1698_v20 = vsel %vm643_vm3, %v1693_v19, 0 }
 0xb86   : > { %2220 = vmatpush3.bf16.msra.mxu0 %v1698_v20 }
 0xc52   : > { %v1675_v3 = vpop.f32.mrb[40].mxu1 }
 0xc53   : > { %v2217_v4 = vpop.f32.mrb[41].mxu1  ;;  %v1681_v7 = vsel %vm580_vm2, %v1675_v3, -inf }
 0xc54   : > { %1682 = vmax.xlane.f32.xlu0 %v1681_v7  ;;  %v1678_v8 = vpop.f32.mrb[42].mxu1 }
 0xc55   : > { %v2218_v9 = vpop.f32.mrb[43].mxu1 }
 0xce1   : > { %v1683_v10 = vpop.xlane.xlu0 %1682 }
 0xce2   : > { %v1684_v11 = vsub.f32 %v1675_v3, %v1683_v10 }
 0xce4   : > { %v1685_v12 = vmul.f32 1.442695, %v1684_v11 }
 0xce6   : > { %2277 = vpow2.f32 %v1685_v12 }
 0xcf0   : > { %v2278_v13 = vpop.eup %2277 }
 0xcf1   : > { %v1687_v14 = vsel %vm580_vm2, %v2278_v13, 0.0 }
 0xcf2   : > { %1688 = vadd.xlane.f32.xlu1 %v1687_v14 }
 0xd7f   : > { %v1689_v23 = vpop.xlane.xlu1 %1688 }
 0xd80   : > { %2279 = vrcp.f32 %v1689_v23 }
 0xd8a   : > { %v2280_v24 = vpop.eup %2279 }
 0xd8b   : > { %v1691_v25 = vmul.f32 %v2280_v24, %v2278_v13 }
 0xd8d   : > { %v1692_v26 = vpack.c.bf16 %v1691_v25, %v1691_v25 }
 0xd8f   : > { %2222 = vmatmul.mubr.msk.bf16.vlgmr.msra.gmra.mrb[44].mxu0 %vm580_vm2, %v1692_v26 }
 0xe62   : > { %v1734_v27 = vpop.f32.mrb[44].mxu0 }
 0xe63   : > { %v1740_v28 = vpack.c.bf16 %v1734_v27, %v1734_v27  ;;  %v2223_v29 = vpop.f32.mrb[45].mxu0 }
 0xe64   : > { %v1737_v30 = vpop.f32.mrb[46].mxu0 }
 0xe65   : > { %v2224_v31 = vpop.f32.mrb[47].mxu0  ;;  %2228 = vmatmul.mubr.msk.bf16.vlgmr.msra.gmra.mrb[44].mxu1 %vm580_vm2, %v1740_v28 }
 0xf38   : > { %v1783_v32 = vpop.f32.mrb[44].mxu1 }
 0xf39   : > { %v1789_v34 = vadd.f32 %v1783_v32, %v2607_v49  ;;  %v2229_v35 = vpop.f32.mrb[45].mxu1 }
 0xf3a   : > { %v1786_v36 = vpop.f32.mrb[46].mxu1 }
 0xf3b   : > { %v1797_v37 = vadd.f32 %v1998_v33, %v1789_v34  ;;  %v2230_v38 = vpop.f32.mrb[47].mxu1 }
 0xf3d   : > { %v1798_v39 = vadd.f32 %v1797_v37, %v2390_v5  ;;  %v1999_v5 = vld [vmem:[%s2675_s9] ss:$0 sm:$0xff] }
 0xf3f   : > { %v1799_v40 = vsel %vm408_vm1, %v1798_v39, 0.0 }
 0xf40   : > { %1800 = vadd.xlane.f32.xlu0 %v1799_v40 }
 0xfcd   : > { %v1801_v41 = vpop.xlane.xlu0 %1800 }
 0xfce   : > { %v1803_v42 = vmul.f32 0.03125, %v1801_v41 }
 0xfd0   : > { %v1804_v43 = vsub.f32 %v1798_v39, %v1803_v42 }
 0xfd2   : > { %v1805_v44 = vmul.f32 %v1804_v43, %v1804_v43 }
 0xfd4   : > { %v1806_v45 = vsel %vm408_vm1, %v1805_v44, 0.0 }
 0xfd5   : > { %1807 = vadd.xlane.f32.xlu1 %v1806_v45 }
0x1062   : > { %v1808_v46 = vpop.xlane.xlu1 %1807 }
0x1063   : > { %v1809_v47 = vmul.f32 0.03125, %v1808_v46 }
0x1065   : > { %v1810_v48 = vadd.f32 1e-05, %v1809_v47 }
0x1067   : > { %2281 = vrsqrt.f32 %v1810_v48 }
0x1071   : > { %v2282_v49 = vpop.eup %2281 }
0x1072   : > { %v1812_v50 = vmul.f32 %v2282_v49, %v1804_v43 }
0x1074   : > { %v1820_v52 = vmul.f32 %v1999_v5, %v1812_v50 }
0x1076   : > { %v1828_v53 = vadd.f32 %v2000_v51, %v1820_v52 }
0x1078   : > { %1829 = vst.msk [vmem:[%s381_s12] sm:$0xff] %vm408_vm1, %v1828_v53 }
0x1079 PF: > { %s21_s17 = sadd.s32 1, %s2289_s17  }
0x107a   : > { %p18_p4 = scmp.ge.s32.totalorder %s21_s17, 4  }
0x107c   :  { %20 = sbr.rel (!%p18_p4) target bundleno = 1 (0x1), region = 115 }

// kernel: modelo_forward.10
= control target key start
LH: loop header
LB: loop body
LE: loop exit
PB: predicated region body
PF: predicated region fallthrough
CT: control target
= control target key end

     0   :  { %vm19_vm0 = vcmask 1041408   ;;  %vm20_vm1 = vcmask 1043458   ;;  %vm22_vm3 = vcmask 357380   ;;  %v647_v53 = vmov 0.0   ;;  %s832_s1 = inlined_call_operand.vmem [shape: bf16[256,300], index: 1, kind: input, shape index: {}]   ;;  %s833_s0 = inlined_call_operand.vmem [shape: f32[2,256], index: 0, kind: input, shape index: {}]   ;;  %s834_s2 = inlined_call_operand.vmem [shape: f32[1,300], index: 2, kind: input, shape index: {}]   ;;  %s835_s3 = inlined_call_operand.vmem [shape: f32[2,300], index: 3, kind: output, shape index: {}]  }
   0x1   :  { %v583_v0 = vld [vmem:[%s832_s1 + $0x4] ss:$12 sps:$4 sm:$0xff]   ;;  %v585_v1 = vld [vmem:[%s832_s1] ss:$12 sps:$4 sm:$0xff]   ;;  %v586_v2 = vld [vmem:[%s832_s1 + $0x1c] ss:$12 sps:$4 sm:$0xff]   ;;  %v448_v61 = vlaneseq }
   0x2   :  { %360 = vmatprep.subr.bf16.mxu0 %v583_v0  ;;  %v588_v3 = vld [vmem:[%s832_s1 + $0x18] ss:$12 sps:$4 sm:$0xff]   ;;  %v589_v4 = vld [vmem:[%s832_s1 + $0x34] ss:$12 sps:$4 sm:$0xff]   ;;  %v591_v5 = vld [vmem:[%s832_s1 + $0x30] ss:$12 sps:$4 sm:$0xff]  }
   0x3   :  { %361 = vmatpush1.bf16.msra.mxu0 %v585_v1  ;;  %v592_v6 = vld [vmem:[%s832_s1 + $0x4c] ss:$12 sps:$4 sm:$0xff]   ;;  %v594_v7 = vld [vmem:[%s832_s1 + $0x48] ss:$12 sps:$4 sm:$0xff]   ;;  %v595_v8 = vld [vmem:[%s832_s1 + $0x64] ss:$12 sps:$4 sm:$0xff]  }
   0x4   :  { %362 = vmatprep.subr.bf16.mxu0 %v586_v2  ;;  %v607_v9 = vld [vmem:[%s832_s1 + $0xc8] ss:$12 sps:$4 sm:$0xff]   ;;  %v597_v11 = vld [vmem:[%s832_s1 + $0x60] ss:$12 sps:$4 sm:$0xff]   ;;  %v600_v15 = vld [vmem:[%s832_s1 + $0x78] ss:$12 sps:$4 sm:$0xff]  }
   0x5   :  { %v608_v10 = vld [vmem:[%s832_s1 + $0x8] ss:$12 sps:$4 sm:$0xff]   ;;  %559 = vmatprep.subr.bf16.mxu1 %v607_v9  ;;  %v612_v12 = vld [vmem:[%s832_s1 + $0xe0] ss:$12 sps:$4 sm:$0xff]   ;;  %v617_v16 = vld [vmem:[%s832_s1 + $0xf8] ss:$12 sps:$4 sm:$0xff]  }
   0x6   :  { %560 = vmatpush3.bf16.msra.mxu1 %v608_v10  ;;  %v613_v13 = vld [vmem:[%s832_s1 + $0x20] ss:$12 sps:$4 sm:$0xff]   ;;  %v598_v14 = vld [vmem:[%s832_s1 + $0x7c] ss:$12 sps:$4 sm:$0xff]   ;;  %v618_v17 = vld [vmem:[%s832_s1 + $0x38] ss:$12 sps:$4 sm:$0xff]  }
   0x7   :  { %363 = vmatpush1.bf16.msra.mxu0 %v588_v3  ;;  %561 = vmatprep.subr.bf16.mxu1 %v612_v12  ;;  %v601_v18 = vld [vmem:[%s832_s1 + $0x94] ss:$12 sps:$4 sm:$0xff]   ;;  %v622_v19 = vld [vmem:[%s832_s1 + $0x110] ss:$12 sps:$4 sm:$0xff]   ;;  %v604_v22 = vld [vmem:[%s832_s1 + $0xac] ss:$12 sps:$4 sm:$0xff]  }
   0x8   :  { %364 = vmatprep.subr.bf16.mxu0 %v589_v4  ;;  %v623_v20 = vld [vmem:[%s832_s1 + $0x50] ss:$12 sps:$4 sm:$0xff]   ;;  %v627_v23 = vld [vmem:[%s832_s1 + $0x128] ss:$12 sps:$4 sm:$0xff]   ;;  %v632_v27 = vld [vmem:[%s832_s1 + $0x140] ss:$12 sps:$4 sm:$0xff]  }
   0x9   :  { %v603_v21 = vld [vmem:[%s832_s1 + $0x90] ss:$12 sps:$4 sm:$0xff]   ;;  %v606_v24 = vld [vmem:[%s832_s1 + $0xa8] ss:$12 sps:$4 sm:$0xff]   ;;  %v611_v28 = vld [vmem:[%s832_s1 + $0xc0] ss:$12 sps:$4 sm:$0xff]  }
   0xa   :  { %562 = vmatpush3.bf16.msra.mxu1 %v613_v13  ;;  %v628_v25 = vld [vmem:[%s832_s1 + $0x68] ss:$12 sps:$4 sm:$0xff]   ;;  %v609_v26 = vld [vmem:[%s832_s1 + $0xc4] ss:$12 sps:$4 sm:$0xff]   ;;  %v633_v29 = vld [vmem:[%s832_s1 + $0x80] ss:$12 sps:$4 sm:$0xff]  }
   0xb   :  { %365 = vmatpush1.bf16.msra.mxu0 %v591_v5  ;;  %563 = vmatprep.subr.bf16.mxu1 %v617_v16  ;;  %v637_v30 = vld [vmem:[%s832_s1 + $0x158] ss:$12 sps:$4 sm:$0xff]   ;;  %v614_v31 = vld [vmem:[%s832_s1 + $0xdc] ss:$12 sps:$4 sm:$0xff]   ;;  %v619_v35 = vld [vmem:[%s832_s1 + $0xf4] ss:$12 sps:$4 sm:$0xff]  }
   0xc   :  { %366 = vmatprep.subr.bf16.mxu0 %v592_v6  ;;  %v616_v32 = vld [vmem:[%s832_s1 + $0xd8] ss:$12 sps:$4 sm:$0xff]   ;;  %v642_v34 = vld [vmem:[%s832_s1 + $0x170] ss:$12 sps:$4 sm:$0xff]   ;;  %v626_v43 = vld [vmem:[%s832_s1 + $0x108] ss:$12 sps:$4 sm:$0xff]  }
   0xd   :  { %v638_v33 = vld [vmem:[%s832_s1 + $0x98] ss:$12 sps:$4 sm:$0xff]   ;;  %v510_v36 = vld.sshfl [vmem:[%s833_s0] sm:$0x33 pattern:$0x76325410]  ;;  %vm21_vm2 = vmor %vm20_vm1, %vm19_vm0 }
   0xe   :  { %564 = vmatpush3.bf16.msra.mxu1 %v618_v17  ;;  %v643_v37 = vld [vmem:[%s832_s1 + $0xb0] ss:$12 sps:$4 sm:$0xff]   ;;  %v35_v38 = vcombine.high %v510_v36, %v510_v36  ;;  %v624_v40 = vld [vmem:[%s832_s1 + $0x10c] ss:$12 sps:$4 sm:$0xff]   ;;  %v38_v42 = vpack.c.bf16 %v510_v36, %v510_v36  ;;  %v639_v48 = vld [vmem:[%s832_s1 + $0x154] ss:$12 sps:$4 sm:$0xff]  }
   0xf   :  { %367 = vmatpush1.bf16.msra.mxu0 %v594_v7  ;;  %565 = vmatprep.subr.bf16.mxu1 %v622_v19  ;;  %v621_v39 = vld [vmem:[%s832_s1 + $0xf0] ss:$12 sps:$4 sm:$0xff]   ;;  %v631_v45 = vld [vmem:[%s832_s1 + $0x120] ss:$12 sps:$4 sm:$0xff]   ;;  %v636_v47 = vld [vmem:[%s832_s1 + $0x138] ss:$12 sps:$4 sm:$0xff]  }
  0x10   :  { %368 = vmatprep.subr.bf16.mxu0 %v595_v8  ;;  %v39_v41 = vpack.c.bf16 %v35_v38, %v35_v38  ;;  %v629_v44 = vld [vmem:[%s832_s1 + $0x124] ss:$12 sps:$4 sm:$0xff]   ;;  %v634_v46 = vld [vmem:[%s832_s1 + $0x13c] ss:$12 sps:$4 sm:$0xff]   ;;  %v644_v50 = vld [vmem:[%s832_s1 + $0x16c] ss:$12 sps:$4 sm:$0xff]  }
  0x11   :  { %v641_v49 = vld [vmem:[%s832_s1 + $0x150] ss:$12 sps:$4 sm:$0xff]   ;;  %v646_v51 = vld [vmem:[%s832_s1 + $0x168] ss:$12 sps:$4 sm:$0xff]   ;;  %vm816_vm4 = vmor %vm22_vm3, %vm21_vm2  ;;  %v648_v59 = vmov 1983009808  }
  0x12   :  { %566 = vmatpush3.bf16.msra.mxu1 %v623_v20  ;;  %433 = vmatprep.mubr.bf16.mxu1 %v39_v41  ;;  %24 = vst.msk [vmem:[#allocation2] sm:$0x3f] %vm816_vm4, %v647_v53  ;;  %v446_v60 = vunpack.c.l.s4 %v648_v59  ;;  %v449_v63 = vshrl.u32 %v448_v61, 7  ;;  %v472_v3 = vld [vmem:[%s834_s2] sm:$0x7] }
  0x13   :  { %369 = vmatpush1.bf16.msra.mxu0 %v597_v11  ;;  %567 = vmatprep.subr.bf16.mxu1 %v627_v23 }
  0x14   :  { %370 = vmatprep.subr.bf16.mxu0 %v598_v14  ;;  %392 = vmatprep.mubr.bf16.mxu0 %v39_v41  ;;  %v447_v62 = vunpack.c.0.s8 %v446_v60  ;;  %v476_v1 = vsub.s32 0, %v449_v63  ;;  %v480_v2 = vsub.s32 1, %v449_v63  ;;  %v484_v5 = vsub.s32 2, %v449_v63 }
  0x16   :  { %568 = vmatpush3.bf16.msra.mxu1 %v628_v25  ;;  %v450_v0 = vsub.s32 %v447_v62, %v449_v63  ;;  %v477_v8 = vrot.slane %v472_v3, %v476_v1  ;;  %v481_v9 = vrot.slane %v472_v3, %v480_v2 }
  0x17   :  { %371 = vmatpush1.bf16.msra.mxu0 %v600_v15  ;;  %569 = vmatprep.subr.bf16.mxu1 %v632_v27  ;;  %v485_v15 = vrot.slane %v472_v3, %v484_v5 }
  0x18   :  { %372 = vmatprep.subr.bf16.mxu0 %v601_v18  ;;  %v486_v16 = vcombine.low %v477_v8, %v481_v9 }
  0x19   :  { %v25_v14 = vld [vmem:[#allocation2] sm:$0x3f]  ;;  %v500_v20 = vrot.slane %v485_v15, %v450_v0 }
  0x1a   :  { %570 = vmatpush3.bf16.msra.mxu1 %v633_v29  ;;  %v493_v19 = vrot.slane %v486_v16, %v450_v0 }
  0x1b   :  { %373 = vmatpush1.bf16.msra.mxu0 %v603_v21  ;;  %571 = vmatprep.subr.bf16.mxu1 %v637_v30 }
  0x1c   :  { %374 = vmatprep.subr.bf16.mxu0 %v604_v22  ;;  %v501_v21 = vcombine.low %v493_v19, %v500_v20 }
  0x1e   :  { %572 = vmatpush3.bf16.msra.mxu1 %v638_v33 }
  0x1f   :  { %375 = vmatpush1.bf16.msra.mxu0 %v606_v24  ;;  %573 = vmatprep.subr.bf16.mxu1 %v642_v34 }
  0x20   :  { %376 = vmatprep.subr.bf16.mxu0 %v609_v26 }
  0x22   :  { %574 = vmatpush3.bf16.msra.mxu1 %v643_v37 }
  0x23   :  { %377 = vmatpush1.bf16.msra.mxu0 %v611_v28 }
  0x24   :  { %378 = vmatprep.subr.bf16.mxu0 %v614_v31 }
  0x25   :  { %434 = vmatmul.mubr.bf16.vlgmr.msra.gmra.mrb[0].mxu1 %v38_v42 }
  0x27   :  { %379 = vmatpush1.bf16.msra.mxu0 %v616_v32 }
  0x28   :  { %380 = vmatprep.subr.bf16.mxu0 %v619_v35 }
  0x2b   :  { %381 = vmatpush1.bf16.msra.mxu0 %v621_v39 }
  0x2c   :  { %382 = vmatprep.subr.bf16.mxu0 %v624_v40 }
  0x2f   :  { %383 = vmatpush1.bf16.msra.mxu0 %v626_v43 }
  0x30   :  { %384 = vmatprep.subr.bf16.mxu0 %v629_v44 }
  0x33   :  { %385 = vmatpush1.bf16.msra.mxu0 %v631_v45 }
  0x34   :  { %386 = vmatprep.subr.bf16.mxu0 %v634_v46 }
  0x37   :  { %387 = vmatpush1.bf16.msra.mxu0 %v636_v47 }
  0x38   :  { %388 = vmatprep.subr.bf16.mxu0 %v639_v48 }
  0x3b   :  { %389 = vmatpush1.bf16.msra.mxu0 %v641_v49 }
  0x3c   :  { %390 = vmatprep.subr.bf16.mxu0 %v644_v50 }
  0x3f   :  { %391 = vmatpush1.bf16.msra.mxu0 %v646_v51 }
  0x42   :  { %393 = vmatmul.mubr.bf16.vlgmr.msra.gmra.mrb[0].mxu0 %v38_v42 }
  0xf8   :  { %v575_v54 = vpop.f32.mrb[0].mxu1 }
  0xf9   :  { %v576_v55 = vpop.f32.mrb[1].mxu1 }
  0xfa   :  { %v577_v56 = vadd.f32 %v576_v55, %v575_v54  ;;  %v578_v57 = vpop.f32.mrb[2].mxu1 }
  0xfb   :  { %v579_v58 = vpop.f32.mrb[3].mxu1 }
  0xfc   :  { %v458_v7 = vrot.slane %v577_v56, %v450_v0 }
 0x115   :  { %v394_v4 = vpop.f32.mrb[0].mxu0 }
 0x116   :  { %v396_v6 = vpop.f32.mrb[1].mxu0 }
 0x117   :  { %v444_v10 = vcombine.low %v394_v4, %v396_v6  ;;  %v398_v11 = vpop.f32.mrb[2].mxu0 }
 0x118   :  { %v399_v12 = vpop.f32.mrb[3].mxu0 }
 0x119   :  { %v451_v13 = vrot.slane %v444_v10, %v450_v0 }
 0x11b   :  { %v459_v17 = vcombine.low %v451_v13, %v458_v7 }
 0x11d   :  { %v461_v18 = vadd.f32 %v459_v17, %v25_v14 }
 0x11f   :  { %467 = vst.msk [vmem:[#allocation2] sm:$0x3f] %vm816_vm4, %v461_v18 }
 0x126   :  { %v471_v22 = vld [vmem:[#allocation2] sm:$0x3f] }
 0x127   :  { %v503_v23 = vadd.f32 %v501_v21, %v471_v22 }
 0x129   :  { %v504_v24 = vmax.f32 %v503_v23, 0.0 }
 0x12b   :  { %505 = vst.msk [vmem:[%s835_s3] sm:$0x3f] %vm816_vm4, %v504_v24 }

// kernel: modelo_forward.7
= control target key start
LH: loop header
LB: loop body
LE: loop exit
PB: predicated region body
PF: predicated region fallthrough
CT: control target
= control target key end

     0   :  { %v2596_v3 = vmov 0   ;;  %vm306_vm0 = vcmask 261120   ;;  %s3264_s1 = inlined_call_operand.vmem [shape: bf16[32,2048], index: 1, kind: input, shape index: {}]   ;;  %s3265_s0 = inlined_call_operand.vmem [shape: f32[16,32], index: 0, kind: input, shape index: {}]   ;;  %s3266_s3 = inlined_call_operand.vmem [shape: bf16[2048,32], index: 3, kind: input, shape index: {}]   ;;  %s3267_s2 = inlined_call_operand.vmem [shape: f32[1,2048], index: 2, kind: input, shape index: {}]   ;;  %s3268_s4 = inlined_call_operand.vmem [shape: f32[1,32], index: 4, kind: input, shape index: {}]   ;;  %s3269_s5 = inlined_call_operand.vmem [shape: f32[1,32], index: 5, kind: input, shape index: {}]   ;;  %s3270_s6 = inlined_call_operand.vmem [shape: f32[1,32], index: 6, kind: input, shape index: {}]   ;;  %s3271_s7 = inlined_call_operand.vmem [shape: f32[16,32], index: 7, kind: output, shape index: {}]  }
   0x1   :  { %v30_v0 = vld [vmem:[%s3264_s1] sm:$0xff]  ;;  %v31_v2 = vld [vmem:[%s3264_s1 + $0x8] sm:$0xff]  ;;  %342 = vmatprep.mubr.bf16.mxu0 %v2596_v3  ;;  %385 = vmatprep.mubr.bf16.mxu1 %v2596_v3  ;;  %v32_v16 = vld [vmem:[%s3264_s1 + $0x10] sm:$0xff] }
   0x2   :  { %v38_v1 = vld [vmem:[%s3264_s1 + $0x40] sm:$0xff]  ;;  %v39_v5 = vld [vmem:[%s3264_s1 + $0x48] sm:$0xff]  ;;  %v40_v17 = vld [vmem:[%s3264_s1 + $0x50] sm:$0xff] }
   0x3   :  { %v2115_v4 = vcombine.high %v30_v0, %v38_v1  ;;  %v2114_v6 = vcombine.low %v30_v0, %v38_v1  ;;  %v46_v7 = vld [vmem:[%s3264_s1 + $0x80] sm:$0xff]  ;;  %v2117_v9 = vcombine.high %v31_v2, %v39_v5  ;;  %v2116_v10 = vcombine.low %v31_v2, %v39_v5  ;;  %v47_v12 = vld [vmem:[%s3264_s1 + $0x88] sm:$0xff]  ;;  %v33_v20 = vld [vmem:[%s3264_s1 + $0x18] sm:$0xff] }
   0x4   :  { %v54_v8 = vld [vmem:[%s3264_s1 + $0xc0] sm:$0xff]  ;;  %v55_v13 = vld [vmem:[%s3264_s1 + $0xc8] sm:$0xff]  ;;  %v41_v21 = vld [vmem:[%s3264_s1 + $0x58] sm:$0xff]  ;;  %v2119_v23 = vcombine.high %v32_v16, %v40_v17  ;;  %v2118_v30 = vcombine.low %v32_v16, %v40_v17 }
   0x5   :  { %v2131_v11 = vcombine.high %v46_v7, %v54_v8  ;;  %310 = vmatprep.subr.bf16.mxu0 %v2115_v4  ;;  %v2133_v14 = vcombine.high %v47_v12, %v55_v13  ;;  %v27_v15 = vld [vmem:[%s3265_s0] sm:$0xff]  ;;  %353 = vmatprep.subr.bf16.mxu1 %v2117_v9  ;;  %v2130_v18 = vcombine.low %v46_v7, %v54_v8  ;;  %v28_v19 = vld [vmem:[%s3265_s0 + $0x8] sm:$0xff]  ;;  %v48_v25 = vld [vmem:[%s3264_s1 + $0x90] sm:$0xff] }
   0x6   :  { %311 = vmatpush1.bf16.msra.mxu0 %v2114_v6  ;;  %354 = vmatpush1.bf16.msra.mxu1 %v2116_v10  ;;  %v2132_v22 = vcombine.low %v47_v12, %v55_v13  ;;  %v2121_v24 = vcombine.high %v33_v20, %v41_v21  ;;  %v56_v26 = vld [vmem:[%s3264_s1 + $0xd0] sm:$0xff]  ;;  %v2687_v27 = vpack.c.bf16 %v28_v19, %v27_v15  ;;  %v49_v28 = vld [vmem:[%s3264_s1 + $0x98] sm:$0xff]  ;;  %v34_v34 = vld [vmem:[%s3264_s1 + $0x20] sm:$0xff] }
   0x7   :  { %312 = vmatprep.subr.bf16.mxu0 %v2131_v11  ;;  %355 = vmatprep.subr.bf16.mxu1 %v2133_v14  ;;  %v57_v29 = vld [vmem:[%s3264_s1 + $0xd8] sm:$0xff]  ;;  %v2120_v31 = vcombine.low %v33_v20, %v41_v21  ;;  %v2135_v32 = vcombine.high %v48_v25, %v56_v26  ;;  %v42_v35 = vld [vmem:[%s3264_s1 + $0x60] sm:$0xff]  ;;  %v35_v36 = vld [vmem:[%s3264_s1 + $0x28] sm:$0xff]  ;;  %v2134_v38 = vcombine.low %v48_v25, %v56_v26 }
   0x8   :  { %v2137_v33 = vcombine.high %v49_v28, %v57_v29  ;;  %v43_v37 = vld [vmem:[%s3264_s1 + $0x68] sm:$0xff]  ;;  %v50_v39 = vld [vmem:[%s3264_s1 + $0xa0] sm:$0xff]  ;;  %v2136_v40 = vcombine.low %v49_v28, %v57_v29  ;;  %v2123_v41 = vcombine.high %v34_v34, %v42_v35  ;;  %v2122_v46 = vcombine.low %v34_v34, %v42_v35  ;;  %v36_v47 = vld [vmem:[%s3264_s1 + $0x30] sm:$0xff] }
   0x9   :  { %v58_v42 = vld [vmem:[%s3264_s1 + $0xe0] sm:$0xff]  ;;  %v2125_v43 = vcombine.high %v35_v36, %v43_v37  ;;  %v51_v44 = vld [vmem:[%s3264_s1 + $0xa8] sm:$0xff]  ;;  %v2124_v48 = vcombine.low %v35_v36, %v43_v37  ;;  %v44_v50 = vld [vmem:[%s3264_s1 + $0x70] sm:$0xff] }
   0xa   :  { %313 = vmatpush1.bf16.msra.mxu0 %v2130_v18  ;;  %356 = vmatpush1.bf16.msra.mxu1 %v2132_v22  ;;  %v59_v45 = vld [vmem:[%s3264_s1 + $0xe8] sm:$0xff]  ;;  %v2139_v49 = vcombine.high %v50_v39, %v58_v42  ;;  %v37_v52 = vld [vmem:[%s3264_s1 + $0x38] sm:$0xff]  ;;  %v2138_v54 = vcombine.low %v50_v39, %v58_v42  ;;  %v52_v55 = vld [vmem:[%s3264_s1 + $0xb0] sm:$0xff]  ;;  %v2127_v57 = vcombine.high %v36_v47, %v44_v50 }
   0xb   :  { %396 = vmatprep.subr.bf16.mxu0 %v2119_v23  ;;  %439 = vmatprep.subr.bf16.mxu1 %v2121_v24  ;;  %v2141_v51 = vcombine.high %v51_v44, %v59_v45  ;;  %v45_v53 = vld [vmem:[%s3264_s1 + $0x78] sm:$0xff]  ;;  %v2140_v56 = vcombine.low %v51_v44, %v59_v45  ;;  %v60_v58 = vld [vmem:[%s3264_s1 + $0xf0] sm:$0xff]  ;;  %v2126_v62 = vcombine.low %v36_v47, %v44_v50  ;;  %v2462_v4 = vld [vmem:[%s3266_s3 + $0x40] sm:$0xff]  }
   0xc   :  { %v2129_v59 = vcombine.high %v37_v52, %v45_v53  ;;  %v53_v60 = vld [vmem:[%s3264_s1 + $0xb8] sm:$0xff]  ;;  %v2128_v63 = vcombine.low %v37_v52, %v45_v53  ;;  %v2143_v0 = vcombine.high %v52_v55, %v60_v58  ;;  %v2142_v2 = vcombine.low %v52_v55, %v60_v58  ;;  %v2463_v6 = vld [vmem:[%s3266_s3 + $0xc0] sm:$0xff]   ;;  %v2466_v9 = vld [vmem:[%s3266_s3 + $0x48] sm:$0xff]  }
   0xd   :  { %2146 = vmatmul.mubr.msk.bf16.vlgmr.msra.gmra.mrb[0].mxu0 %vm306_vm0, %v2687_v27  ;;  %2147 = vmatmul.mubr.msk.bf16.vlgmr.msra.gmra.mrb[0].mxu1 %vm306_vm0, %v2687_v27  ;;  %v61_v61 = vld [vmem:[%s3264_s1 + $0xf8] sm:$0xff]  ;;  %v2464_v7 = vld [vmem:[%s3266_s3] sm:$0xff]   ;;  %v2467_v10 = vld [vmem:[%s3266_s3 + $0xc8] sm:$0xff]  }
   0xe   :  { %397 = vmatpush1.bf16.msra.mxu0 %v2118_v30  ;;  %440 = vmatpush1.bf16.msra.mxu1 %v2120_v31  ;;  %v2145_v1 = vcombine.high %v53_v60, %v61_v61  ;;  %v2144_v5 = vcombine.low %v53_v60, %v61_v61  ;;  %v2465_v8 = vld [vmem:[%s3266_s3 + $0x80] sm:$0xff]   ;;  %v2469_v11 = vld [vmem:[%s3266_s3 + $0x88] sm:$0xff]   ;;  %v2470_v12 = vld [vmem:[%s3266_s3 + $0x50] sm:$0xff]  }
   0xf   :  { %398 = vmatprep.subr.bf16.mxu0 %v2135_v32  ;;  %441 = vmatprep.subr.bf16.mxu1 %v2137_v33  ;;  %v2471_v13 = vld [vmem:[%s3266_s3 + $0xd0] sm:$0xff]   ;;  %v2474_v16 = vld [vmem:[%s3266_s3 + $0x58] sm:$0xff]   ;;  %v2478_v20 = vld [vmem:[%s3266_s3 + $0x60] sm:$0xff]  }
  0x10   :  { %428 = vmatprep.mubr.bf16.mxu0 %v2596_v3  ;;  %471 = vmatprep.mubr.bf16.mxu1 %v2596_v3  ;;  %v2472_v14 = vld [vmem:[%s3266_s3 + $0x10] sm:$0xff]   ;;  %v2475_v17 = vld [vmem:[%s3266_s3 + $0xd8] sm:$0xff]   ;;  %v2479_v21 = vld [vmem:[%s3266_s3 + $0xe0] sm:$0xff]  }
  0x11   :  { %v2473_v15 = vld [vmem:[%s3266_s3 + $0x90] sm:$0xff]   ;;  %v2476_v18 = vld [vmem:[%s3266_s3 + $0x18] sm:$0xff]   ;;  %v2480_v22 = vld [vmem:[%s3266_s3 + $0x20] sm:$0xff]  }
  0x12   :  { %399 = vmatpush1.bf16.msra.mxu0 %v2134_v38  ;;  %442 = vmatpush1.bf16.msra.mxu1 %v2136_v40  ;;  %v2477_v19 = vld [vmem:[%s3266_s3 + $0x98] sm:$0xff]   ;;  %v2481_v23 = vld [vmem:[%s3266_s3 + $0xa0] sm:$0xff]   ;;  %v2482_v24 = vld [vmem:[%s3266_s3 + $0x68] sm:$0xff]   ;;  %v66_v38 = vlaneseq }
  0x13   :  { %482 = vmatprep.subr.bf16.mxu0 %v2123_v41  ;;  %525 = vmatprep.subr.bf16.mxu1 %v2125_v43  ;;  %v2483_v25 = vld [vmem:[%s3266_s3 + $0xe8] sm:$0xff]   ;;  %v2486_v28 = vld [vmem:[%s3266_s3 + $0x70] sm:$0xff]   ;;  %v2490_v32 = vld [vmem:[%s3266_s3 + $0x78] sm:$0xff]  }
  0x14   :  { %v2484_v26 = vld [vmem:[%s3266_s3 + $0x28] sm:$0xff]   ;;  %v2487_v29 = vld [vmem:[%s3266_s3 + $0xf0] sm:$0xff]   ;;  %v2491_v33 = vld [vmem:[%s3266_s3 + $0xf8] sm:$0xff]   ;;  %v2867_v39 = vshrl.u32 %v66_v38, 7 }
  0x15   :  { %2148 = vmatmul.mubr.msk.bf16.vlgmr.msra.gmra.mrb[4].mxu0 %vm306_vm0, %v2687_v27  ;;  %2149 = vmatmul.mubr.msk.bf16.vlgmr.msra.gmra.mrb[4].mxu1 %vm306_vm0, %v2687_v27  ;;  %v2488_v30 = vld [vmem:[%s3266_s3 + $0x30] sm:$0xff]   ;;  %v2492_v34 = vld [vmem:[%s3266_s3 + $0x38] sm:$0xff]   ;;  %v2494_v36 = vld [vmem:[%s3266_s3 + $0x140] sm:$0xff]  }
  0x16   :  { %483 = vmatpush1.bf16.msra.mxu0 %v2122_v46  ;;  %526 = vmatpush1.bf16.msra.mxu1 %v2124_v48  ;;  %v2489_v31 = vld [vmem:[%s3266_s3 + $0xb0] sm:$0xff]   ;;  %v2493_v35 = vld [vmem:[%s3266_s3 + $0xb8] sm:$0xff]   ;;  %v2495_v37 = vld [vmem:[%s3266_s3 + $0x1c0] sm:$0xff]   ;;  %v68_v40 = vsub.s32 0, %v2867_v39  ;;  %v76_v42 = vsub.s32 2, %v2867_v39  ;;  %v72_v43 = vsub.s32 1, %v2867_v39 }
  0x17   :  { %484 = vmatprep.subr.bf16.mxu0 %v2139_v49  ;;  %527 = vmatprep.subr.bf16.mxu1 %v2141_v51  ;;  %v62_v41 = vld [vmem:[%s3267_s2] sm:$0xff]  ;;  %v80_v44 = vsub.s32 3, %v2867_v39  ;;  %v84_v49 = vsub.s32 4, %v2867_v39  ;;  %v88_v51 = vsub.s32 5, %v2867_v39 }
  0x18   :  { %514 = vmatprep.mubr.bf16.mxu0 %v2596_v3  ;;  %557 = vmatprep.mubr.bf16.mxu1 %v2596_v3  ;;  %v69_v45 = vrot.slane %v62_v41, %v68_v40  ;;  %v77_v46 = vrot.slane %v62_v41, %v76_v42  ;;  %v73_v47 = vrot.slane %v62_v41, %v72_v43 }
  0x19   :  { %v81_v48 = vrot.slane %v62_v41, %v80_v44 }
  0x1a   :  { %485 = vmatpush1.bf16.msra.mxu0 %v2138_v54  ;;  %528 = vmatpush1.bf16.msra.mxu1 %v2140_v56 }
  0x1b   :  { %568 = vmatprep.subr.bf16.mxu0 %v2127_v57  ;;  %611 = vmatprep.subr.bf16.mxu1 %v2129_v59  ;;  %v92_v59 = vsub.s32 6, %v2867_v39 }
  0x1d   :  { %2150 = vmatmul.mubr.msk.bf16.vlgmr.msra.gmra.mrb[8].mxu0 %vm306_vm0, %v2687_v27  ;;  %2151 = vmatmul.mubr.msk.bf16.vlgmr.msra.gmra.mrb[8].mxu1 %vm306_vm0, %v2687_v27 }
  0x1e   :  { %569 = vmatpush1.bf16.msra.mxu0 %v2126_v62  ;;  %612 = vmatpush1.bf16.msra.mxu1 %v2128_v63 }
  0x1f   :  { %570 = vmatprep.subr.bf16.mxu0 %v2143_v0  ;;  %613 = vmatprep.subr.bf16.mxu1 %v2145_v1  ;;  %v85_v0 = vrot.slane %v62_v41, %v84_v49  ;;  %v96_v1 = vsub.s32 7, %v2867_v39  ;;  %v2514_v39 = vld [vmem:[%s3266_s3 + $0x168] sm:$0xff]  }
  0x20   :  { %600 = vmatprep.mubr.bf16.mxu0 %v2596_v3  ;;  %643 = vmatprep.mubr.bf16.mxu1 %v2596_v3  ;;  %v2468_v3 = vld [vmem:[%s3266_s3 + $0x8] sm:$0xff]  }
  0x22   :  { %571 = vmatpush1.bf16.msra.mxu0 %v2142_v2  ;;  %614 = vmatpush1.bf16.msra.mxu1 %v2144_v5 }
  0x23   :  { %2285 = vmatprep.subr.bf16.mxu0 %v2462_v4  ;;  %2307 = vmatprep.subr.bf16.mxu1 %v2463_v6 }
  0x25   :  { %2152 = vmatmul.mubr.msk.bf16.vlgmr.msra.gmra.mrb[12].mxu0 %vm306_vm0, %v2687_v27  ;;  %2153 = vmatmul.mubr.msk.bf16.vlgmr.msra.gmra.mrb[12].mxu1 %vm306_vm0, %v2687_v27  ;;  %v2485_v27 = vld [vmem:[%s3266_s3 + $0xa8] sm:$0xff]  }
  0x26   :  { %2286 = vmatpush3.bf16.msra.mxu0 %v2464_v7  ;;  %2308 = vmatpush3.bf16.msra.mxu1 %v2465_v8  ;;  %v89_v7 = vrot.slane %v62_v41, %v88_v51 }
  0x27   :  { %2287 = vmatprep.subr.bf16.mxu0 %v2466_v9  ;;  %2309 = vmatprep.subr.bf16.mxu1 %v2467_v10 }
  0x2a   :  { %2288 = vmatpush3.bf16.msra.mxu0 %v2468_v3  ;;  %2310 = vmatpush3.bf16.msra.mxu1 %v2469_v11 }
  0x2b   :  { %2289 = vmatprep.subr.bf16.mxu0 %v2470_v12  ;;  %2311 = vmatprep.subr.bf16.mxu1 %v2471_v13 }
  0x2e   :  { %2290 = vmatpush3.bf16.msra.mxu0 %v2472_v14  ;;  %2312 = vmatpush3.bf16.msra.mxu1 %v2473_v15  ;;  %v93_v14 = vrot.slane %v62_v41, %v92_v59 }
  0x2f   :  { %2291 = vmatprep.subr.bf16.mxu0 %v2474_v16  ;;  %2313 = vmatprep.subr.bf16.mxu1 %v2475_v17  ;;  %v97_v17 = vrot.slane %v62_v41, %v96_v1  ;;  %v2500_v41 = vld [vmem:[%s3266_s3 + $0x108] sm:$0xff]  }
  0x32   :  { %2292 = vmatpush3.bf16.msra.mxu0 %v2476_v18  ;;  %2314 = vmatpush3.bf16.msra.mxu1 %v2477_v19 }
  0x33   :  { %2293 = vmatprep.subr.bf16.mxu0 %v2478_v20  ;;  %2315 = vmatprep.subr.bf16.mxu1 %v2479_v21  ;;  %v2496_v20 = vld [vmem:[%s3266_s3 + $0x100] sm:$0xff]  }
  0x36   :  { %2294 = vmatpush3.bf16.msra.mxu0 %v2480_v22  ;;  %2316 = vmatpush3.bf16.msra.mxu1 %v2481_v23  ;;  %v2497_v23 = vld [vmem:[%s3266_s3 + $0x180] sm:$0xff]  }
  0x37   :  { %2295 = vmatprep.subr.bf16.mxu0 %v2482_v24  ;;  %2317 = vmatprep.subr.bf16.mxu1 %v2483_v25  ;;  %v2498_v24 = vld [vmem:[%s3266_s3 + $0x148] sm:$0xff]  }
  0x3a   :  { %2296 = vmatpush3.bf16.msra.mxu0 %v2484_v26  ;;  %2318 = vmatpush3.bf16.msra.mxu1 %v2485_v27 }
  0x3b   :  { %2297 = vmatprep.subr.bf16.mxu0 %v2486_v28  ;;  %2319 = vmatprep.subr.bf16.mxu1 %v2487_v29  ;;  %v2499_v28 = vld [vmem:[%s3266_s3 + $0x1c8] sm:$0xff]  }
  0x3e   :  { %2298 = vmatpush3.bf16.msra.mxu0 %v2488_v30  ;;  %2320 = vmatpush3.bf16.msra.mxu1 %v2489_v31 }
  0x3f   :  { %2299 = vmatprep.subr.bf16.mxu0 %v2490_v32  ;;  %2321 = vmatprep.subr.bf16.mxu1 %v2491_v33  ;;  %v2911_v33 = vld [vmem:[%s3267_s2 + $0x8] sm:$0xff] }
  0x42   :  { %2300 = vmatpush3.bf16.msra.mxu0 %v2492_v34  ;;  %2322 = vmatpush3.bf16.msra.mxu1 %v2493_v35 }
  0x43   :  { %2329 = vmatprep.subr.bf16.mxu0 %v2494_v36  ;;  %2351 = vmatprep.subr.bf16.mxu1 %v2495_v37 }
  0xe0   :  { %v344_v50 = vpop.f32.mrb[0].mxu0  ;;  %v387_v53 = vpop.f32.mrb[0].mxu1 }
  0xe1   :  { %v345_v52 = vadd.f32 %v344_v50, %v69_v45  ;;  %v346_v54 = vpop.f32.mrb[1].mxu0  ;;  %v388_v55 = vadd.f32 %v387_v53, %v77_v46  ;;  %v389_v57 = vpop.f32.mrb[1].mxu1  ;;  %v2502_v53 = vld [vmem:[%s3266_s3 + $0x150] sm:$0xff]  }
  0xe2   :  { %v347_v56 = vadd.f32 %v346_v54, %v73_v47  ;;  %v348_v58 = vpop.f32.mrb[2].mxu0  ;;  %v390_v60 = vadd.f32 %v389_v57, %v81_v48  ;;  %v391_v62 = vpop.f32.mrb[2].mxu1  ;;  %v101_v57 = vrot.slane %v2911_v33, %v68_v40  ;;  %v113_v40 = vrot.slane %v2911_v33, %v80_v44 }
  0xe3   :  { %v349_v61 = vadd.f32 %v348_v58, %v69_v45  ;;  %v350_v63 = vpop.f32.mrb[3].mxu0  ;;  %v656_v2 = vmax.f32 %v388_v55, 0.0  ;;  %v392_v4 = vadd.f32 %v391_v62, %v77_v46  ;;  %v393_v6 = vpop.f32.mrb[3].mxu1  ;;  %v654_v8 = vmax.f32 %v345_v52, 0.0  ;;  %v2501_v52 = vld [vmem:[%s3266_s3 + $0x188] sm:$0xff]   ;;  %v2503_v58 = vld [vmem:[%s3266_s3 + $0x1d0] sm:$0xff]  }
  0xe4   :  { %v351_v5 = vadd.f32 %v350_v63, %v73_v47  ;;  %v657_v9 = vmax.f32 %v390_v60, 0.0  ;;  %v394_v3 = vadd.f32 %v393_v6, %v81_v48  ;;  %v655_v11 = vmax.f32 %v347_v56, 0.0 }
  0xe5   :  { %v670_v10 = vmax.f32 %v349_v61, 0.0  ;;  %v672_v12 = vmax.f32 %v392_v4, 0.0  ;;  %v105_v62 = vrot.slane %v2911_v33, %v72_v43  ;;  %v109_v63 = vrot.slane %v2911_v33, %v76_v42  ;;  %v2504_v4 = vld [vmem:[%s3266_s3 + $0x110] sm:$0xff]  }
  0xe6   :  { %v671_v13 = vmax.f32 %v351_v5, 0.0  ;;  %v673_v16 = vmax.f32 %v394_v3, 0.0  ;;  %v2505_v42 = vld [vmem:[%s3266_s3 + $0x190] sm:$0xff]   ;;  %v2507_v3 = vld [vmem:[%s3266_s3 + $0x1d8] sm:$0xff]  }
  0xe7   :  { %v686_v15 = vpack.c.bf16 %v670_v10, %v654_v8  ;;  %v688_v18 = vpack.c.bf16 %v672_v12, %v656_v2 }
  0xe8   :  { %v687_v19 = vpack.c.bf16 %v671_v13, %v655_v11  ;;  %v430_v21 = vpop.f32.mrb[4].mxu0  ;;  %v689_v22 = vpack.c.bf16 %v673_v16, %v657_v9  ;;  %v473_v27 = vpop.f32.mrb[4].mxu1 }
  0xe9   :  { %v431_v25 = vadd.f32 %v430_v21, %v85_v0  ;;  %v432_v26 = vpop.f32.mrb[5].mxu0  ;;  %v474_v31 = vadd.f32 %v473_v27, %v93_v14  ;;  %v475_v32 = vpop.f32.mrb[5].mxu1  ;;  %v2510_v27 = vld [vmem:[%s3266_s3 + $0x160] sm:$0xff]  }
  0xea   :  { %1765 = vmatprep.mubr.bf16.mxu0 %v687_v19  ;;  %v433_v29 = vadd.f32 %v432_v26, %v89_v7  ;;  %v434_v30 = vpop.f32.mrb[6].mxu0  ;;  %1806 = vmatprep.mubr.bf16.mxu1 %v689_v22  ;;  %v476_v37 = vadd.f32 %v475_v32, %v97_v17  ;;  %v477_v38 = vpop.f32.mrb[6].mxu1  ;;  %v2509_v26 = vld [vmem:[%s3266_s3 + $0x198] sm:$0xff]   ;;  %v2511_v32 = vld [vmem:[%s3266_s3 + $0x1e0] sm:$0xff]  }
  0xeb   :  { %1766 = vmatmul.mubr.bf16.vlgmr.msra.gmra.mrb[16].mxu0 %v686_v15  ;;  %v658_v34 = vmax.f32 %v431_v25, 0.0  ;;  %v435_v35 = vadd.f32 %v434_v30, %v85_v0  ;;  %v436_v36 = vpop.f32.mrb[7].mxu0  ;;  %1807 = vmatmul.mubr.bf16.vlgmr.msra.gmra.mrb[16].mxu1 %v688_v18  ;;  %v660_v46 = vmax.f32 %v474_v31, 0.0  ;;  %v478_v48 = vadd.f32 %v477_v38, %v93_v14  ;;  %v479_v50 = vpop.f32.mrb[7].mxu1 }
  0xec   :  { %2330 = vmatpush3.bf16.msra.mxu0 %v2496_v20  ;;  %v659_v45 = vmax.f32 %v433_v29, 0.0  ;;  %v437_v47 = vadd.f32 %v436_v36, %v89_v7  ;;  %2352 = vmatpush3.bf16.msra.mxu1 %v2497_v23  ;;  %v661_v55 = vmax.f32 %v476_v37, 0.0  ;;  %v480_v56 = vadd.f32 %v479_v50, %v97_v17  ;;  %v2506_v7 = vld [vmem:[%s3266_s3 + $0x158] sm:$0xff]  }
  0xed   :  { %2331 = vmatprep.subr.bf16.mxu0 %v2498_v24  ;;  %v674_v54 = vmax.f32 %v435_v35, 0.0  ;;  %2353 = vmatprep.subr.bf16.mxu1 %v2499_v28  ;;  %v676_v61 = vmax.f32 %v478_v48, 0.0  ;;  %v2508_v20 = vld [vmem:[%s3266_s3 + $0x118] sm:$0xff]   ;;  %v117_v31 = vrot.slane %v2911_v33, %v84_v49  ;;  %v121_v36 = vrot.slane %v2911_v33, %v88_v51 }
  0xee   :  { %v675_v60 = vmax.f32 %v437_v47, 0.0  ;;  %v677_v2 = vmax.f32 %v480_v56, 0.0  ;;  %v125_v37 = vrot.slane %v2911_v33, %v92_v59  ;;  %v129_v49 = vrot.slane %v2911_v33, %v96_v1  ;;  %v2513_v59 = vld [vmem:[%s3266_s3 + $0x1a0] sm:$0xff]  }
  0xef   :  { %v2934_v0 = vpack.c.bf16 %v674_v54, %v658_v34  ;;  %v2942_v6 = vpack.c.bf16 %v676_v61, %v660_v46 }
  0xf0   :  { %2332 = vmatpush3.bf16.msra.mxu0 %v2500_v41  ;;  %v691_v5 = vpack.c.bf16 %v675_v60, %v659_v45  ;;  %v516_v43 = vpop.f32.mrb[8].mxu0  ;;  %2354 = vmatpush3.bf16.msra.mxu1 %v2501_v52  ;;  %v693_v44 = vpack.c.bf16 %v677_v2, %v661_v55  ;;  %v559_v10 = vpop.f32.mrb[8].mxu1  ;;  %v2512_v45 = vld [vmem:[%s3266_s3 + $0x120] sm:$0xff]   ;;  %v2515_v52 = vld [vmem:[%s3266_s3 + $0x1e8] sm:$0xff]  }
  0xf1   :  { %2333 = vmatprep.subr.bf16.mxu0 %v2502_v53  ;;  %v517_v8 = vadd.f32 %v516_v43, %v101_v57  ;;  %v518_v9 = vpop.f32.mrb[9].mxu0  ;;  %2355 = vmatprep.subr.bf16.mxu1 %v2503_v58  ;;  %v560_v13 = vadd.f32 %v559_v10, %v109_v63  ;;  %v561_v14 = vpop.f32.mrb[9].mxu1  ;;  %v2519_v10 = vld [vmem:[%s3266_s3 + $0x1f0] sm:$0xff]  }
  0xf2   :  { %1847 = vmatprep.mubr.bf16.mxu0 %v691_v5  ;;  %v519_v11 = vadd.f32 %v518_v9, %v105_v62  ;;  %v520_v12 = vpop.f32.mrb[10].mxu0  ;;  %1888 = vmatprep.mubr.bf16.mxu1 %v693_v44  ;;  %v562_v18 = vadd.f32 %v561_v14, %v113_v40  ;;  %v563_v19 = vpop.f32.mrb[10].mxu1  ;;  %v2520_v14 = vld [vmem:[%s3266_s3 + $0x130] sm:$0xff]  }
  0xf3   :  { %v662_v15 = vmax.f32 %v517_v8, 0.0  ;;  %v521_v16 = vadd.f32 %v520_v12, %v101_v57  ;;  %v522_v17 = vpop.f32.mrb[11].mxu0  ;;  %v664_v22 = vmax.f32 %v560_v13, 0.0  ;;  %v564_v24 = vadd.f32 %v563_v19, %v109_v63  ;;  %v565_v25 = vpop.f32.mrb[11].mxu1  ;;  %v2516_v63 = vld [vmem:[%s3266_s3 + $0x128] sm:$0xff]  }
  0xf4   :  { %2334 = vmatpush3.bf16.msra.mxu0 %v2504_v4  ;;  %v663_v21 = vmax.f32 %v519_v11, 0.0  ;;  %v523_v23 = vadd.f32 %v522_v17, %v105_v62  ;;  %2356 = vmatpush3.bf16.msra.mxu1 %v2505_v42  ;;  %v665_v29 = vmax.f32 %v562_v18, 0.0  ;;  %v566_v30 = vadd.f32 %v565_v25, %v113_v40  ;;  %v2517_v42 = vld [vmem:[%s3266_s3 + $0x1a8] sm:$0xff]   ;;  %v2521_v17 = vld [vmem:[%s3266_s3 + $0x1b0] sm:$0xff]   ;;  %v2522_v18 = vld [vmem:[%s3266_s3 + $0x178] sm:$0xff]  }
  0xf5   :  { %2335 = vmatprep.subr.bf16.mxu0 %v2506_v7  ;;  %v678_v28 = vmax.f32 %v521_v16, 0.0  ;;  %2357 = vmatprep.subr.bf16.mxu1 %v2507_v3  ;;  %v680_v35 = vmax.f32 %v564_v24, 0.0  ;;  %v2518_v7 = vld [vmem:[%s3266_s3 + $0x170] sm:$0xff]   ;;  %v2527_v24 = vld [vmem:[%s3266_s3 + $0x2c0] sm:$0xff]  }
  0xf6   :  { %v679_v34 = vmax.f32 %v523_v23, 0.0  ;;  %v681_v41 = vmax.f32 %v566_v30, 0.0  ;;  %v2526_v23 = vld [vmem:[%s3266_s3 + $0x240] sm:$0xff]   ;;  %v2533_v30 = vld [vmem:[%s3266_s3 + $0x288] sm:$0xff]  }
  0xf7   :  { %v2974_v38 = vpack.c.bf16 %v678_v28, %v662_v15  ;;  %v2984_v47 = vpack.c.bf16 %v680_v35, %v664_v22  ;;  %v2525_v22 = vld [vmem:[%s3266_s3 + $0x1b8] sm:$0xff]   ;;  %v2528_v25 = vld [vmem:[%s3266_s3 + $0x200] sm:$0xff]   ;;  %v2531_v28 = vld [vmem:[%s3266_s3 + $0x2c8] sm:$0xff]  }
  0xf8   :  { %2336 = vmatpush3.bf16.msra.mxu0 %v2508_v20  ;;  %v2982_v46 = vpack.c.bf16 %v679_v34, %v663_v21  ;;  %v602_v51 = vpop.f32.mrb[12].mxu0  ;;  %2358 = vmatpush3.bf16.msra.mxu1 %v2509_v26  ;;  %v2992_v1 = vpack.c.bf16 %v681_v41, %v665_v29  ;;  %v645_v50 = vpop.f32.mrb[12].mxu1  ;;  %v2523_v20 = vld [vmem:[%s3266_s3 + $0x1f8] sm:$0xff]   ;;  %v2529_v26 = vld [vmem:[%s3266_s3 + $0x280] sm:$0xff]   ;;  %v2532_v29 = vld [vmem:[%s3266_s3 + $0x208] sm:$0xff]  }
  0xf9   :  { %2337 = vmatprep.subr.bf16.mxu0 %v2510_v27  ;;  %v603_v33 = vadd.f32 %v602_v51, %v117_v31  ;;  %v604_v48 = vpop.f32.mrb[13].mxu0  ;;  %2359 = vmatprep.subr.bf16.mxu1 %v2511_v32  ;;  %v646_v55 = vadd.f32 %v645_v50, %v125_v37  ;;  %v647_v56 = vpop.f32.mrb[13].mxu1  ;;  %v2524_v21 = vld [vmem:[%s3266_s3 + $0x138] sm:$0xff]   ;;  %v2530_v27 = vld [vmem:[%s3266_s3 + $0x248] sm:$0xff]   ;;  %v2537_v32 = vld [vmem:[%s3266_s3 + $0x290] sm:$0xff]  }
  0xfa   :  { %v605_v53 = vadd.f32 %v604_v48, %v121_v36  ;;  %v606_v54 = vpop.f32.mrb[14].mxu0  ;;  %v648_v61 = vadd.f32 %v647_v56, %v129_v49  ;;  %v649_v62 = vpop.f32.mrb[14].mxu1  ;;  %v2538_v34 = vld [vmem:[%s3266_s3 + $0x258] sm:$0xff]   ;;  %v2542_v41 = vld [vmem:[%s3266_s3 + $0x260] sm:$0xff]   ;;  %v2546_v51 = vld [vmem:[%s3266_s3 + $0x268] sm:$0xff]  }
  0xfb   :  { %v666_v57 = vmax.f32 %v603_v33, 0.0  ;;  %v607_v58 = vadd.f32 %v606_v54, %v117_v31  ;;  %v608_v60 = vpop.f32.mrb[15].mxu0  ;;  %v668_v40 = vmax.f32 %v646_v55, 0.0  ;;  %v650_v5 = vadd.f32 %v649_v62, %v125_v37  ;;  %v651_v43 = vpop.f32.mrb[15].mxu1  ;;  %v2534_v31 = vld [vmem:[%s3266_s3 + $0x250] sm:$0xff]   ;;  %v2539_v35 = vld [vmem:[%s3266_s3 + $0x2d8] sm:$0xff]  }
  0xfc   :  { %2338 = vmatpush3.bf16.msra.mxu0 %v2512_v45  ;;  %v667_v2 = vmax.f32 %v605_v53, 0.0  ;;  %v609_v4 = vadd.f32 %v608_v60, %v121_v36  ;;  %2360 = vmatpush3.bf16.msra.mxu1 %v2513_v59  ;;  %v669_v8 = vmax.f32 %v648_v61, 0.0  ;;  %v652_v9 = vadd.f32 %v651_v43, %v129_v49  ;;  %v2540_v36 = vld [vmem:[%s3266_s3 + $0x218] sm:$0xff]   ;;  %v2543_v49 = vld [vmem:[%s3266_s3 + $0x2e0] sm:$0xff]   ;;  %v2547_v59 = vld [vmem:[%s3266_s3 + $0x2e8] sm:$0xff]  }
  0xfd   :  { %2339 = vmatprep.subr.bf16.mxu0 %v2514_v39  ;;  %v682_v44 = vmax.f32 %v607_v58, 0.0  ;;  %2361 = vmatprep.subr.bf16.mxu1 %v2515_v52  ;;  %v684_v11 = vmax.f32 %v650_v5, 0.0  ;;  %v2541_v37 = vld [vmem:[%s3266_s3 + $0x298] sm:$0xff]   ;;  %v2544_v45 = vld [vmem:[%s3266_s3 + $0x220] sm:$0xff]   ;;  %v2548_v39 = vld [vmem:[%s3266_s3 + $0x228] sm:$0xff]  }
  0xfe   :  { %v683_v3 = vmax.f32 %v609_v4, 0.0  ;;  %v685_v13 = vmax.f32 %v652_v9, 0.0  ;;  %v2550_v33 = vld [vmem:[%s3266_s3 + $0x270] sm:$0xff]   ;;  %v2554_v53 = vld [vmem:[%s3266_s3 + $0x278] sm:$0xff]   ;;  %v2559_v58 = vld [vmem:[%s3266_s3 + $0x3c0] sm:$0xff]  }
  0xff   :  { %v3009_v12 = vpack.c.bf16 %v682_v44, %v666_v57  ;;  %v3016_v16 = vpack.c.bf16 %v684_v11, %v668_v40  ;;  %v2551_v48 = vld [vmem:[%s3266_s3 + $0x2f0] sm:$0xff]   ;;  %v2555_v54 = vld [vmem:[%s3266_s3 + $0x2f8] sm:$0xff]   ;;  %v2558_v57 = vld [vmem:[%s3266_s3 + $0x340] sm:$0xff]  }
 0x100   :  { %2340 = vmatpush3.bf16.msra.mxu0 %v2516_v63  ;;  %v3014_v15 = vpack.c.bf16 %v683_v3, %v667_v2  ;;  %2362 = vmatpush3.bf16.msra.mxu1 %v2517_v42  ;;  %v3024_v19 = vpack.c.bf16 %v685_v13, %v669_v8  ;;  %v2552_v50 = vld [vmem:[%s3266_s3 + $0x230] sm:$0xff]   ;;  %v2556_v55 = vld [vmem:[%s3266_s3 + $0x238] sm:$0xff]   ;;  %v2560_v60 = vld [vmem:[%s3266_s3 + $0x300] sm:$0xff]  }
 0x101   :  { %2341 = vmatprep.subr.bf16.mxu0 %v2518_v7  ;;  %2363 = vmatprep.subr.bf16.mxu1 %v2519_v10  ;;  %v2553_v52 = vld [vmem:[%s3266_s3 + $0x2b0] sm:$0xff]   ;;  %v2557_v56 = vld [vmem:[%s3266_s3 + $0x2b8] sm:$0xff]   ;;  %v2561_v61 = vld [vmem:[%s3266_s3 + $0x380] sm:$0xff]  }
 0x102   :  { %v2562_v62 = vld [vmem:[%s3266_s3 + $0x348] sm:$0xff]   ;;  %v2566_v4 = vld [vmem:[%s3266_s3 + $0x350] sm:$0xff]   ;;  %v2570_v43 = vld [vmem:[%s3266_s3 + $0x358] sm:$0xff]  }
 0x103   :  { %v2563_v63 = vld [vmem:[%s3266_s3 + $0x3c8] sm:$0xff]   ;;  %v2569_v5 = vld [vmem:[%s3266_s3 + $0x390] sm:$0xff]   ;;  %v2571_v42 = vld [vmem:[%s3266_s3 + $0x3d8] sm:$0xff]  }
 0x104   :  { %2342 = vmatpush3.bf16.msra.mxu0 %v2520_v14  ;;  %2364 = vmatpush3.bf16.msra.mxu1 %v2521_v17  ;;  %v2564_v2 = vld [vmem:[%s3266_s3 + $0x308] sm:$0xff]   ;;  %v2572_v7 = vld [vmem:[%s3266_s3 + $0x318] sm:$0xff]   ;;  %v2574_v8 = vld [vmem:[%s3266_s3 + $0x360] sm:$0xff]  }
 0x105   :  { %2343 = vmatprep.subr.bf16.mxu0 %v2522_v18  ;;  %2365 = vmatprep.subr.bf16.mxu1 %v2523_v20  ;;  %v2565_v40 = vld [vmem:[%s3266_s3 + $0x388] sm:$0xff]   ;;  %v2573_v44 = vld [vmem:[%s3266_s3 + $0x398] sm:$0xff]   ;;  %v2575_v9 = vld [vmem:[%s3266_s3 + $0x3e0] sm:$0xff]  }
 0x106   :  { %v2576_v10 = vld [vmem:[%s3266_s3 + $0x320] sm:$0xff]   ;;  %v2578_v11 = vld [vmem:[%s3266_s3 + $0x368] sm:$0xff]   ;;  %v2582_v17 = vld [vmem:[%s3266_s3 + $0x370] sm:$0xff]  }
 0x107   :  { %v2577_v3 = vld [vmem:[%s3266_s3 + $0x3a0] sm:$0xff]   ;;  %v2579_v13 = vld [vmem:[%s3266_s3 + $0x3e8] sm:$0xff]   ;;  %v2583_v18 = vld [vmem:[%s3266_s3 + $0x3f0] sm:$0xff]  }
 0x108   :  { %2344 = vmatpush3.bf16.msra.mxu0 %v2524_v21  ;;  %2366 = vmatpush3.bf16.msra.mxu1 %v2525_v22  ;;  %v2580_v14 = vld [vmem:[%s3266_s3 + $0x328] sm:$0xff]   ;;  %v2585_v20 = vld [vmem:[%s3266_s3 + $0x3b0] sm:$0xff]   ;;  %v2586_v21 = vld [vmem:[%s3266_s3 + $0x378] sm:$0xff]  }
 0x109   :  { %2373 = vmatprep.subr.bf16.mxu0 %v2526_v23  ;;  %2395 = vmatprep.subr.bf16.mxu1 %v2527_v24  ;;  %v2587_v22 = vld [vmem:[%s3266_s3 + $0x3f8] sm:$0xff]  }
 0x10a   :  { %v2588_v23 = vld [vmem:[%s3266_s3 + $0x338] sm:$0xff]  }
 0x10b   :  { %1848 = vmatmul.mubr.bf16.vlgmr.msra.gmra.mrb[20].mxu0 %v2934_v0  ;;  %1889 = vmatmul.mubr.bf16.vlgmr.msra.gmra.mrb[20].mxu1 %v2942_v6  ;;  %v2535_v0 = vld [vmem:[%s3266_s3 + $0x2d0] sm:$0xff]   ;;  %v2589_v24 = vld [vmem:[%s3266_s3 + $0x3b8] sm:$0xff]  }
 0x10c   :  { %2374 = vmatpush3.bf16.msra.mxu0 %v2528_v25  ;;  %2396 = vmatpush3.bf16.msra.mxu1 %v2529_v26  ;;  %v2536_v6 = vld [vmem:[%s3266_s3 + $0x210] sm:$0xff]  }
 0x10d   :  { %2375 = vmatprep.subr.bf16.mxu0 %v2530_v27  ;;  %2397 = vmatprep.subr.bf16.mxu1 %v2531_v28  ;;  %v2154_v27 = vld [vmem:[%s3268_s4] ss:$0 sm:$0xff] }
 0x10e   :  { %1929 = vmatprep.mubr.bf16.mxu0 %v2982_v46  ;;  %1970 = vmatprep.mubr.bf16.mxu1 %v2992_v1  ;;  %v2545_v46 = vld [vmem:[%s3266_s3 + $0x2a0] sm:$0xff]   ;;  %v2549_v1 = vld [vmem:[%s3266_s3 + $0x2a8] sm:$0xff]  }
 0x110   :  { %2376 = vmatpush3.bf16.msra.mxu0 %v2532_v29  ;;  %2398 = vmatpush3.bf16.msra.mxu1 %v2533_v30 }
 0x111   :  { %2377 = vmatprep.subr.bf16.mxu0 %v2534_v31  ;;  %2399 = vmatprep.subr.bf16.mxu1 %v2535_v0 }
 0x114   :  { %2378 = vmatpush3.bf16.msra.mxu0 %v2536_v6  ;;  %2400 = vmatpush3.bf16.msra.mxu1 %v2537_v32 }
 0x115   :  { %2379 = vmatprep.subr.bf16.mxu0 %v2538_v34  ;;  %2401 = vmatprep.subr.bf16.mxu1 %v2539_v35 }
 0x118   :  { %2380 = vmatpush3.bf16.msra.mxu0 %v2540_v36  ;;  %2402 = vmatpush3.bf16.msra.mxu1 %v2541_v37 }
 0x119   :  { %2381 = vmatprep.subr.bf16.mxu0 %v2542_v41  ;;  %2403 = vmatprep.subr.bf16.mxu1 %v2543_v49 }
 0x11c   :  { %2382 = vmatpush3.bf16.msra.mxu0 %v2544_v45  ;;  %2404 = vmatpush3.bf16.msra.mxu1 %v2545_v46 }
 0x11d   :  { %2383 = vmatprep.subr.bf16.mxu0 %v2546_v51  ;;  %2405 = vmatprep.subr.bf16.mxu1 %v2547_v59 }
 0x120   :  { %2384 = vmatpush3.bf16.msra.mxu0 %v2548_v39  ;;  %2406 = vmatpush3.bf16.msra.mxu1 %v2549_v1 }
 0x121   :  { %2385 = vmatprep.subr.bf16.mxu0 %v2550_v33  ;;  %2407 = vmatprep.subr.bf16.mxu1 %v2551_v48 }
 0x124   :  { %2386 = vmatpush3.bf16.msra.mxu0 %v2552_v50  ;;  %2408 = vmatpush3.bf16.msra.mxu1 %v2553_v52 }
 0x125   :  { %2387 = vmatprep.subr.bf16.mxu0 %v2554_v53  ;;  %2409 = vmatprep.subr.bf16.mxu1 %v2555_v54 }
 0x128   :  { %2388 = vmatpush3.bf16.msra.mxu0 %v2556_v55  ;;  %2410 = vmatpush3.bf16.msra.mxu1 %v2557_v56 }
 0x129   :  { %2417 = vmatprep.subr.bf16.mxu0 %v2558_v57  ;;  %2439 = vmatprep.subr.bf16.mxu1 %v2559_v58 }
 0x12b   :  { %1930 = vmatmul.mubr.bf16.vlgmr.msra.gmra.mrb[24].mxu0 %v2974_v38  ;;  %1971 = vmatmul.mubr.bf16.vlgmr.msra.gmra.mrb[24].mxu1 %v2984_v47  ;;  %v2567_v38 = vld [vmem:[%s3266_s3 + $0x3d0] sm:$0xff]  }
 0x12c   :  { %2418 = vmatpush3.bf16.msra.mxu0 %v2560_v60  ;;  %2440 = vmatpush3.bf16.msra.mxu1 %v2561_v61  ;;  %v2568_v47 = vld [vmem:[%s3266_s3 + $0x310] sm:$0xff]  }
 0x12d   :  { %2419 = vmatprep.subr.bf16.mxu0 %v2562_v62  ;;  %2441 = vmatprep.subr.bf16.mxu1 %v2563_v63 }
 0x12e   :  { %2011 = vmatprep.mubr.bf16.mxu0 %v3014_v15  ;;  %2052 = vmatprep.mubr.bf16.mxu1 %v3024_v19  ;;  %v2581_v15 = vld [vmem:[%s3266_s3 + $0x3a8] sm:$0xff]   ;;  %v2584_v19 = vld [vmem:[%s3266_s3 + $0x330] sm:$0xff]  }
 0x130   :  { %2420 = vmatpush3.bf16.msra.mxu0 %v2564_v2  ;;  %2442 = vmatpush3.bf16.msra.mxu1 %v2565_v40 }
 0x131   :  { %2421 = vmatprep.subr.bf16.mxu0 %v2566_v4  ;;  %2443 = vmatprep.subr.bf16.mxu1 %v2567_v38 }
 0x134   :  { %2422 = vmatpush3.bf16.msra.mxu0 %v2568_v47  ;;  %2444 = vmatpush3.bf16.msra.mxu1 %v2569_v5 }
 0x135   :  { %2423 = vmatprep.subr.bf16.mxu0 %v2570_v43  ;;  %2445 = vmatprep.subr.bf16.mxu1 %v2571_v42 }
 0x138   :  { %2424 = vmatpush3.bf16.msra.mxu0 %v2572_v7  ;;  %2446 = vmatpush3.bf16.msra.mxu1 %v2573_v44 }
 0x139   :  { %2425 = vmatprep.subr.bf16.mxu0 %v2574_v8  ;;  %2447 = vmatprep.subr.bf16.mxu1 %v2575_v9 }
 0x13c   :  { %2426 = vmatpush3.bf16.msra.mxu0 %v2576_v10  ;;  %2448 = vmatpush3.bf16.msra.mxu1 %v2577_v3 }
 0x13d   :  { %2427 = vmatprep.subr.bf16.mxu0 %v2578_v11  ;;  %2449 = vmatprep.subr.bf16.mxu1 %v2579_v13 }
 0x140   :  { %2428 = vmatpush3.bf16.msra.mxu0 %v2580_v14  ;;  %2450 = vmatpush3.bf16.msra.mxu1 %v2581_v15 }
 0x141   :  { %2429 = vmatprep.subr.bf16.mxu0 %v2582_v17  ;;  %2451 = vmatprep.subr.bf16.mxu1 %v2583_v18 }
 0x144   :  { %2430 = vmatpush3.bf16.msra.mxu0 %v2584_v19  ;;  %2452 = vmatpush3.bf16.msra.mxu1 %v2585_v20 }
 0x145   :  { %2431 = vmatprep.subr.bf16.mxu0 %v2586_v21  ;;  %2453 = vmatprep.subr.bf16.mxu1 %v2587_v22 }
 0x148   :  { %2432 = vmatpush3.bf16.msra.mxu0 %v2588_v23  ;;  %2454 = vmatpush3.bf16.msra.mxu1 %v2589_v24 }
 0x14b   :  { %2012 = vmatmul.mubr.bf16.vlgmr.msra.gmra.mrb[28].mxu0 %v3009_v12  ;;  %2053 = vmatmul.mubr.bf16.vlgmr.msra.gmra.mrb[28].mxu1 %v3016_v16 }
 0x1be   :  { %v2301_v25 = vpop.f32.mrb[16].mxu0  ;;  %v2323_v26 = vpop.f32.mrb[16].mxu1 }
 0x1bf   :  { %v2302_v28 = vpop.f32.mrb[17].mxu0  ;;  %v2324_v30 = vpop.f32.mrb[17].mxu1 }
 0x1c0   :  { %v2303_v29 = vadd.f32 %v2302_v28, %v2301_v25  ;;  %v2304_v31 = vpop.f32.mrb[18].mxu0  ;;  %v2325_v0 = vadd.f32 %v2324_v30, %v2323_v26  ;;  %v2326_v6 = vpop.f32.mrb[18].mxu1  ;;  %v2594_v26 = vld [vmem:[%s3265_s0] sm:$0xff] }
 0x1c1   :  { %v2305_v32 = vpop.f32.mrb[19].mxu0  ;;  %v2327_v36 = vpop.f32.mrb[19].mxu1 }
 0x1c2   :  { %v1768_v34 = vadd.f32 %v2303_v29, %v2154_v27  ;;  %v2306_v35 = vadd.f32 %v2305_v32, %v2304_v31  ;;  %v2328_v37 = vadd.f32 %v2327_v36, %v2326_v6  ;;  %v2595_v29 = vld [vmem:[%s3265_s0 + $0x8] sm:$0xff] }
 0x1c4   :  { %v1809_v12 = vadd.f32 %v2325_v0, %v1768_v34  ;;  %v1771_v41 = vadd.f32 %v2306_v35, %v2154_v27 }
 0x1c6   :  { %v1812_v16 = vadd.f32 %v2328_v37, %v1771_v41 }
 0x1de   :  { %v2345_v49 = vpop.f32.mrb[20].mxu0  ;;  %v2367_v45 = vpop.f32.mrb[20].mxu1 }
 0x1df   :  { %v2346_v46 = vpop.f32.mrb[21].mxu0  ;;  %v2368_v59 = vpop.f32.mrb[21].mxu1 }
 0x1e0   :  { %v2347_v51 = vadd.f32 %v2346_v46, %v2345_v49  ;;  %v2348_v39 = vpop.f32.mrb[22].mxu0  ;;  %v2369_v1 = vadd.f32 %v2368_v59, %v2367_v45  ;;  %v2370_v33 = vpop.f32.mrb[22].mxu1 }
 0x1e1   :  { %v2349_v48 = vpop.f32.mrb[23].mxu0  ;;  %v2371_v53 = vpop.f32.mrb[23].mxu1 }
 0x1e2   :  { %v1850_v50 = vadd.f32 %v2347_v51, %v1809_v12  ;;  %v2350_v52 = vadd.f32 %v2349_v48, %v2348_v39  ;;  %v2372_v54 = vadd.f32 %v2371_v53, %v2370_v33  ;;  %v2283_v33 = vld [vmem:[%s3269_s5] ss:$0 sm:$0xff] }
 0x1e4   :  { %v1891_v55 = vadd.f32 %v2369_v1, %v1850_v50  ;;  %v1853_v56 = vadd.f32 %v2350_v52, %v1812_v16  ;;  %v2284_v50 = vld [vmem:[%s3270_s6] ss:$0 sm:$0xff] }
 0x1e6   :  { %v1894_v57 = vadd.f32 %v2372_v54, %v1853_v56 }
 0x1fe   :  { %v2389_v58 = vpop.f32.mrb[24].mxu0  ;;  %v2411_v60 = vpop.f32.mrb[24].mxu1 }
 0x1ff   :  { %v2390_v61 = vpop.f32.mrb[25].mxu0  ;;  %v2412_v63 = vpop.f32.mrb[25].mxu1 }
 0x200   :  { %v2391_v62 = vadd.f32 %v2390_v61, %v2389_v58  ;;  %v2392_v2 = vpop.f32.mrb[26].mxu0  ;;  %v2413_v40 = vadd.f32 %v2412_v63, %v2411_v60  ;;  %v2414_v4 = vpop.f32.mrb[26].mxu1 }
 0x201   :  { %v2393_v38 = vpop.f32.mrb[27].mxu0  ;;  %v2415_v43 = vpop.f32.mrb[27].mxu1 }
 0x202   :  { %v1932_v47 = vadd.f32 %v2391_v62, %v1891_v55  ;;  %v2394_v5 = vadd.f32 %v2393_v38, %v2392_v2  ;;  %v2416_v42 = vadd.f32 %v2415_v43, %v2414_v4 }
 0x204   :  { %v1973_v7 = vadd.f32 %v2413_v40, %v1932_v47  ;;  %v1935_v44 = vadd.f32 %v2394_v5, %v1894_v57 }
 0x206   :  { %v1976_v8 = vadd.f32 %v2416_v42, %v1935_v44 }
 0x21e   :  { %v2433_v9 = vpop.f32.mrb[28].mxu0  ;;  %v2455_v10 = vpop.f32.mrb[28].mxu1 }
 0x21f   :  { %v2434_v3 = vpop.f32.mrb[29].mxu0  ;;  %v2456_v13 = vpop.f32.mrb[29].mxu1 }
 0x220   :  { %v2435_v11 = vadd.f32 %v2434_v3, %v2433_v9  ;;  %v2436_v14 = vpop.f32.mrb[30].mxu0  ;;  %v2457_v15 = vadd.f32 %v2456_v13, %v2455_v10  ;;  %v2458_v17 = vpop.f32.mrb[30].mxu1 }
 0x221   :  { %v2437_v18 = vpop.f32.mrb[31].mxu0  ;;  %v2459_v21 = vpop.f32.mrb[31].mxu1 }
 0x222   :  { %v2014_v19 = vadd.f32 %v2435_v11, %v1973_v7  ;;  %v2438_v20 = vadd.f32 %v2437_v18, %v2436_v14  ;;  %v2460_v22 = vadd.f32 %v2459_v21, %v2458_v17 }
 0x224   :  { %v2055_v23 = vadd.f32 %v2457_v15, %v2014_v19  ;;  %v2017_v24 = vadd.f32 %v2438_v20, %v1976_v8 }
 0x226   :  { %v2058_v25 = vadd.f32 %v2460_v22, %v2017_v24  ;;  %v2061_v27 = vadd.f32 %v2594_v26, %v2055_v23 }
 0x228   :  { %v2063_v28 = vsel %vm306_vm0, %v2061_v27, 0.0  ;;  %v2062_v30 = vadd.f32 %v2595_v29, %v2058_v25 }
 0x229   :  { %2064 = vadd.xlane.f32.xlu0 %v2063_v28 }
 0x22a   :  { %v2066_v31 = vsel %vm306_vm0, %v2062_v30, 0.0 }
 0x22d   :  { %2067 = vadd.xlane.f32.xlu0 %v2066_v31 }
 0x2b6   :  { %v2065_v0 = vpop.xlane.xlu0 %2064 }
 0x2b7   :  { %v2070_v6 = vmul.f32 0.03125, %v2065_v0 }
 0x2b9   :  { %v2072_v32 = vsub.f32 %v2061_v27, %v2070_v6 }
 0x2ba   :  { %v2068_v34 = vpop.xlane.xlu0 %2067 }
 0x2bb   :  { %v2071_v35 = vmul.f32 0.03125, %v2068_v34  ;;  %v2074_v36 = vmul.f32 %v2072_v32, %v2072_v32 }
 0x2bd   :  { %v2073_v37 = vsub.f32 %v2062_v30, %v2071_v35  ;;  %v2076_v12 = vsel %vm306_vm0, %v2074_v36, 0.0 }
 0x2be   :  { %2077 = vadd.xlane.f32.xlu1 %v2076_v12 }
 0x2bf   :  { %v2075_v41 = vmul.f32 %v2073_v37, %v2073_v37 }
 0x2c1   :  { %v2079_v16 = vsel %vm306_vm0, %v2075_v41, 0.0 }
 0x2c2   :  { %2080 = vadd.xlane.f32.xlu1 %v2079_v16 }
 0x34b   :  { %v2078_v49 = vpop.xlane.xlu1 %2077 }
 0x34c   :  { %v2082_v45 = vmul.f32 0.03125, %v2078_v49 }
 0x34e   :  { %v2084_v46 = vadd.f32 1e-05, %v2082_v45 }
 0x34f   :  { %v2081_v51 = vpop.xlane.xlu1 %2080 }
 0x350   :  { %2590 = vrsqrt.f32 %v2084_v46  ;;  %v2083_v59 = vmul.f32 0.03125, %v2081_v51 }
 0x352   :  { %v2085_v39 = vadd.f32 1e-05, %v2083_v59 }
 0x354   :  { %2592 = vrsqrt.f32 %v2085_v39 }
 0x35a   :  { %v2591_v1 = vpop.eup %2590 }
 0x35b   :  { %v2088_v48 = vmul.f32 %v2591_v1, %v2072_v32 }
 0x35d   :  { %v2097_v52 = vmul.f32 %v2283_v33, %v2088_v48 }
 0x35e   :  { %v2593_v53 = vpop.eup %2592 }
 0x35f   :  { %v2106_v54 = vadd.f32 %v2284_v50, %v2097_v52  ;;  %v2089_v55 = vmul.f32 %v2593_v53, %v2073_v37 }
 0x361   :  { %2108 = vst.msk [vmem:[%s3271_s7] sm:$0xff] %vm306_vm0, %v2106_v54  ;;  %v2098_v56 = vmul.f32 %v2283_v33, %v2089_v55 }
 0x363   :  { %v2107_v57 = vadd.f32 %v2284_v50, %v2098_v56 }
 0x365   :  { %2109 = vst.msk [vmem:[%s3271_s7 + $0x8] sm:$0xff] %vm306_vm0, %v2107_v57 }

// kernel: modelo_forward.11
= control target key start
LH: loop header
LB: loop body
LE: loop exit
PB: predicated region body
PF: predicated region fallthrough
CT: control target
= control target key end

     0   :  { %v421_v2 = vmov 0.0   ;;  %vm422_vm0 = vmmov 0   ;;  %v29_v14 = vlaneseq  ;;  %vm202_vm1 = vcmask 1045504   ;;  %s528_s0 = inlined_call_operand.vmem [shape: f32[2,300], index: 0, kind: input, shape index: {}]   ;;  %s529_s1 = inlined_call_operand.vmem [shape: bf16[300,10], index: 1, kind: input, shape index: {}]   ;;  %s530_s2 = inlined_call_operand.vmem [shape: f32[1,10], index: 2, kind: input, shape index: {}]   ;;  %s531_s3 = inlined_call_operand.hbm [shape: f32[2,10], index: 3, kind: output, shape index: {}]  }
   0x1   :  { %v377_v0 = vld [vmem:[%s529_s1 + $0x40] sm:$0xff]   ;;  %363 = vmatprep.subr.bf16.mxu1 %v421_v2  ;;  %v379_v3 = vld [vmem:[%s529_s1 + $0x48] sm:$0xff]   ;;  %v381_v5 = vld [vmem:[%s529_s1 + $0x50] sm:$0xff]   ;;  %369 = vmatprep.mubr.msk.bf16.mxu1 %vm422_vm0, %v421_v2 }
   0x2   :  { %v378_v1 = vld [vmem:[%s529_s1] sm:$0xff]   ;;  %337 = vmatprep.subr.bf16.mxu0 %v377_v0  ;;  %v380_v4 = vld [vmem:[%s529_s1 + $0x8] sm:$0xff]   ;;  %v382_v6 = vld [vmem:[%s529_s1 + $0x10] sm:$0xff]  }
   0x3   :  { %338 = vmatpush3.bf16.msra.mxu0 %v378_v1  ;;  %v383_v7 = vld [vmem:[%s529_s1 + $0x58] sm:$0xff]   ;;  %v385_v9 = vld [vmem:[%s529_s1 + $0x60] sm:$0xff]   ;;  %v392_v12 = vld [vmem:[%s529_s1 + $0x88] sm:$0xff]  }
   0x4   :  { %339 = vmatprep.subr.bf16.mxu0 %v379_v3  ;;  %v384_v8 = vld [vmem:[%s529_s1 + $0x18] sm:$0xff]   ;;  %v389_v10 = vld [vmem:[%s529_s1 + $0x80] sm:$0xff]   ;;  %v387_v13 = vld [vmem:[%s529_s1 + $0x68] sm:$0xff]  }
   0x5   :  { %v386_v11 = vld [vmem:[%s529_s1 + $0x20] sm:$0xff]   ;;  %364 = vmatpush3.bf16.msra.mxu1 %v389_v10  ;;  %v388_v15 = vld [vmem:[%s529_s1 + $0x28] sm:$0xff]   ;;  %v395_v16 = vld [vmem:[%s529_s1 + $0x90] sm:$0x3f]  }
   0x6   :  { %365 = vmatprep.subr.bf16.mxu1 %v421_v2  ;;  %v23_v17 = vld [vmem:[%s528_s0] sm:$0x3f] }
   0x7   :  { %340 = vmatpush3.bf16.msra.mxu0 %v380_v4 }
   0x8   :  { %341 = vmatprep.subr.bf16.mxu0 %v381_v5 }
   0x9   :  { %366 = vmatpush3.bf16.msra.mxu1 %v392_v12 }
   0xa   :  { %367 = vmatprep.subr.bf16.mxu1 %v421_v2 }
   0xb   :  { %342 = vmatpush3.bf16.msra.mxu0 %v382_v6 }
   0xc   :  { %343 = vmatprep.subr.bf16.mxu0 %v383_v7 }
   0xf   :  { %344 = vmatpush3.bf16.msra.mxu0 %v384_v8 }
  0x10   :  { %345 = vmatprep.subr.bf16.mxu0 %v385_v9 }
  0x13   :  { %346 = vmatpush3.bf16.msra.mxu0 %v386_v11 }
  0x14   :  { %8 = vsyncpa [#allocation4], 0  ;;  %347 = vmatprep.subr.bf16.mxu0 %v387_v13  ;;  %v390_v18 = vld [vmem:[%s529_s1 + $0x70] sm:$0xff]   ;;  %v204_v19 = vsel %vm202_vm1, %v395_v16, 0  ;;  %v423_v20 = vmov 1983009808   ;;  %v25_v23 = vcombine.high %v23_v17, %v23_v17 }
  0x15   :  { %v27_v21 = vunpack.c.l.s4 %v423_v20  ;;  %v30_v22 = vshrl.u32 %v29_v14, 7  ;;  %368 = vmatpush3.bf16.msra.mxu1 %v204_v19  ;;  %v391_v25 = vld [vmem:[%s529_s1 + $0x30] sm:$0xff]   ;;  %v393_v26 = vld [vmem:[%s529_s1 + $0x78] sm:$0xff]   ;;  %vm198_vm2 = vcmask 359424   ;;  %vm20_vm3 = vcmask 74752   ;;  %s424_s25 = smov [#allocation3]  }
  0x16   :  { %v394_v30 = vld [vmem:[%s529_s1 + $0x38] sm:$0xff]   ;;  %21 = vst.msk [vmem:[#allocation2] sm:$0x3] %vm20_vm3, %v421_v2  ;;  %v336_v47 = vld [vmem:[%s530_s2] ss:$0 sm:$0xff]  ;;  %s308_s26 = sshll.u32 %s424_s25, 4  ;;  %s309_s26 = int_to_ptr.vmem [resolvable:$true] %s308_s26 }
  0x17   :  { %v28_v24 = vunpack.c.0.s8 %v27_v21  ;;  %348 = vmatpush3.bf16.msra.mxu0 %v388_v15  ;;  %s397_s27 = scalar_lea.vmem %s309_s26, 32  ;;  %p402_p1 = scmp.lt.s32.totalorder %s309_s26, %s309_s26 }
  0x18   :  { %349 = vmatprep.subr.bf16.mxu0 %v390_v18  ;;  %p398_p0 = scmp.ne.s32.totalorder %s309_s26, %s397_s27  ;;  %p403_p2 = scmp.lt.s32.totalorder %s397_s27, %s397_s27 }
  0x19   :  { %v31_v27 = vsub.s32 %v28_v24, %v30_v22 }
  0x1a   :  { %p404_p3 = por %p403_p2, %p402_p1 }
  0x1b   :  { %v32_v28 = vrot.slane %v23_v17, %v31_v27  ;;  %v39_v29 = vrot.slane %v25_v23, %v31_v27  ;;  %350 = vmatpush3.bf16.msra.mxu0 %v391_v25 }
  0x1c   :  { %351 = vmatprep.subr.bf16.mxu0 %v393_v26  ;;  %p405_p4 = pnand %p404_p3, %p398_p0 }
  0x1d   :  { %v40_v31 = vcombine.high %v32_v28, %v32_v28  ;;  %v46_v32 = vpack.c.bf16 %v39_v29, %v39_v29  ;;  %v44_v34 = vpack.c.bf16 %v32_v28, %v32_v28  ;;  %v22_v44 = vld [vmem:[#allocation2] sm:$0x3] }
  0x1f   :  { %v45_v33 = vpack.c.bf16 %v40_v31, %v40_v31  ;;  %370 = vmatmul.mubr.msk.bf16.vlgmr.msra.gmra.mrb[0].mxu1 %vm198_vm2, %v46_v32  ;;  %352 = vmatpush3.bf16.msra.mxu0 %v394_v30 }
  0x21   :  { %238 = vmatprep.mubr.bf16.mxu0 %v45_v33 }
  0x22   :  { %239 = vmatmul.mubr.bf16.vlgmr.msra.gmra.mrb[0].mxu0 %v44_v34 }
  0xf2   :  { %v280_v35 = vpop.f32.mrb[0].mxu1 }
  0xf3   :  { %v371_v36 = vpop.f32.mrb[1].mxu1 }
  0xf4   :  { %v283_v37 = vpop.f32.mrb[2].mxu1 }
  0xf5   :  { %v372_v38 = vpop.f32.mrb[3].mxu1  ;;  %v353_v39 = vpop.f32.mrb[0].mxu0 }
  0xf6   :  { %v354_v40 = vpop.f32.mrb[1].mxu0 }
  0xf7   :  { %v355_v41 = vadd.f32 %v354_v40, %v353_v39  ;;  %v356_v42 = vpop.f32.mrb[2].mxu0 }
  0xf8   :  { %v357_v43 = vpop.f32.mrb[3].mxu0 }
  0xf9   :  { %v281_v45 = vadd.f32 %v355_v41, %v280_v35 }
  0xfb   :  { %v286_v46 = vadd.f32 %v281_v45, %v22_v44 }
  0xfd   :  { %288 = vst.msk [vmem:[#allocation2] sm:$0x3] %vm20_vm3, %v286_v46 }
 0x104   :  { %v292_v48 = vld [vmem:[#allocation2] sm:$0x3] }
 0x105   :  { %v300_v49 = vadd.f32 %v336_v47, %v292_v48 }
 0x107   :  { %301 = vst.msk [vmem:[#allocation3] sm:$0x3] %vm20_vm3, %v300_v49 }
 0x108   :  { %408 = shalt.err (!%p405_p4)
}
 0x109   :  { %s409_s30 = scalar_lea.hbm %s531_s3, 32 }
 0x10a   :  { %p410_p5 = scmp.ne.s32.totalorder %s531_s3, %s409_s30  ;;  %p413_p6 = scmp.lt.u32.totalorder %s409_s30, %s531_s3 }
 0x10c   :  { %p415_p7 = pnand %p413_p6, %p410_p5 }
 0x10e   :  { %418 = shalt.err (!%p415_p7)
}
 0x10f   :  { %311 = dma.vmem_to_hbm [thread:$0]  %s309_s26, 32, %s531_s3, [#allocation4]  }
 0x110   :  { %419 = dma.done.wait [#allocation4], 32  }
 0x111   :  { %420 = vsyncadd [#allocation4], 4294967264 }
 0x112   :  { %315 = vsyncpa [#allocation4], 1 }

</bundles_post_ra>
